<compile_context>
chip_gen: v5e
topology: v5e:2x2
jax: 0.10.0
libtpu: 0.0.40
codegen_flags: <defaults>
</compile_context>

<pallas_src>
import numpy as np

import jax
import jax.numpy as jnp
from jax import lax
from jax.experimental import pallas as pl
from jax.experimental.pallas import tpu as pltpu


# ---------------------------------------------------------------------------
# Row-packing constants (per image)
#   conv1 / im2col rows : q*256 + hp*16 + wp, q = 2*dh + dw, hp,wp in 0..13
#   pool1 (compact)     : hp*16 + wp                      -> 224 rows
#   conv2 rows          : ho*16 + wo, ho,wo in 0..9       -> 154 rows computed
#   pool2 (valid rows)  : 32*hq + 2*wq, hq,wq in 0..4
# ---------------------------------------------------------------------------
_NROWS1 = 1024        # 4 quadrants * 256
_NPOOL1 = 224         # 14*16
_NCONV2 = 154         # 9*16 + 10
_NHMAX2 = 153
_NPOOL2 = 137         # 32*4 + 2*4 + 1


def _lenet_kernel(x25_ref, w1_ref, b1_ref, w2_ref, b2_ref,
                  fw1_ref, fb1_ref, fw2_ref, fb2_ref, fw3_ref, fb3_ref,
                  out_ref):
    f32, bf16 = jnp.float32, jnp.bfloat16

    # ---- conv1 (5x5, 1->6, pad 2) as ONE MXU dot over im2col patches -------
    x25 = x25_ref[...].reshape(_NROWS1, 25)                       # (1024, 25) bf16
    r1 = jnp.dot(x25, w1_ref[...], preferred_element_type=f32)    # (1024, 6)
    r1 = jnp.maximum(r1 + b1_ref[...], 0.0)

    # ---- pool1 (2x2/2) + compaction: the host packs im2col rows by pooling
    # quadrant, so this is 3 maxes of sublane-ALIGNED slices and the result is
    # already the dense 14x14 grid (rows hp*16 + wp). ------------------------
    m1 = jnp.maximum(jnp.maximum(r1[0:_NPOOL1], r1[256:256 + _NPOOL1]),
                     jnp.maximum(r1[512:512 + _NPOOL1], r1[768:768 + _NPOOL1]))
    # m1: (224, 6) f32

    # ---- conv2 (5x5, 6->16): in-kernel im2col = lane-concat of 25 CONTIGUOUS
    # row-offset slices of m1, then ONE K=150 MXU dot with f32 accumulation. -
    patches = jnp.concatenate(
        [m1[16 * i + j: 16 * i + j + _NCONV2]
         for i in range(5) for j in range(5)], axis=1)            # (154, 150) f32
    r2 = jnp.dot(patches.astype(bf16), w2_ref[...],
                 preferred_element_type=f32)                      # (154, 16)
    r2 = jnp.maximum(r2 + b2_ref[...], 0.0)                       # rows ho*16 + wo

    # ---- pool2: horizontal max once (single misaligned slice), then an
    # aligned vertical max (offset 16). --------------------------------------
    hm2 = jnp.maximum(r2[0:_NHMAX2], r2[1:1 + _NHMAX2])           # (153, 16)
    m2 = jnp.maximum(hm2[0:_NPOOL2], hm2[16:16 + _NPOOL2])        # (137, 16)
    # valid pool2 values sit at rows 32*hq + 2*wq

    # ---- gather the 25 valid pool2 rows -> (1, 400) fc input, lane order
    # (s, o); torch's NCHW flatten (o*25 + s) is folded into fw1 host-side. --
    xfc = jnp.concatenate(
        [m2[32 * (s // 5) + 2 * (s % 5): 32 * (s // 5) + 2 * (s % 5) + 1]
         for s in range(25)], axis=1)                             # (1, 400) f32

    h1 = jnp.dot(xfc.astype(bf16), fw1_ref[...], preferred_element_type=f32)
    h1 = jnp.maximum(h1 + fb1_ref[...], 0.0)
    h2 = jnp.dot(h1.astype(bf16), fw2_ref[...], preferred_element_type=f32)
    h2 = jnp.maximum(h2 + fb2_ref[...], 0.0)
    h3 = jnp.dot(h2.astype(bf16), fw3_ref[...], preferred_element_type=f32)
    out_ref[...] = (h3 + fb3_ref[...]).reshape(1, 1, 10).astype(out_ref.dtype)


def _conv1_patch_indices():
    """Gather indices into the flattened 32x32 zero-padded image.

    Row r = (2*dh + dw)*256 + hp*16 + wp holds the 5x5 conv1 patch (tap
    t = 5*di + dj) for output position (2*hp + dh, 2*wp + dw).  Unused rows
    point at the padded (0, 0) corner, which is always zero.
    """
    idx = np.zeros((_NROWS1, 25), dtype=np.int32)
    hp = np.arange(14).reshape(14, 1, 1, 1)
    wp = np.arange(14).reshape(1, 14, 1, 1)
    di = np.arange(5).reshape(1, 1, 5, 1)
    dj = np.arange(5).reshape(1, 1, 1, 5)
    taps = (di * 5 + dj).reshape(1, 25)
    for dh in range(2):
        for dw in range(2):
            rows = ((2 * dh + dw) * 256 + hp * 16 + wp).reshape(196, 1)
            src = ((2 * hp + dh + di) * 32 + (2 * wp + dw + dj)).reshape(196, 25)
            idx[rows, taps] = src
    return idx


def lenet_forward(x, params):
    """x: (B, 1, 28, 28) float32 NCHW -> (B, 10) float32 logits."""
    B, C, H, W = x.shape
    assert (C, H, W) == (1, 28, 28)
    bf16, f32 = jnp.bfloat16, jnp.float32

    # ---- host-side prep: a single pad + gather builds the quadrant-ordered
    # conv1 patch matrix (no intermediate activation ever touches HBM). ------
    xpad = jnp.pad(x[:, 0].astype(f32), ((0, 0), (2, 2), (2, 2)))  # (B, 32, 32)
    idx = jnp.asarray(_conv1_patch_indices().reshape(-1))
    x25 = jnp.take(xpad.reshape(B, 32 * 32), idx, axis=1)
    x25 = x25.reshape(B, _NROWS1, 25).astype(bf16)

    w1 = params["c1w"].reshape(6, 25).T.astype(bf16)               # (25, 6)
    b1 = params["c1b"].reshape(1, 6).astype(f32)
    # conv2 weight rows ordered ((i*5 + j)*6 + c) to match the in-kernel concat.
    w2 = params["c2w"].transpose(2, 3, 1, 0).reshape(150, 16).astype(bf16)
    b2 = params["c2b"].reshape(1, 16).astype(f32)
    # fc1 weight rows permuted from torch's (c*25 + s) to the kernel's (s*16 + c).
    fw1 = (params["f1w"].reshape(120, 16, 25).transpose(2, 1, 0)
           .reshape(400, 120).astype(bf16))
    fb1 = params["f1b"].reshape(1, 120).astype(f32)
    fw2 = params["f2w"].T.astype(bf16)
    fb2 = params["f2b"].reshape(1, 84).astype(f32)
    fw3 = params["f3w"].T.astype(bf16)
    fb3 = params["f3b"].reshape(1, 10).astype(f32)

    weights = (w1, b1, w2, b2, fw1, fb1, fw2, fb2, fw3, fb3)

    def _wspec(shape):
        zeros = (0,) * len(shape)
        return pl.BlockSpec(shape, lambda b, _z=zeros: _z)

    flops = 2 * B * (_NROWS1 * 25 * 6 + _NCONV2 * 150 * 16
                     + 400 * 120 + 120 * 84 + 84 * 10)
    bytes_accessed = (x25.size * x25.dtype.itemsize
                      + sum(int(np.prod(w.shape)) * w.dtype.itemsize
                            for w in weights)
                      + B * 10 * 4)

    out = pl.pallas_call(
        _lenet_kernel,
        out_shape=jax.ShapeDtypeStruct((B, 1, 10), f32),
        grid=(B,),
        in_specs=[pl.BlockSpec((1, _NROWS1, 25), lambda b: (b, 0, 0))]
                 + [_wspec(w.shape) for w in weights],
        out_specs=pl.BlockSpec((1, 1, 10), lambda b: (b, 0, 0)),
        compiler_params=pltpu.CompilerParams(
            dimension_semantics=("parallel",),
            vmem_limit_bytes=32 * 1024 * 1024,
        ),
        cost_estimate=pl.CostEstimate(flops=flops, transcendentals=0,
                                      bytes_accessed=bytes_accessed),
    )(x25, *weights)
    return out[:, 0, :]


# ---------------------------------------------------------------------------
# Pure-JAX reference (matches the PyTorch module) for a self-check
# ---------------------------------------------------------------------------

def _lenet_reference(x, p):
    y = lax.conv_general_dilated(x, p["c1w"], (1, 1), ((2, 2), (2, 2)),
                                 dimension_numbers=("NCHW", "OIHW", "NCHW"))
    y = jax.nn.relu(y + p["c1b"].reshape(1, -1, 1, 1))
    y = lax.reduce_window(y, -jnp.inf, lax.max, (1, 1, 2, 2), (1, 1, 2, 2), "VALID")
    y = lax.conv_general_dilated(y, p["c2w"], (1, 1), ((0, 0), (0, 0)),
                                 dimension_numbers=("NCHW", "OIHW", "NCHW"))
    y = jax.nn.relu(y + p["c2b"].reshape(1, -1, 1, 1))
    y = lax.reduce_window(y, -jnp.inf, lax.max, (1, 1, 2, 2), (1, 1, 2, 2), "VALID")
    y = y.reshape(y.shape[0], -1)
    y = jax.nn.relu(y @ p["f1w"].T + p["f1b"])
    y = jax.nn.relu(y @ p["f2w"].T + p["f2b"])
    return y @ p["f3w"].T + p["f3b"]


if __name__ == "__main__":
    key = jax.random.PRNGKey(0)
    keys = jax.random.split(key, 11)

    def init(k, shape, scale=0.1):
        return scale * jax.random.normal(k, shape, dtype=jnp.float32)

    # Deterministic synthetic parameters (shapes from LeNet.__init__, torch layout).
    params = {
        "c1w": init(keys[0], (6, 1, 5, 5)),
        "c1b": init(keys[1], (6,)),
        "c2w": init(keys[2], (16, 6, 5, 5)),
        "c2b": init(keys[3], (16,)),
        "f1w": init(keys[4], (120, 400)),   # torch Linear weight: (out, in)
        "f1b": init(keys[5], (120,)),
        "f2w": init(keys[6], (84, 120)),
        "f2b": init(keys[7], (84,)),
        "f3w": init(keys[8], (10, 84)),
        "f3b": init(keys[9], (10,)),
    }

    # LeNet expects 28x28 single-channel input (so the flatten is 16*5*5 = 400).
    x = jax.random.normal(keys[10], (2, 1, 28, 28), dtype=jnp.float32)

    out = jax.jit(lenet_forward)(x, params)
    jax.block_until_ready(out)

    ref = _lenet_reference(x, params)
    err = float(jnp.max(jnp.abs(out - ref)))

    assert out.shape == (2, 10) and out.dtype == jnp.float32
    # bf16 MXU operands with f32 accumulation: expect ~1e-2 absolute error.
    assert err < 0.1, f"kernel/reference mismatch: max abs err {err}"
    print("KERNEL_OK")
</pallas_src>

<mosaic_0001>
module attributes {stable_mosaic.version = 11 : i64} {
  func.func @_lenet_kernel(%arg0: i32, %arg1: memref<1x1024x25xbf16, #tpu.memory_space<vmem>>, %arg2: memref<25x6xbf16, #tpu.memory_space<vmem>>, %arg3: memref<1x6xf32, #tpu.memory_space<vmem>>, %arg4: memref<150x16xbf16, #tpu.memory_space<vmem>>, %arg5: memref<1x16xf32, #tpu.memory_space<vmem>>, %arg6: memref<400x120xbf16, #tpu.memory_space<vmem>>, %arg7: memref<1x120xf32, #tpu.memory_space<vmem>>, %arg8: memref<120x84xbf16, #tpu.memory_space<vmem>>, %arg9: memref<1x84xf32, #tpu.memory_space<vmem>>, %arg10: memref<84x10xbf16, #tpu.memory_space<vmem>>, %arg11: memref<1x10xf32, #tpu.memory_space<vmem>>, %arg12: memref<1x1x10xf32, #tpu.memory_space<vmem>>) attributes {dimension_semantics = [#tpu.dimension_semantics<parallel>], iteration_bounds = array<i64: 2>, scalar_prefetch = 0 : i64, scratch_operands = 0 : i64, tpu.core_type = #tpu.core_type<tc>, window_params = [{transform_indices = @transform_0, window_bounds = array<i64: 1, 1024, 25>}, {pipeline_mode = #tpu.pipeline_mode<synchronous>, transform_indices = @transform_1, window_bounds = array<i64: 25, 6>}, {pipeline_mode = #tpu.pipeline_mode<synchronous>, transform_indices = @transform_2, window_bounds = array<i64: 1, 6>}, {pipeline_mode = #tpu.pipeline_mode<synchronous>, transform_indices = @transform_3, window_bounds = array<i64: 150, 16>}, {pipeline_mode = #tpu.pipeline_mode<synchronous>, transform_indices = @transform_4, window_bounds = array<i64: 1, 16>}, {pipeline_mode = #tpu.pipeline_mode<synchronous>, transform_indices = @transform_5, window_bounds = array<i64: 400, 120>}, {pipeline_mode = #tpu.pipeline_mode<synchronous>, transform_indices = @transform_6, window_bounds = array<i64: 1, 120>}, {pipeline_mode = #tpu.pipeline_mode<synchronous>, transform_indices = @transform_7, window_bounds = array<i64: 120, 84>}, {pipeline_mode = #tpu.pipeline_mode<synchronous>, transform_indices = @transform_8, window_bounds = array<i64: 1, 84>}, {pipeline_mode = #tpu.pipeline_mode<synchronous>, transform_indices = @transform_9, window_bounds = array<i64: 84, 10>}, {pipeline_mode = #tpu.pipeline_mode<synchronous>, transform_indices = @transform_10, window_bounds = array<i64: 1, 10>}, {transform_indices = @transform_11, window_bounds = array<i64: 1, 1, 10>}]} {
    %c0 = arith.constant 0 : index
    %c0_0 = arith.constant 0 : index
    %c0_1 = arith.constant 0 : index
    %0 = vector.load %arg1[%c0, %c0_0, %c0_1] : memref<1x1024x25xbf16, #tpu.memory_space<vmem>>, vector<1x1024x25xbf16>
    %1 = vector.shape_cast %0 : vector<1x1024x25xbf16> to vector<1024x25xbf16>
    %c0_2 = arith.constant 0 : index
    %c0_3 = arith.constant 0 : index
    %2 = vector.load %arg2[%c0_2, %c0_3] : memref<25x6xbf16, #tpu.memory_space<vmem>>, vector<25x6xbf16>
    %cst = arith.constant dense<0.000000e+00> : vector<1024x6xf32>
    %3 = tpu.matmul %1, %2, %cst {dimension_numbers = #tpu.dot_dimension_numbers<[1], [0], [0], [1], [0, 0, 1, 1], [], []>} : vector<1024x25xbf16>, vector<25x6xbf16>, vector<1024x6xf32> -> vector<1024x6xf32>
    %c0_4 = arith.constant 0 : index
    %c0_5 = arith.constant 0 : index
    %4 = vector.load %arg3[%c0_4, %c0_5] : memref<1x6xf32, #tpu.memory_space<vmem>>, vector<1x6xf32>
    %5 = vector.broadcast %4 : vector<1x6xf32> to vector<1024x6xf32>
    %6 = arith.addf %3, %5 : vector<1024x6xf32>
    %cst_6 = arith.constant 0.000000e+00 : f32
    %7 = vector.broadcast %cst_6 : f32 to vector<1024x6xf32>
    %8 = arith.maximumf %6, %7 : vector<1024x6xf32>
    %9 = vector.extract_strided_slice %8 {offsets = [0, 0], sizes = [224, 6], strides = [1, 1]} : vector<1024x6xf32> to vector<224x6xf32>
    %10 = vector.extract_strided_slice %8 {offsets = [256, 0], sizes = [224, 6], strides = [1, 1]} : vector<1024x6xf32> to vector<224x6xf32>
    %11 = arith.maximumf %9, %10 : vector<224x6xf32>
    %12 = vector.extract_strided_slice %8 {offsets = [512, 0], sizes = [224, 6], strides = [1, 1]} : vector<1024x6xf32> to vector<224x6xf32>
    %13 = vector.extract_strided_slice %8 {offsets = [768, 0], sizes = [224, 6], strides = [1, 1]} : vector<1024x6xf32> to vector<224x6xf32>
    %14 = arith.maximumf %12, %13 : vector<224x6xf32>
    %15 = arith.maximumf %11, %14 : vector<224x6xf32>
    %16 = vector.extract_strided_slice %15 {offsets = [0, 0], sizes = [154, 6], strides = [1, 1]} : vector<224x6xf32> to vector<154x6xf32>
    %17 = vector.extract_strided_slice %15 {offsets = [1, 0], sizes = [154, 6], strides = [1, 1]} : vector<224x6xf32> to vector<154x6xf32>
    %18 = vector.extract_strided_slice %15 {offsets = [2, 0], sizes = [154, 6], strides = [1, 1]} : vector<224x6xf32> to vector<154x6xf32>
    %19 = vector.extract_strided_slice %15 {offsets = [3, 0], sizes = [154, 6], strides = [1, 1]} : vector<224x6xf32> to vector<154x6xf32>
    %20 = vector.extract_strided_slice %15 {offsets = [4, 0], sizes = [154, 6], strides = [1, 1]} : vector<224x6xf32> to vector<154x6xf32>
    %21 = vector.extract_strided_slice %15 {offsets = [16, 0], sizes = [154, 6], strides = [1, 1]} : vector<224x6xf32> to vector<154x6xf32>
    %22 = vector.extract_strided_slice %15 {offsets = [17, 0], sizes = [154, 6], strides = [1, 1]} : vector<224x6xf32> to vector<154x6xf32>
    %23 = vector.extract_strided_slice %15 {offsets = [18, 0], sizes = [154, 6], strides = [1, 1]} : vector<224x6xf32> to vector<154x6xf32>
    %24 = vector.extract_strided_slice %15 {offsets = [19, 0], sizes = [154, 6], strides = [1, 1]} : vector<224x6xf32> to vector<154x6xf32>
    %25 = vector.extract_strided_slice %15 {offsets = [20, 0], sizes = [154, 6], strides = [1, 1]} : vector<224x6xf32> to vector<154x6xf32>
    %26 = vector.extract_strided_slice %15 {offsets = [32, 0], sizes = [154, 6], strides = [1, 1]} : vector<224x6xf32> to vector<154x6xf32>
    %27 = vector.extract_strided_slice %15 {offsets = [33, 0], sizes = [154, 6], strides = [1, 1]} : vector<224x6xf32> to vector<154x6xf32>
    %28 = vector.extract_strided_slice %15 {offsets = [34, 0], sizes = [154, 6], strides = [1, 1]} : vector<224x6xf32> to vector<154x6xf32>
    %29 = vector.extract_strided_slice %15 {offsets = [35, 0], sizes = [154, 6], strides = [1, 1]} : vector<224x6xf32> to vector<154x6xf32>
    %30 = vector.extract_strided_slice %15 {offsets = [36, 0], sizes = [154, 6], strides = [1, 1]} : vector<224x6xf32> to vector<154x6xf32>
    %31 = vector.extract_strided_slice %15 {offsets = [48, 0], sizes = [154, 6], strides = [1, 1]} : vector<224x6xf32> to vector<154x6xf32>
    %32 = vector.extract_strided_slice %15 {offsets = [49, 0], sizes = [154, 6], strides = [1, 1]} : vector<224x6xf32> to vector<154x6xf32>
    %33 = vector.extract_strided_slice %15 {offsets = [50, 0], sizes = [154, 6], strides = [1, 1]} : vector<224x6xf32> to vector<154x6xf32>
    %34 = vector.extract_strided_slice %15 {offsets = [51, 0], sizes = [154, 6], strides = [1, 1]} : vector<224x6xf32> to vector<154x6xf32>
    %35 = vector.extract_strided_slice %15 {offsets = [52, 0], sizes = [154, 6], strides = [1, 1]} : vector<224x6xf32> to vector<154x6xf32>
    %36 = vector.extract_strided_slice %15 {offsets = [64, 0], sizes = [154, 6], strides = [1, 1]} : vector<224x6xf32> to vector<154x6xf32>
    %37 = vector.extract_strided_slice %15 {offsets = [65, 0], sizes = [154, 6], strides = [1, 1]} : vector<224x6xf32> to vector<154x6xf32>
    %38 = vector.extract_strided_slice %15 {offsets = [66, 0], sizes = [154, 6], strides = [1, 1]} : vector<224x6xf32> to vector<154x6xf32>
    %39 = vector.extract_strided_slice %15 {offsets = [67, 0], sizes = [154, 6], strides = [1, 1]} : vector<224x6xf32> to vector<154x6xf32>
    %40 = vector.extract_strided_slice %15 {offsets = [68, 0], sizes = [154, 6], strides = [1, 1]} : vector<224x6xf32> to vector<154x6xf32>
    %41 = tpu.concatenate %16, %17, %18, %19, %20, %21, %22, %23, %24, %25, %26, %27, %28, %29, %30, %31 in 1 : vector<154x6xf32>, vector<154x6xf32>, vector<154x6xf32>, vector<154x6xf32>, vector<154x6xf32>, vector<154x6xf32>, vector<154x6xf32>, vector<154x6xf32>, vector<154x6xf32>, vector<154x6xf32>, vector<154x6xf32>, vector<154x6xf32>, vector<154x6xf32>, vector<154x6xf32>, vector<154x6xf32>, vector<154x6xf32> -> vector<154x96xf32>
    %42 = tpu.concatenate %32, %33, %34, %35, %36, %37, %38, %39, %40 in 1 : vector<154x6xf32>, vector<154x6xf32>, vector<154x6xf32>, vector<154x6xf32>, vector<154x6xf32>, vector<154x6xf32>, vector<154x6xf32>, vector<154x6xf32>, vector<154x6xf32> -> vector<154x54xf32>
    %43 = tpu.concatenate %41, %42 in 1 : vector<154x96xf32>, vector<154x54xf32> -> vector<154x150xf32>
    %44 = arith.truncf %43 : vector<154x150xf32> to vector<154x150xbf16>
    %c0_7 = arith.constant 0 : index
    %c0_8 = arith.constant 0 : index
    %45 = vector.load %arg4[%c0_7, %c0_8] : memref<150x16xbf16, #tpu.memory_space<vmem>>, vector<150x16xbf16>
    %cst_9 = arith.constant dense<0.000000e+00> : vector<154x16xf32>
    %46 = tpu.matmul %44, %45, %cst_9 {dimension_numbers = #tpu.dot_dimension_numbers<[1], [0], [0], [1], [0, 0, 1, 1], [], []>} : vector<154x150xbf16>, vector<150x16xbf16>, vector<154x16xf32> -> vector<154x16xf32>
    %c0_10 = arith.constant 0 : index
    %c0_11 = arith.constant 0 : index
    %47 = vector.load %arg5[%c0_10, %c0_11] : memref<1x16xf32, #tpu.memory_space<vmem>>, vector<1x16xf32>
    %48 = vector.broadcast %47 : vector<1x16xf32> to vector<154x16xf32>
    %49 = arith.addf %46, %48 : vector<154x16xf32>
    %cst_12 = arith.constant 0.000000e+00 : f32
    %50 = vector.broadcast %cst_12 : f32 to vector<154x16xf32>
    %51 = arith.maximumf %49, %50 : vector<154x16xf32>
    %52 = vector.extract_strided_slice %51 {offsets = [0, 0], sizes = [153, 16], strides = [1, 1]} : vector<154x16xf32> to vector<153x16xf32>
    %53 = vector.extract_strided_slice %51 {offsets = [1, 0], sizes = [153, 16], strides = [1, 1]} : vector<154x16xf32> to vector<153x16xf32>
    %54 = arith.maximumf %52, %53 : vector<153x16xf32>
    %55 = vector.extract_strided_slice %54 {offsets = [0, 0], sizes = [137, 16], strides = [1, 1]} : vector<153x16xf32> to vector<137x16xf32>
    %56 = vector.extract_strided_slice %54 {offsets = [16, 0], sizes = [137, 16], strides = [1, 1]} : vector<153x16xf32> to vector<137x16xf32>
    %57 = arith.maximumf %55, %56 : vector<137x16xf32>
    %58 = vector.extract_strided_slice %57 {offsets = [0, 0], sizes = [1, 16], strides = [1, 1]} : vector<137x16xf32> to vector<1x16xf32>
    %59 = vector.extract_strided_slice %57 {offsets = [2, 0], sizes = [1, 16], strides = [1, 1]} : vector<137x16xf32> to vector<1x16xf32>
    %60 = vector.extract_strided_slice %57 {offsets = [4, 0], sizes = [1, 16], strides = [1, 1]} : vector<137x16xf32> to vector<1x16xf32>
    %61 = vector.extract_strided_slice %57 {offsets = [6, 0], sizes = [1, 16], strides = [1, 1]} : vector<137x16xf32> to vector<1x16xf32>
    %62 = vector.extract_strided_slice %57 {offsets = [8, 0], sizes = [1, 16], strides = [1, 1]} : vector<137x16xf32> to vector<1x16xf32>
    %63 = vector.extract_strided_slice %57 {offsets = [32, 0], sizes = [1, 16], strides = [1, 1]} : vector<137x16xf32> to vector<1x16xf32>
    %64 = vector.extract_strided_slice %57 {offsets = [34, 0], sizes = [1, 16], strides = [1, 1]} : vector<137x16xf32> to vector<1x16xf32>
    %65 = vector.extract_strided_slice %57 {offsets = [36, 0], sizes = [1, 16], strides = [1, 1]} : vector<137x16xf32> to vector<1x16xf32>
    %66 = vector.extract_strided_slice %57 {offsets = [38, 0], sizes = [1, 16], strides = [1, 1]} : vector<137x16xf32> to vector<1x16xf32>
    %67 = vector.extract_strided_slice %57 {offsets = [40, 0], sizes = [1, 16], strides = [1, 1]} : vector<137x16xf32> to vector<1x16xf32>
    %68 = vector.extract_strided_slice %57 {offsets = [64, 0], sizes = [1, 16], strides = [1, 1]} : vector<137x16xf32> to vector<1x16xf32>
    %69 = vector.extract_strided_slice %57 {offsets = [66, 0], sizes = [1, 16], strides = [1, 1]} : vector<137x16xf32> to vector<1x16xf32>
    %70 = vector.extract_strided_slice %57 {offsets = [68, 0], sizes = [1, 16], strides = [1, 1]} : vector<137x16xf32> to vector<1x16xf32>
    %71 = vector.extract_strided_slice %57 {offsets = [70, 0], sizes = [1, 16], strides = [1, 1]} : vector<137x16xf32> to vector<1x16xf32>
    %72 = vector.extract_strided_slice %57 {offsets = [72, 0], sizes = [1, 16], strides = [1, 1]} : vector<137x16xf32> to vector<1x16xf32>
    %73 = vector.extract_strided_slice %57 {offsets = [96, 0], sizes = [1, 16], strides = [1, 1]} : vector<137x16xf32> to vector<1x16xf32>
    %74 = vector.extract_strided_slice %57 {offsets = [98, 0], sizes = [1, 16], strides = [1, 1]} : vector<137x16xf32> to vector<1x16xf32>
    %75 = vector.extract_strided_slice %57 {offsets = [100, 0], sizes = [1, 16], strides = [1, 1]} : vector<137x16xf32> to vector<1x16xf32>
    %76 = vector.extract_strided_slice %57 {offsets = [102, 0], sizes = [1, 16], strides = [1, 1]} : vector<137x16xf32> to vector<1x16xf32>
    %77 = vector.extract_strided_slice %57 {offsets = [104, 0], sizes = [1, 16], strides = [1, 1]} : vector<137x16xf32> to vector<1x16xf32>
    %78 = vector.extract_strided_slice %57 {offsets = [128, 0], sizes = [1, 16], strides = [1, 1]} : vector<137x16xf32> to vector<1x16xf32>
    %79 = vector.extract_strided_slice %57 {offsets = [130, 0], sizes = [1, 16], strides = [1, 1]} : vector<137x16xf32> to vector<1x16xf32>
    %80 = vector.extract_strided_slice %57 {offsets = [132, 0], sizes = [1, 16], strides = [1, 1]} : vector<137x16xf32> to vector<1x16xf32>
    %81 = vector.extract_strided_slice %57 {offsets = [134, 0], sizes = [1, 16], strides = [1, 1]} : vector<137x16xf32> to vector<1x16xf32>
    %82 = vector.extract_strided_slice %57 {offsets = [136, 0], sizes = [1, 16], strides = [1, 1]} : vector<137x16xf32> to vector<1x16xf32>
    %83 = tpu.concatenate %58, %59, %60, %61, %62, %63, %64, %65, %66, %67, %68, %69, %70, %71, %72, %73 in 1 : vector<1x16xf32>, vector<1x16xf32>, vector<1x16xf32>, vector<1x16xf32>, vector<1x16xf32>, vector<1x16xf32>, vector<1x16xf32>, vector<1x16xf32>, vector<1x16xf32>, vector<1x16xf32>, vector<1x16xf32>, vector<1x16xf32>, vector<1x16xf32>, vector<1x16xf32>, vector<1x16xf32>, vector<1x16xf32> -> vector<1x256xf32>
    %84 = tpu.concatenate %74, %75, %76, %77, %78, %79, %80, %81, %82 in 1 : vector<1x16xf32>, vector<1x16xf32>, vector<1x16xf32>, vector<1x16xf32>, vector<1x16xf32>, vector<1x16xf32>, vector<1x16xf32>, vector<1x16xf32>, vector<1x16xf32> -> vector<1x144xf32>
    %85 = tpu.concatenate %83, %84 in 1 : vector<1x256xf32>, vector<1x144xf32> -> vector<1x400xf32>
    %86 = arith.truncf %85 : vector<1x400xf32> to vector<1x400xbf16>
    %c0_13 = arith.constant 0 : index
    %c0_14 = arith.constant 0 : index
    %87 = vector.load %arg6[%c0_13, %c0_14] : memref<400x120xbf16, #tpu.memory_space<vmem>>, vector<400x120xbf16>
    %cst_15 = arith.constant dense<0.000000e+00> : vector<1x120xf32>
    %88 = tpu.matmul %86, %87, %cst_15 {dimension_numbers = #tpu.dot_dimension_numbers<[1], [0], [0], [1], [0, 0, 1, 1], [], []>} : vector<1x400xbf16>, vector<400x120xbf16>, vector<1x120xf32> -> vector<1x120xf32>
    %c0_16 = arith.constant 0 : index
    %c0_17 = arith.constant 0 : index
    %89 = vector.load %arg7[%c0_16, %c0_17] : memref<1x120xf32, #tpu.memory_space<vmem>>, vector<1x120xf32>
    %90 = arith.addf %88, %89 : vector<1x120xf32>
    %cst_18 = arith.constant 0.000000e+00 : f32
    %91 = vector.broadcast %cst_18 : f32 to vector<1x120xf32>
    %92 = arith.maximumf %90, %91 : vector<1x120xf32>
    %93 = arith.truncf %92 : vector<1x120xf32> to vector<1x120xbf16>
    %c0_19 = arith.constant 0 : index
    %c0_20 = arith.constant 0 : index
    %94 = vector.load %arg8[%c0_19, %c0_20] : memref<120x84xbf16, #tpu.memory_space<vmem>>, vector<120x84xbf16>
    %cst_21 = arith.constant dense<0.000000e+00> : vector<1x84xf32>
    %95 = tpu.matmul %93, %94, %cst_21 {dimension_numbers = #tpu.dot_dimension_numbers<[1], [0], [0], [1], [0, 0, 1, 1], [], []>} : vector<1x120xbf16>, vector<120x84xbf16>, vector<1x84xf32> -> vector<1x84xf32>
    %c0_22 = arith.constant 0 : index
    %c0_23 = arith.constant 0 : index
    %96 = vector.load %arg9[%c0_22, %c0_23] : memref<1x84xf32, #tpu.memory_space<vmem>>, vector<1x84xf32>
    %97 = arith.addf %95, %96 : vector<1x84xf32>
    %cst_24 = arith.constant 0.000000e+00 : f32
    %98 = vector.broadcast %cst_24 : f32 to vector<1x84xf32>
    %99 = arith.maximumf %97, %98 : vector<1x84xf32>
    %100 = arith.truncf %99 : vector<1x84xf32> to vector<1x84xbf16>
    %c0_25 = arith.constant 0 : index
    %c0_26 = arith.constant 0 : index
    %101 = vector.load %arg10[%c0_25, %c0_26] : memref<84x10xbf16, #tpu.memory_space<vmem>>, vector<84x10xbf16>
    %cst_27 = arith.constant dense<0.000000e+00> : vector<1x10xf32>
    %102 = tpu.matmul %100, %101, %cst_27 {dimension_numbers = #tpu.dot_dimension_numbers<[1], [0], [0], [1], [0, 0, 1, 1], [], []>} : vector<1x84xbf16>, vector<84x10xbf16>, vector<1x10xf32> -> vector<1x10xf32>
    %c0_28 = arith.constant 0 : index
    %c0_29 = arith.constant 0 : index
    %103 = vector.load %arg11[%c0_28, %c0_29] : memref<1x10xf32, #tpu.memory_space<vmem>>, vector<1x10xf32>
    %104 = arith.addf %102, %103 : vector<1x10xf32>
    %105 = vector.shape_cast %104 : vector<1x10xf32> to vector<1x1x10xf32>
    %c0_30 = arith.constant 0 : index
    %c0_31 = arith.constant 0 : index
    %c0_32 = arith.constant 0 : index
    %106 = vector.load %arg12[%c0_30, %c0_31, %c0_32] : memref<1x1x10xf32, #tpu.memory_space<vmem>>, vector<1x1x10xf32>
    tpu.vector_store %arg12[%c0_30, %c0_31, %c0_32], %105 {strides = array<i32>} : memref<1x1x10xf32, #tpu.memory_space<vmem>>, vector<1x1x10xf32>,
    return
  }
  func.func @transform_0(%arg0: i32) -> (i32, i32, i32) {
    %c0_i32 = arith.constant 0 : i32
    %c0_i32_0 = arith.constant 0 : i32
    %c0_i32_1 = arith.constant 0 : i32
    return %arg0, %c0_i32, %c0_i32_0 : i32, i32, i32
  }
  func.func @transform_1(%arg0: i32) -> (i32, i32) {
    %c0_i32 = arith.constant 0 : i32
    %c0_i32_0 = arith.constant 0 : i32
    %c0_i32_1 = arith.constant 0 : i32
    return %c0_i32, %c0_i32_0 : i32, i32
  }
  func.func @transform_2(%arg0: i32) -> (i32, i32) {
    %c0_i32 = arith.constant 0 : i32
    %c0_i32_0 = arith.constant 0 : i32
    %c0_i32_1 = arith.constant 0 : i32
    return %c0_i32, %c0_i32_0 : i32, i32
  }
  func.func @transform_3(%arg0: i32) -> (i32, i32) {
    %c0_i32 = arith.constant 0 : i32
    %c0_i32_0 = arith.constant 0 : i32
    %c0_i32_1 = arith.constant 0 : i32
    return %c0_i32, %c0_i32_0 : i32, i32
  }
  func.func @transform_4(%arg0: i32) -> (i32, i32) {
    %c0_i32 = arith.constant 0 : i32
    %c0_i32_0 = arith.constant 0 : i32
    %c0_i32_1 = arith.constant 0 : i32
    return %c0_i32, %c0_i32_0 : i32, i32
  }
  func.func @transform_5(%arg0: i32) -> (i32, i32) {
    %c0_i32 = arith.constant 0 : i32
    %c0_i32_0 = arith.constant 0 : i32
    %c0_i32_1 = arith.constant 0 : i32
    return %c0_i32, %c0_i32_0 : i32, i32
  }
  func.func @transform_6(%arg0: i32) -> (i32, i32) {
    %c0_i32 = arith.constant 0 : i32
    %c0_i32_0 = arith.constant 0 : i32
    %c0_i32_1 = arith.constant 0 : i32
    return %c0_i32, %c0_i32_0 : i32, i32
  }
  func.func @transform_7(%arg0: i32) -> (i32, i32) {
    %c0_i32 = arith.constant 0 : i32
    %c0_i32_0 = arith.constant 0 : i32
    %c0_i32_1 = arith.constant 0 : i32
    return %c0_i32, %c0_i32_0 : i32, i32
  }
  func.func @transform_8(%arg0: i32) -> (i32, i32) {
    %c0_i32 = arith.constant 0 : i32
    %c0_i32_0 = arith.constant 0 : i32
    %c0_i32_1 = arith.constant 0 : i32
    return %c0_i32, %c0_i32_0 : i32, i32
  }
  func.func @transform_9(%arg0: i32) -> (i32, i32) {
    %c0_i32 = arith.constant 0 : i32
    %c0_i32_0 = arith.constant 0 : i32
    %c0_i32_1 = arith.constant 0 : i32
    return %c0_i32, %c0_i32_0 : i32, i32
  }
  func.func @transform_10(%arg0: i32) -> (i32, i32) {
    %c0_i32 = arith.constant 0 : i32
    %c0_i32_0 = arith.constant 0 : i32
    %c0_i32_1 = arith.constant 0 : i32
    return %c0_i32, %c0_i32_0 : i32, i32
  }
  func.func @transform_11(%arg0: i32) -> (i32, i32, i32) {
    %c0_i32 = arith.constant 0 : i32
    %c0_i32_0 = arith.constant 0 : i32
    %c0_i32_1 = arith.constant 0 : i32
    return %arg0, %c0_i32, %c0_i32_0 : i32, i32, i32
  }
}

</mosaic_0001>

<bundles_post_ra>
// kernel: lenet_forward.1
= control target key start
LH: loop header
LB: loop body
LE: loop exit
PB: predicated region body
PF: predicated region fallthrough
CT: control target
= control target key end

     0   :  { %s9576_s0 = inlined_call_operand.vmem [shape: bf16[2,1024,25], index: 0, kind: input, shape index: {}]   ;;  %s9577_s1 = inlined_call_operand.vmem [shape: bf16[25,6], index: 1, kind: input, shape index: {}]   ;;  %s9578_s2 = inlined_call_operand.vmem [shape: f32[1,6], index: 2, kind: input, shape index: {}]   ;;  %s9579_s3 = inlined_call_operand.vmem [shape: bf16[150,16], index: 3, kind: input, shape index: {}]   ;;  %s9580_s4 = inlined_call_operand.vmem [shape: f32[1,16], index: 4, kind: input, shape index: {}]   ;;  %s9581_s5 = inlined_call_operand.vmem [shape: bf16[400,120], index: 5, kind: input, shape index: {}]   ;;  %s9582_s6 = inlined_call_operand.vmem [shape: f32[1,120], index: 6, kind: input, shape index: {}]   ;;  %s9583_s7 = inlined_call_operand.vmem [shape: bf16[120,84], index: 7, kind: input, shape index: {}]   ;;  %s9584_s8 = inlined_call_operand.vmem [shape: f32[1,84], index: 8, kind: input, shape index: {}]   ;;  %s9585_s9 = inlined_call_operand.vmem [shape: bf16[84,10], index: 9, kind: input, shape index: {}]   ;;  %s9586_s10 = inlined_call_operand.vmem [shape: f32[1,10], index: 10, kind: input, shape index: {}]   ;;  %s9587_s11 = inlined_call_operand.hbm [shape: f32[2,1,10], index: 11, kind: output, shape index: {}]  }
   0x1   :  { %9818 = sst [smem:[#allocation111_spill]] %s9576_s0 }
   0x2   :  { %9819 = sst [smem:[#allocation112_spill]] %s9577_s1 }
   0x3   :  { %9820 = sst [smem:[#allocation113_spill]] %s9578_s2 }
   0x4   :  { %16 = vsyncpa [#allocation3], 0 }
   0x5   :  { %18 = vsyncpa [#allocation3 + $0x1], 0  ;;  %s6338_s17 = smov 0   ;;  %s6340_s18 = smov 0  }
   0x6   :  { %s6342_s19 = smov 0   ;;  %s6344_s20 = smov 0  }
   0x7 LB: > { %9821 = sst [smem:[#allocation5_spill]] %s6242_s17  ;;  %s6359_s21 = sadd.s32 4294967295, %s6254_s20   ;;  %s6254_s20 = sphi %s6344_s20, %s10364_s20   ;;  %s6250_s19 = sphi %s6342_s19, %s10366_s19   ;;  %s6246_s18 = sphi %s6340_s18, %s10368_s18   ;;  %s6242_s17 = sphi %s6338_s17, %s10367_s17  }
   0x8   : > { %9822 = sst [smem:[#allocation6_spill]] %s6250_s19  ;;  %s4506_s22 = sadd.s32 4294967294, %s6254_s20  }
   0x9   : > { %s6363_s23 = sadd.s32 1, %s6254_s20   ;;  %s267_s24 = sadd.s32 1, %s6250_s19 }
   0xa   : > { %9823 = sst [smem:[#allocation7_spill]] %s6363_s23  ;;  %s264_s25 = ssub.s32 %s6254_s20, %s6363_s23 }
   0xb   : > { %p277_p0 = scmp.ne.s32.totalorder %s6250_s19, %s6246_s18  ;;  %p265_p1 = scmp.eq.s32.totalorder %s264_s25, 0 }
   0xc   : > { %p278_p2 = scmp.eq.s32.totalorder %s6359_s21, 1  ;;  %p283_p3 = scmp.ne.s32.totalorder %s6246_s18, %s6242_s17 }
   0xd   : > { %p284_p4 = scmp.eq.s32.totalorder %s4506_s22, 1  ;;  %p4509_p7 = scmp.ge.s32.totalorder %s6254_s20, 1 }
   0xe   : > { %s6374_s26 = scalar_select %p265_p1, %s6250_s19, %s267_s24  }
   0xf   : > { %p6376_p5 = por %p278_p2, %p277_p0  ;;  %p6380_p6 = por %p284_p4, %p283_p3 }
  0x10   : > { %9824 = sst [smem:[#allocation8_spill]] %s6374_s26  ;;  %p340_p8 = scmp.lt.s32.totalorder %s6254_s20, 3 }
  0x11   : > { %s9826_s28 = scalar_select %p6380_p6, 1, 0 }
  0x12   : > { %p341_p9 = pnand %p4509_p7, %p340_p8 }
  0x13   : > { %9827 = sst [smem:[#allocation9_spill]] %s9826_s28 }
  0x14   : > { %344 = sbr.rel (%p341_p9) target bundleno = 1852 (0x73c), region = 64 }
  0x19   : > { %s9828_s1 = sld [smem:[#allocation112_spill]]  ;;  %vm9779_vm0 = vcmask 1043456   ;;  %vm1046_vm1 = vcmask 1044480   ;;  %p379_p10 = scmp.lt.s32.totalorder %s6359_s21, 1  ;;  %v6256_v3 = vmov 65535   ;;  %vm9778_vm2 = vcmask 203776  }
  0x1a   : > { %v1047_v4 = vsel %vm9779_vm0, 4294967295, %v6256_v3  ;;  %s9829_s0 = sld [smem:[#allocation111_spill]]  ;;  %s9667_s13 = smov 30   ;;  %vm1681_vm3 = vcmask 1045504   ;;  %vm9780_vm4 = vcmask 1046528   ;;  %vm3069_vm5 = vcmask 1040384  }
  0x1b   : > { %v1048_v5 = vsel %vm1046_vm1, %v1047_v4, 0  ;;  %s380_s14 = scalar_select %p379_p10, %s6359_s21, 1  ;;  %vm2677_vm6 = vcmask 48128   ;;  %vm2698_vm7 = vcmask 97280   ;;  %vm2719_vm8 = vcmask 146432  }
  0x1c   : > { %s9831_s2 = sld [smem:[#allocation113_spill]]  ;;  %s9669_s16 = smov 6   ;;  %vm2740_vm9 = vcmask 195584   ;;  %vm2761_vm10 = vcmask 244736   ;;  %vm2782_vm11 = vcmask 293888   ;;  %vm9794_vm12 = vcmask 343040  }
  0x1d   : > { %s5039_s15 = sshll.u32 %s380_s14, 9  ;;  %s9703_s14 = smov 18   ;;  %vm9793_vm13 = vcmask 392192   ;;  %vm9807_vm14 = vcmask 441344   ;;  %vm9817_vm15 = vcmask 490496  }
  0x1e   : > { %s9716_s22 = smov 36   ;;  %s9679_s24 = smov 24  }
  0x1f   : > { %v4774_v0 = vld [vmem:[%s9828_s1 + $0x8] sm:$0xf]  ;;  %v5105_v1 = vld [vmem:[%s9828_s1 + $0x8] sm:$0x10]  ;;  %v5104_v7 = vld [vmem:[%s9828_s1] sm:$0xff]  ;;  %s9714_s25 = smov 42  }
  0x20   : > { %v4775_v2 = vor.u32 %v5105_v1, %v4774_v0  ;;  %s6402_s29 = scalar_lea.vmem %s9829_s0, %s5039_s15  ;;  %s9710_s15 = smov 12  }
  0x21   : > { %v5040_v8 = vld [vmem:[%s6402_s29] sm:$0xff]  ;;  %v5041_v11 = vld [vmem:[%s6402_s29 + $0x8] sm:$0xff]  ;;  %v5075_v14 = vld [vmem:[%s6402_s29 + $0x118] sm:$0xff]  ;;  %s9636_s30 = smov 48   ;;  %s9726_s12 = smov 60  }
  0x22   : > { %v1050_v6 = vand.u32 %v4775_v2, %v1048_v5  ;;  %v5064_v9 = vld [vmem:[%s6402_s29 + $0xc0] sm:$0xff]  ;;  %v5065_v12 = vld [vmem:[%s6402_s29 + $0xc8] sm:$0xff]  ;;  %v5042_v15 = vld [vmem:[%s6402_s29 + $0x10] sm:$0xff]  ;;  %s9985_s0 = smov 54   ;;  %s9986_s1 = smov 84  }
  0x23   : > { %v5088_v10 = vld [vmem:[%s6402_s29 + $0x180] sm:$0xff]  ;;  %v5089_v13 = vld [vmem:[%s6402_s29 + $0x188] sm:$0xff]  ;;  %v5066_v16 = vld [vmem:[%s6402_s29 + $0xd0] sm:$0xff]  ;;  %s9998_s26 = smov 42   ;;  %s10005_s19 = smov 78  }
  0x24   : > { %1058 = vmatpush.bf16.msra.mxu0 %v1050_v6  ;;  %5152 = vmatpush.bf16.msra.mxu1 %v1050_v6  ;;  %v5090_v17 = vld [vmem:[%s6402_s29 + $0x190] sm:$0xff]  ;;  %v5076_v18 = vld [vmem:[%s6402_s29 + $0x120] sm:$0xff]  ;;  %v5043_v19 = vld [vmem:[%s6402_s29 + $0x18] sm:$0xff]  ;;  %s10010_s23 = smov 60   ;;  %s6272_s17 = smov 96  }
  0x25   : > { %5154 = vmatpush.bf16.msra.mxu3 %v1050_v6  ;;  %5153 = vmatpush.bf16.msra.mxu2 %v1050_v6  ;;  %v5067_v20 = vld [vmem:[%s6402_s29 + $0xd8] sm:$0xff]  ;;  %v5077_v22 = vld [vmem:[%s6402_s29 + $0x128] sm:$0xff]  ;;  %v5044_v23 = vld [vmem:[%s6402_s29 + $0x20] sm:$0xff] }
  0x26   : > { %v5091_v21 = vld [vmem:[%s6402_s29 + $0x198] sm:$0xff]  ;;  %v5068_v24 = vld [vmem:[%s6402_s29 + $0xe0] sm:$0xff]  ;;  %v5078_v26 = vld [vmem:[%s6402_s29 + $0x130] sm:$0xff] }
  0x27   : > { %v5092_v25 = vld [vmem:[%s6402_s29 + $0x1a0] sm:$0xff]  ;;  %v5045_v27 = vld [vmem:[%s6402_s29 + $0x28] sm:$0xff]  ;;  %v5079_v30 = vld [vmem:[%s6402_s29 + $0x138] sm:$0xff] }
  0x28   : > { %1059 = vmatpush.bf16.msra.mxu0 %v5104_v7  ;;  %5155 = vmatpush.bf16.msra.mxu1 %v5104_v7  ;;  %v5069_v28 = vld [vmem:[%s6402_s29 + $0xe8] sm:$0xff]  ;;  %v5046_v31 = vld [vmem:[%s6402_s29 + $0x30] sm:$0xff]  ;;  %v5080_v34 = vld [vmem:[%s6402_s29 + $0x140] sm:$0xff] }
  0x29   : > { %5157 = vmatpush.bf16.msra.mxu3 %v5104_v7  ;;  %5156 = vmatpush.bf16.msra.mxu2 %v5104_v7  ;;  %v5093_v29 = vld [vmem:[%s6402_s29 + $0x1a8] sm:$0xff]  ;;  %v5070_v32 = vld [vmem:[%s6402_s29 + $0xf0] sm:$0xff]  ;;  %v5047_v35 = vld [vmem:[%s6402_s29 + $0x38] sm:$0xff] }
  0x2a   : > { %v5094_v33 = vld [vmem:[%s6402_s29 + $0x1b0] sm:$0xff]  ;;  %v5071_v36 = vld [vmem:[%s6402_s29 + $0xf8] sm:$0xff]  ;;  %v5081_v38 = vld [vmem:[%s6402_s29 + $0x148] sm:$0xff] }
  0x2b   : > { %4776 = vmatmul.msk.bf16.vlgmr.msra.gmra.mxu0 %vm9778_vm2, %v5040_v8  ;;  %4800 = vmatmul.msk.bf16.vlgmr.msra.gmra.mxu1 %vm9778_vm2, %v5064_v9  ;;  %v5095_v37 = vld [vmem:[%s6402_s29 + $0x1b8] sm:$0xff]  ;;  %v5048_v39 = vld [vmem:[%s6402_s29 + $0x40] sm:$0xff]  ;;  %v5082_v44 = vld [vmem:[%s6402_s29 + $0x150] sm:$0xff] }
  0x2c   : > { %4824 = vmatmul.msk.bf16.vlgmr.msra.gmra.mxu3 %vm9778_vm2, %v5088_v10  ;;  %4811 = vmatmul.msk.bf16.vlgmr.msra.gmra.mxu2 %vm9778_vm2, %v5075_v14  ;;  %v5072_v40 = vld [vmem:[%s6402_s29 + $0x100] sm:$0xff]  ;;  %v5049_v49 = vld [vmem:[%s6402_s29 + $0x48] sm:$0xff]  ;;  %v5083_v54 = vld [vmem:[%s6402_s29 + $0x158] sm:$0xff] }
  0x2d   : > { %v5096_v43 = vld [vmem:[%s6402_s29 + $0x1c0] sm:$0xff]  ;;  %v5073_v50 = vld [vmem:[%s6402_s29 + $0x108] sm:$0xff]  ;;  %v5050_v60 = vld [vmem:[%s6402_s29 + $0x50] sm:$0xff] }
  0x2e   : > { %v5097_v53 = vld [vmem:[%s6402_s29 + $0x1c8] sm:$0xff]  ;;  %v5074_v61 = vld [vmem:[%s6402_s29 + $0x110] sm:$0xff]  ;;  %v5084_v2 = vld [vmem:[%s6402_s29 + $0x160] sm:$0xff] }
  0x2f   : > { %v5098_v1 = vld [vmem:[%s6402_s29 + $0x1d0] sm:$0xff]  ;;  %v5051_v8 = vld [vmem:[%s6402_s29 + $0x58] sm:$0xff]  ;;  %v5085_v14 = vld [vmem:[%s6402_s29 + $0x168] sm:$0xff] }
  0x3b   : > { %4777 = vmatmul.msk.bf16.gmra.mxu0 %vm9778_vm2, %v5041_v11  ;;  %4801 = vmatmul.msk.bf16.gmra.mxu1 %vm9778_vm2, %v5065_v12  ;;  %v5099_v12 = vld [vmem:[%s6402_s29 + $0x1d8] sm:$0xff] }
  0x3c   : > { %4825 = vmatmul.msk.bf16.gmra.mxu3 %vm9778_vm2, %v5089_v13  ;;  %4812 = vmatmul.msk.bf16.gmra.mxu2 %vm9778_vm2, %v5076_v18  ;;  %v6539_v13 = vld [vmem:[%s9831_s2] ss:$0 sm:$0xff] }
  0x4b   : > { %4778 = vmatmul.msk.bf16.gmra.mxu0 %vm9778_vm2, %v5042_v15  ;;  %4802 = vmatmul.msk.bf16.gmra.mxu1 %vm9778_vm2, %v5066_v16 }
  0x4c   : > { %4826 = vmatmul.msk.bf16.gmra.mxu3 %vm9778_vm2, %v5090_v17  ;;  %4813 = vmatmul.msk.bf16.gmra.mxu2 %vm9778_vm2, %v5077_v22 }
  0x5b   : > { %4779 = vmatmul.msk.bf16.gmra.mxu0 %vm9778_vm2, %v5043_v19  ;;  %4803 = vmatmul.msk.bf16.gmra.mxu1 %vm9778_vm2, %v5067_v20 }
  0x5c   : > { %4827 = vmatmul.msk.bf16.gmra.mxu3 %vm9778_vm2, %v5091_v21  ;;  %4814 = vmatmul.msk.bf16.gmra.mxu2 %vm9778_vm2, %v5078_v26 }
  0x6b   : > { %4780 = vmatmul.msk.bf16.gmra.mxu0 %vm9778_vm2, %v5044_v23  ;;  %4804 = vmatmul.msk.bf16.gmra.mxu1 %vm9778_vm2, %v5068_v24 }
  0x6c   : > { %4828 = vmatmul.msk.bf16.gmra.mxu3 %vm9778_vm2, %v5092_v25  ;;  %4815 = vmatmul.msk.bf16.gmra.mxu2 %vm9778_vm2, %v5079_v30  ;;  %v5052_v25 = vld [vmem:[%s6402_s29 + $0x60] sm:$0xff] }
  0x7b   : > { %4781 = vmatmul.msk.bf16.gmra.mxu0 %vm9778_vm2, %v5045_v27  ;;  %4805 = vmatmul.msk.bf16.gmra.mxu1 %vm9778_vm2, %v5069_v28 }
  0x7c   : > { %4829 = vmatmul.msk.bf16.gmra.mxu3 %vm9778_vm2, %v5093_v29  ;;  %4816 = vmatmul.msk.bf16.gmra.mxu2 %vm9778_vm2, %v5080_v34  ;;  %v5100_v29 = vld [vmem:[%s6402_s29 + $0x1e0] sm:$0xff] }
  0x8b   : > { %4782 = vmatmul.msk.bf16.gmra.mxu0 %vm9778_vm2, %v5046_v31  ;;  %4806 = vmatmul.msk.bf16.gmra.mxu1 %vm9778_vm2, %v5070_v32 }
  0x8c   : > { %4830 = vmatmul.msk.bf16.gmra.mxu3 %vm9778_vm2, %v5094_v33  ;;  %4817 = vmatmul.msk.bf16.gmra.mxu2 %vm9778_vm2, %v5081_v38 }
  0x9b   : > { %4783 = vmatmul.msk.bf16.gmra.mxu0 %vm9778_vm2, %v5047_v35  ;;  %4807 = vmatmul.msk.bf16.gmra.mxu1 %vm9778_vm2, %v5071_v36 }
  0x9c   : > { %4831 = vmatmul.msk.bf16.gmra.mxu3 %vm9778_vm2, %v5095_v37  ;;  %4818 = vmatmul.msk.bf16.gmra.mxu2 %vm9778_vm2, %v5082_v44 }
  0xa8   : > { %v6468_v41 = vpop.f32.mrf.mxu0  ;;  %v6470_v42 = vpop.f32.mrf.mxu1 }
  0xab   : > { %4784 = vmatmul.msk.bf16.gmra.mxu0 %vm9778_vm2, %v5048_v39  ;;  %4808 = vmatmul.msk.bf16.gmra.mxu1 %vm9778_vm2, %v5072_v40  ;;  %v5053_v40 = vld [vmem:[%s6402_s29 + $0x68] sm:$0xff] }
  0xac   : > { %4832 = vmatmul.msk.bf16.gmra.mxu3 %vm9778_vm2, %v5096_v43  ;;  %4819 = vmatmul.msk.bf16.gmra.mxu2 %vm9778_vm2, %v5083_v54 }
  0xaf   : > { %v6478_v45 = vpop.f32.mrf.mxu3  ;;  %v1228_v56 = vpop.f32.mrf.mxu2 }
  0xb0   : > { %v6480_v46 = vpop.f32.mrf.mxu0  ;;  %v6482_v47 = vpop.f32.mrf.mxu1  ;;  %v1229_v15 = vadd.f32 %v6539_v13, %v1228_v56 }
  0xb2   : > { %v1427_v18 = vmax.f32 %v1229_v15, 0.0 }
  0xb7   : > { %v6484_v48 = vpop.f32.mrf.mxu3  ;;  %v6508_v62 = vpop.f32.mrf.mxu2 }
  0xb8   : > { %v6488_v51 = vpop.f32.mrf.mxu0  ;;  %v6490_v52 = vpop.f32.mrf.mxu1 }
  0xbb   : > { %4785 = vmatmul.msk.bf16.gmra.mxu0 %vm9778_vm2, %v5049_v49  ;;  %4809 = vmatmul.msk.bf16.gmra.mxu1 %vm9778_vm2, %v5073_v50  ;;  %v5101_v50 = vld [vmem:[%s6402_s29 + $0x1e8] sm:$0xff] }
  0xbc   : > { %4833 = vmatmul.msk.bf16.gmra.mxu3 %vm9778_vm2, %v5097_v53  ;;  %4820 = vmatmul.msk.bf16.gmra.mxu2 %vm9778_vm2, %v5084_v2 }
  0xbf   : > { %v6498_v55 = vpop.f32.mrf.mxu3  ;;  %v1233_v4 = vpop.f32.mrf.mxu2 }
  0xc0   : > { %v6500_v57 = vpop.f32.mrf.mxu0  ;;  %v6502_v58 = vpop.f32.mrf.mxu1  ;;  %v1234_v30 = vadd.f32 %v6539_v13, %v1233_v4 }
  0xc2   : > { %v1429_v33 = vmax.f32 %v1234_v30, 0.0 }
  0xc7   : > { %v6504_v59 = vpop.f32.mrf.mxu3  ;;  %v6529_v9 = vpop.f32.mrf.mxu2 }
  0xc8   : > { %v6510_v63 = vpop.f32.mrf.mxu0  ;;  %v6512_v0 = vpop.f32.mrf.mxu1  ;;  %9830 = vst [vmem:[#allocation10_spill] sm:$0xff] %v6529_v9 }
  0xcb   : > { %4786 = vmatmul.msk.bf16.gmra.mxu0 %vm9778_vm2, %v5050_v60  ;;  %4810 = vmatmul.msk.bf16.gmra.mxu1 %vm9778_vm2, %v5074_v61 }
  0xcc   : > { %4834 = vmatmul.msk.bf16.gmra.mxu3 %vm9778_vm2, %v5098_v1  ;;  %4821 = vmatmul.msk.bf16.gmra.mxu2 %vm9778_vm2, %v5085_v14  ;;  %v5054_v14 = vld [vmem:[%s6402_s29 + $0x70] sm:$0xff] }
  0xcf   : > { %v6520_v3 = vpop.f32.mrf.mxu3  ;;  %v1238_v17 = vpop.f32.mrf.mxu2 }
  0xd0   : > { %v6522_v5 = vpop.f32.mrf.mxu0  ;;  %v6524_v6 = vpop.f32.mrf.mxu1  ;;  %v1239_v53 = vadd.f32 %v6539_v13, %v1238_v17 }
  0xd2   : > { %v1431_v60 = vmax.f32 %v1239_v53, 0.0 }
  0xd7   : > { %v6526_v7 = vpop.f32.mrf.mxu3  ;;  %v6556_v26 = vpop.f32.mrf.mxu2 }
  0xd8   : > { %v6531_v10 = vpop.f32.mrf.mxu0  ;;  %v6533_v11 = vpop.f32.mrf.mxu1  ;;  %9832 = vst [vmem:[#allocation11_spill] sm:$0xff] %v6556_v26  ;;  %v5057_v26 = vld [vmem:[%s6402_s29 + $0x88] sm:$0xff] }
  0xdb   : > { %4787 = vmatmul.msk.bf16.gmra.mxu0 %vm9778_vm2, %v5051_v8 }
  0xdc   : > { %4835 = vmatmul.msk.bf16.gmra.mxu3 %vm9778_vm2, %v5099_v12 }
  0xdf   : > { %v1304_v16 = vpop.f32.mrf.mxu3  ;;  %v1243_v32 = vpop.f32.mrf.mxu2 }
  0xe0   : > { %v1305_v19 = vadd.f32 %v6539_v13, %v1304_v16  ;;  %v6547_v20 = vpop.f32.mrf.mxu0  ;;  %v6549_v21 = vpop.f32.mrf.mxu1 }
  0xe2   : > { %v1455_v22 = vmax.f32 %v1305_v19, 0.0 }
  0xe4   : > { %v6551_v23 = vmax.f32 %v1427_v18, %v1455_v22  ;;  %v1244_v18 = vadd.f32 %v6539_v13, %v1243_v32 }
  0xe7   : > { %v6553_v24 = vpop.f32.mrf.mxu3  ;;  %v6576_v43 = vpop.f32.mrf.mxu2 }
  0xe8   : > { %v6558_v27 = vpop.f32.mrf.mxu0  ;;  %v6560_v28 = vpop.f32.mrf.mxu1  ;;  %9835 = vst [vmem:[#allocation14_spill] sm:$0xff] %v6576_v43 }
  0xeb   : > { %4788 = vmatmul.msk.bf16.gmra.mxu0 %vm9778_vm2, %v5052_v25  ;;  %v1433_v25 = vmax.f32 %v1244_v18, 0.0 }
  0xec   : > { %4836 = vmatmul.msk.bf16.gmra.mxu3 %vm9778_vm2, %v5100_v29 }
  0xef   : > { %v1309_v31 = vpop.f32.mrf.mxu3  ;;  %v1248_v56 = vpop.f32.mrf.mxu2 }
  0xf0   : > { %v1310_v34 = vadd.f32 %v6539_v13, %v1309_v31  ;;  %v6567_v35 = vpop.f32.mrf.mxu0  ;;  %v6569_v36 = vpop.f32.mrf.mxu1  ;;  %v1249_v32 = vadd.f32 %v6539_v13, %v1248_v56 }
  0xf1   : > { %9833 = vst [vmem:[#allocation12_spill] sm:$0xff] %v6567_v35 }
  0xf2   : > { %v1457_v37 = vmax.f32 %v1310_v34, 0.0 }
  0xf4   : > { %v6571_v38 = vmax.f32 %v1429_v33, %v1457_v37 }
  0xf7   : > { %v6573_v39 = vpop.f32.mrf.mxu3  ;;  %v6596_v15 = vpop.f32.mrf.mxu2 }
  0xf8   : > { %9834 = vst [vmem:[#allocation13_spill] sm:$0xff] %v6573_v39  ;;  %v6578_v44 = vpop.f32.mrf.mxu0  ;;  %v6580_v49 = vpop.f32.mrf.mxu1 }
  0xf9   : > { %9836 = vst [vmem:[#allocation15_spill] sm:$0xff] %v6578_v44 }
  0xfa   : > { %9840 = vst [vmem:[#allocation19_spill] sm:$0xff] %v6596_v15 }
  0xfb   : > { %4789 = vmatmul.msk.bf16.gmra.mxu0 %vm9778_vm2, %v5053_v40  ;;  %v5055_v40 = vld [vmem:[%s6402_s29 + $0x78] sm:$0xff] }
  0xfc   : > { %4837 = vmatmul.msk.bf16.gmra.mxu3 %vm9778_vm2, %v5101_v50 }
  0xff   : > { %v1314_v54 = vpop.f32.mrf.mxu3  ;;  %v1253_v22 = vpop.f32.mrf.mxu2 }
 0x100   : > { %v1315_v61 = vadd.f32 %v6539_v13, %v1314_v54  ;;  %v6587_v1 = vpop.f32.mrf.mxu0  ;;  %v6589_v2 = vpop.f32.mrf.mxu1 }
 0x101   : > { %9837 = vst [vmem:[#allocation16_spill] sm:$0xff] %v6587_v1 }
 0x102   : > { %v1459_v4 = vmax.f32 %v1315_v61, 0.0  ;;  %v1435_v61 = vmax.f32 %v1249_v32, 0.0  ;;  %v1254_v32 = vadd.f32 %v6539_v13, %v1253_v22 }
 0x104   : > { %v6591_v8 = vmax.f32 %v1431_v60, %v1459_v4 }
 0x106   : > { %9838 = vst [vmem:[#allocation17_spill] sm:$0xff] %v6591_v8 }
 0x107   : > { %v6593_v12 = vpop.f32.mrf.mxu3  ;;  %v1255_v54 = vpop.f32.mrf.mxu2 }
 0x108   : > { %9839 = vst [vmem:[#allocation18_spill] sm:$0xff] %v6593_v12  ;;  %v6598_v16 = vpop.f32.mrf.mxu0  ;;  %v1207_v17 = vpop.f32.mrf.mxu1 }
 0x109   : > { %9841 = vst [vmem:[#allocation20_spill] sm:$0xff] %v6598_v16 }
 0x10b   : > { %4790 = vmatmul.msk.bf16.gmra.mxu0 %vm9778_vm2, %v5054_v14 }
 0x10f   : > { %v1319_v19 = vpop.f32.mrf.mxu3 }
 0x110   : > { %v1320_v29 = vadd.f32 %v6539_v13, %v1319_v19  ;;  %v6603_v30 = vpop.f32.mrf.mxu0  ;;  %v1208_v31 = vpop.f32.mrf.mxu1 }
 0x111   : > { %9842 = vst [vmem:[#allocation21_spill] sm:$0xff] %v6603_v30  ;;  %v1258_v19 = vpop.f32.mrf.mxu2  ;;  %v5056_v31 = vld [vmem:[%s6402_s29 + $0x80] sm:$0xff] }
 0x112   : > { %v1461_v33 = vmax.f32 %v1320_v29, 0.0 }
 0x114   : > { %v6605_v34 = vmax.f32 %v1433_v25, %v1461_v33 }
 0x116   : > { %9843 = vst [vmem:[#allocation22_spill] sm:$0xff] %v6605_v34 }
 0x117   : > { %v6607_v37 = vpop.f32.mrf.mxu3 }
 0x118   : > { %9844 = vst [vmem:[#allocation23_spill] sm:$0xff] %v6607_v37  ;;  %v6610_v50 = vpop.f32.mrf.mxu0  ;;  %v1210_v53 = vpop.f32.mrf.mxu1  ;;  %v1180_v37 = vadd.f32 %v6539_v13, %v6482_v47  ;;  %v1259_v47 = vadd.f32 %v6539_v13, %v1258_v19  ;;  %v1188_v19 = vadd.f32 %v6539_v13, %v6512_v0 }
 0x119   : > { %9845 = vst [vmem:[#allocation24_spill] sm:$0xff] %v6610_v50 }
 0x11b   : > { %4791 = vmatmul.msk.bf16.gmra.mxu0 %vm9778_vm2, %v5055_v40  ;;  %v1260_v40 = vpop.f32.mrf.mxu2 }
 0x11f   : > { %v1324_v60 = vpop.f32.mrf.mxu3 }
 0x120   : > { %v1325_v4 = vadd.f32 %v6539_v13, %v1324_v60  ;;  %v6615_v14 = vpop.f32.mrf.mxu0  ;;  %v1211_v17 = vpop.f32.mrf.mxu1 }
 0x121   : > { %9846 = vst [vmem:[#allocation25_spill] sm:$0xff] %v6615_v14  ;;  %v1413_v14 = vmax.f32 %v1188_v19, 0.0 }
 0x122   : > { %v1463_v18 = vmax.f32 %v1325_v4, 0.0  ;;  %v1178_v4 = vadd.f32 %v6539_v13, %v6470_v42 }
 0x123   : > { %v1263_v22 = vpop.f32.mrf.mxu2 }
 0x124   : > { %v6617_v25 = vmax.f32 %v1435_v61, %v1463_v18  ;;  %v1256_v18 = vadd.f32 %v6539_v13, %v1255_v54  ;;  %v1409_v43 = vmax.f32 %v1178_v4, 0.0  ;;  %v1183_v54 = vadd.f32 %v6539_v13, %v6490_v52 }
 0x125   : > { %v1439_v52 = vmax.f32 %v1259_v47, 0.0 }
 0x126   : > { %9847 = vst [vmem:[#allocation26_spill] sm:$0xff] %v6617_v25  ;;  %v1438_v39 = vmax.f32 %v1256_v18, 0.0 }
 0x127   : > { %v6619_v29 = vpop.f32.mrf.mxu3 }
 0x128   : > { %9848 = vst [vmem:[#allocation27_spill] sm:$0xff] %v6619_v29  ;;  %v1101_v33 = vpop.f32.mrf.mxu0 }
 0x129   : > { %v1102_v61 = vadd.f32 %v6539_v13, %v1101_v33  ;;  %v1410_v33 = vmax.f32 %v1180_v37, 0.0 }
 0x12b   : > { %4792 = vmatmul.msk.bf16.gmra.mxu0 %vm9778_vm2, %v5056_v31  ;;  %v1437_v31 = vmax.f32 %v1254_v32, 0.0  ;;  %v1381_v1 = vmax.f32 %v1102_v61, 0.0 }
 0x12d   : > { %v1493_v32 = vmax.f32 %v1381_v1, %v1409_v43 }
 0x12f   : > { %v1329_v56 = vpop.f32.mrf.mxu3 }
 0x130   : > { %v1103_v53 = vpop.f32.mrf.mxu0  ;;  %v1330_v60 = vadd.f32 %v6539_v13, %v1329_v56 }
 0x131   : > { %v1104_v17 = vadd.f32 %v6539_v13, %v1103_v53 }
 0x132   : > { %v1465_v30 = vmax.f32 %v1330_v60, 0.0 }
 0x133   : > { %v1382_v56 = vmax.f32 %v1104_v17, 0.0 }
 0x134   : > { %v1521_v35 = vmax.f32 %v1437_v31, %v1465_v30  ;;  %v1185_v30 = vadd.f32 %v6539_v13, %v6502_v58 }
 0x135   : > { %v1494_v60 = vmax.f32 %v1382_v56, %v1410_v33 }
 0x136   : > { %v6639_v17 = vmax.f32 %v1493_v32, %v1521_v35  ;;  %v6651_v35 = vpop.f32.mrf.mxu2  ;;  %v1412_v1 = vmax.f32 %v1185_v30, 0.0  ;;  %v5058_v30 = vld [vmem:[%s6402_s29 + $0x90] sm:$0xff] }
 0x137   : > { %v1331_v12 = vpop.f32.mrf.mxu3 }
 0x138   : > { %v1332_v42 = vadd.f32 %v6539_v13, %v1331_v12  ;;  %v1106_v9 = vpop.f32.mrf.mxu0  ;;  %v1411_v12 = vmax.f32 %v1183_v54, 0.0  ;;  %v9588_v47 = vrot.slane %v6639_v17, 3 }
 0x139   : > { %v1107_v61 = vadd.f32 %v6539_v13, %v1106_v9  ;;  %v1261_v9 = vadd.f32 %v6539_v13, %v1260_v40 }
 0x13a   : > { %v1466_v53 = vmax.f32 %v1332_v42, 0.0 }
 0x13b   : > { %4793 = vmatmul.msk.bf16.gmra.mxu0 %vm9778_vm2, %v5057_v26  ;;  %v1383_v31 = vmax.f32 %v1107_v61, 0.0 }
 0x13c   : > { %v1522_v4 = vmax.f32 %v1438_v39, %v1466_v53  ;;  %v1440_v53 = vmax.f32 %v1261_v9, 0.0 }
 0x13d   : > { %v1495_v56 = vmax.f32 %v1383_v31, %v1411_v12 }
 0x13e   : > { %v6641_v18 = vmax.f32 %v1494_v60, %v1522_v4  ;;  %v1264_v60 = vadd.f32 %v6539_v13, %v1263_v22 }
 0x13f   : > { %v1334_v37 = vpop.f32.mrf.mxu3 }
 0x140   : > { %v1335_v26 = vadd.f32 %v6539_v13, %v1334_v37  ;;  %v1108_v42 = vpop.f32.mrf.mxu0  ;;  %v6648_v43 = vpack.i.bf16 %v6641_v18, %v6639_v17  ;;  %v1814_v54 = vrot.slane %v6641_v18, 3  ;;  %v1715_v0 = vrot.slane %v6641_v18, 2 }
 0x141   : > { %v1109_v58 = vadd.f32 %v6539_v13, %v1108_v42  ;;  %v1615_v37 = vrot.slane %v6641_v18, 1 }
 0x142   : > { %9849 = vst [vmem:[#allocation28_spill] sm:$0xff] %v6648_v43  ;;  %v1467_v39 = vmax.f32 %v1335_v26, 0.0  ;;  %5220 = vrot.lane.b32.xlu2 %v6648_v43, %s9667_s13  ;;  %v6675_v22 = vsel %vm1046_vm1, %v9588_v47, %v1814_v54  ;;  %v1268_v43 = vpop.f32.mrf.mxu2 }
 0x143   : > { %v1384_v4 = vmax.f32 %v1109_v58, 0.0  ;;  %9850 = vst [vmem:[#allocation29_spill] sm:$0xff] %v6675_v22  ;;  %v1913_v58 = vrot.slane %v6641_v18, 4 }
 0x144   : > { %v1523_v33 = vmax.f32 %v1439_v52, %v1467_v39 }
 0x145   : > { %v1496_v25 = vmax.f32 %v1384_v4, %v1412_v1  ;;  %v9860_v1 = vrot.slane %v6639_v17, 4 }
 0x146   : > { %v6659_v40 = vmax.f32 %v1495_v56, %v1523_v33 }
 0x147   : > { %v1336_v61 = vpop.f32.mrf.mxu3 }
 0x148   : > { %v1337_v31 = vadd.f32 %v6539_v13, %v1336_v61  ;;  %v1111_v52 = vpop.f32.mrf.mxu0  ;;  %v9589_v26 = vrot.slane %v6659_v40, 3  ;;  %v1717_v42 = vrot.slane %v6659_v40, 2  ;;  %v9592_v9 = vrot.slane %v6659_v40, 1 }
 0x149   : > { %v1112_v32 = vadd.f32 %v6539_v13, %v1111_v52  ;;  %v9868_v50 = vrot.slane %v6659_v40, 1 }
 0x14a   : > { %v1468_v33 = vmax.f32 %v1337_v31, 0.0  ;;  %v6683_v61 = vsel %vm1046_vm1, %v1814_v54, %v9589_v26  ;;  %v6686_v12 = vsel %vm1681_vm3, %v1715_v0, %v1717_v42  ;;  %v1618_v47 = vsel %vm9780_vm4, %v1615_v37, %v9592_v9 }
 0x14b   : > { %9851 = vst [vmem:[#allocation30_spill] sm:$0xff] %v6683_v61  ;;  %4794 = vmatmul.msk.bf16.gmra.mxu0 %vm9778_vm2, %v5058_v30  ;;  %v6695_v39 = vpack.i.bf16 %v6683_v61, %v6675_v22  ;;  %v9854_v31 = vrot.slane %v6639_v17, 2  ;;  %v9855_v26 = vrot.slane %v6639_v17, 1 }
 0x14c   : > { %9852 = vst [vmem:[#allocation31_spill] sm:$0xff] %v6686_v12  ;;  %v1524_v9 = vmax.f32 %v1440_v53, %v1468_v33  ;;  %v1914_v53 = vsel %vm9779_vm0, %v9860_v1, %v1913_v58 }
 0x14d   : > { %9853 = vst [vmem:[#allocation32_spill] sm:$0xff] %v6695_v39  ;;  %v6700_v54 = vsel %vm1681_vm3, %v9854_v31, %v1715_v0  ;;  %v1616_v56 = vsel %vm9780_vm4, %v9855_v26, %v1615_v37  ;;  %5235 = vrot.lane.b32.xlu1 %v6695_v39, %s9703_s14  ;;  %v9858_v0 = vrot.slane %v6659_v40, 4  ;;  %v1441_v26 = vmax.f32 %v1264_v60, 0.0 }
 0x14e   : > { %v6707_v52 = vpack.i.bf16 %v6686_v12, %v6700_v54  ;;  %v6709_v30 = vpack.i.bf16 %v1618_v47, %v1616_v56  ;;  %v6716_v29 = vmax.f32 %v1496_v25, %v1524_v9  ;;  %v1385_v47 = vmax.f32 %v1112_v32, 0.0 }
 0x14f   : > { %v1916_v31 = vsel %vm9779_vm0, %v1913_v58, %v9858_v0  ;;  %v1339_v4 = vpop.f32.mrf.mxu3  ;;  %v1190_v56 = vadd.f32 %v6539_v13, %v6524_v6 }
 0x150   : > { %9856 = vst [vmem:[#allocation33_spill] sm:$0xff] %v6707_v52  ;;  %5230 = vrot.lane.b32.xlu0 %v6707_v52, %s9710_s15  ;;  %5225 = vrot.lane.b32.xlu2 %v6709_v30, %s9669_s16  ;;  %v6725_v37 = vpack.i.bf16 %v1916_v31, %v1914_v53  ;;  %v1340_v25 = vadd.f32 %v6539_v13, %v1339_v4  ;;  %v1113_v19 = vpop.f32.mrf.mxu0  ;;  %v6729_v9 = vrot.slane %v6716_v29, 2  ;;  %v9598_v53 = vrot.slane %v6716_v29, 7 }
 0x151   : > { %9857 = vst [vmem:[#allocation34_spill] sm:$0xff] %v6709_v30  ;;  %v1497_v58 = vmax.f32 %v1385_v47, %v1413_v14  ;;  %v1114_v32 = vadd.f32 %v6539_v13, %v1113_v19  ;;  %v1266_v31 = vadd.f32 %v6539_v13, %v6651_v35  ;;  %v6745_v6 = vrot.slane %v6716_v29, 3  ;;  %v5059_v19 = vld [vmem:[%s6402_s29 + $0x98] sm:$0xff] }
 0x152   : > { %9859 = vst [vmem:[#allocation35_spill] sm:$0xff] %v6716_v29  ;;  %v1469_v33 = vmax.f32 %v1340_v25, 0.0  ;;  %v6735_v0 = vsel %vm1681_vm3, %v1717_v42, %v6729_v9  ;;  %v1270_v42 = vpop.f32.mrf.mxu2  ;;  %v1414_v4 = vmax.f32 %v1190_v56, 0.0  ;;  %v3089_v35 = vrot.slane %v6659_v40, 7 }
 0x153   : > { %9861 = vst [vmem:[#allocation36_spill] sm:$0xff] %v6725_v37  ;;  %v5259_v60 = vpack.i.bf16 %v6729_v9, %v6735_v0  ;;  %v1386_v47 = vmax.f32 %v1114_v32, 0.0  ;;  %v1193_v32 = vadd.f32 %v6539_v13, %v6533_v11  ;;  %v9866_v52 = vrot.slane %v6641_v18, 7 }
 0x154   : > { %9862 = vst [vmem:[#allocation37_spill] sm:$0xff] %v6735_v0  ;;  %v1525_v1 = vmax.f32 %v1441_v26, %v1469_v33  ;;  %v1442_v26 = vmax.f32 %v1266_v31, 0.0  ;;  %v1619_v33 = vrot.slane %v6716_v29, 1  ;;  %v9864_v31 = vrot.slane %v6659_v40, 3 }
 0x155   : > { %5260 = vrot.lane.b32.xlu1 %v5259_v60, %s9710_s15  ;;  %v1498_v15 = vmax.f32 %v1386_v47, %v1414_v4 }
 0x156   : > { %v6747_v14 = vmax.f32 %v1497_v58, %v1525_v1  ;;  %v3092_v1 = vsel %vm3069_vm5, %v3089_v35, %v9598_v53  ;;  %v6768_v39 = vsel %vm1046_vm1, %v9864_v31, %v6745_v6  ;;  %v3090_v53 = vsel %vm3069_vm5, %v9866_v52, %v3089_v35 }
 0x157   : > { %v1341_v25 = vpop.f32.mrf.mxu3  ;;  %9865 = vst [vmem:[#allocation39_spill] sm:$0xff] %v6768_v39  ;;  %v5274_v31 = vpack.i.bf16 %v3092_v1, %v3090_v53  ;;  %v5264_v35 = vpack.i.bf16 %v6745_v6, %v6768_v39  ;;  %v9870_v53 = vrot.slane %v6659_v40, 4 }
 0x158   : > { %9863 = vst [vmem:[#allocation38_spill] sm:$0xff] %v6747_v14  ;;  %5245 = vrot.lane.b32.xlu0 %v6709_v30, %s9716_s22  ;;  %5240 = vrot.lane.b32.xlu2 %v6725_v37, %s9679_s24  ;;  %v1342_v56 = vadd.f32 %v6539_v13, %v1341_v25  ;;  %v1116_v58 = vpop.f32.mrf.mxu0  ;;  %v2041_v37 = vrot.slane %v6747_v14, 1  ;;  %v1269_v25 = vadd.f32 %v6539_v13, %v1268_v43  ;;  %v6772_v30 = vrot.slane %v6716_v29, 4 }
 0x159   : > { %v6784_v43 = vpack.i.bf16 %v6716_v29, %v6659_v40  ;;  %v1117_v52 = vadd.f32 %v6539_v13, %v1116_v58  ;;  %v9871_v47 = vrot.slane %v6747_v14, 4  ;;  %v1415_v58 = vmax.f32 %v1193_v32, 0.0 }
 0x15a   : > { %v1470_v60 = vmax.f32 %v1342_v56, 0.0  ;;  %v6778_v0 = vsel %vm9780_vm4, %v1619_v33, %v2041_v37  ;;  %v1620_v56 = vsel %vm9780_vm4, %v9868_v50, %v1619_v33  ;;  %v6800_v4 = vsel %vm9779_vm0, %v9870_v53, %v6772_v30  ;;  %v1273_v1 = vpop.f32.mrf.mxu2 }
 0x15b   : > { %4795 = vmatmul.msk.bf16.gmra.mxu0 %vm9778_vm2, %v5059_v19  ;;  %9867 = vst [vmem:[#allocation40_spill] sm:$0xff] %v6784_v43  ;;  %v6793_v11 = vpack.i.bf16 %v6778_v0, %v1620_v56  ;;  %v2234_v50 = vsel %vm9779_vm0, %v6772_v30, %v9871_v47  ;;  %v1443_v53 = vmax.f32 %v1269_v25, 0.0  ;;  %v1271_v32 = vadd.f32 %v6539_v13, %v1270_v42 }
 0x15c   : > { %v1526_v61 = vmax.f32 %v1442_v26, %v1470_v60  ;;  %v6812_v19 = vpack.i.bf16 %v2234_v50, %v6800_v4 }
 0x15d   : > { %9869 = vst [vmem:[#allocation41_spill] sm:$0xff] %v6793_v11  ;;  %5275 = vrot.lane.b32.xlu1 %v5274_v31, %s9679_s24  ;;  %v1387_v31 = vmax.f32 %v1117_v52, 0.0  ;;  %v1444_v42 = vmax.f32 %v1271_v32, 0.0  ;;  %v2169_v32 = vrot.slane %v6747_v14, 3 }
 0x15e   : > { %v6806_v26 = vmax.f32 %v1498_v15, %v1526_v61  ;;  %9873 = vst [vmem:[#allocation43_spill] sm:$0xff] %v6812_v19  ;;  %v1195_v15 = vadd.f32 %v6539_v13, %v6549_v21  ;;  %v5254_v19 = vpack.i.bf16 %v1619_v33, %v1620_v56  ;;  %v3093_v21 = vrot.slane %v6747_v14, 7 }
 0x15f   : > { %v1344_v60 = vpop.f32.mrf.mxu3  ;;  %v1499_v25 = vmax.f32 %v1387_v31, %v1415_v58 }
 0x160   : > { %9872 = vst [vmem:[#allocation42_spill] sm:$0xff] %v6806_v26  ;;  %5250 = vrot.lane.b32.xlu0 %v6784_v43, %s9667_s13  ;;  %5265 = vrot.lane.b32.xlu2 %v5264_v35, %s9703_s14  ;;  %v1345_v39 = vadd.f32 %v6539_v13, %v1344_v60  ;;  %v1118_v34 = vpop.f32.mrf.mxu0  ;;  %v2043_v47 = vrot.slane %v6806_v26, 1  ;;  %v9607_v52 = vrot.slane %v6806_v26, 7  ;;  %v6841_v56 = vrot.slane %v6806_v26, 3 }
 0x161   : > { %v1119_v60 = vadd.f32 %v6539_v13, %v1118_v34  ;;  %v5060_v34 = vld [vmem:[%s6402_s29 + $0xa0] sm:$0xff]  ;;  %v6844_v31 = vrot.slane %v6806_v26, 2 }
 0x162   : > { %v1471_v61 = vmax.f32 %v1345_v39, 0.0  ;;  %v6819_v43 = vsel %vm9780_vm4, %v2041_v37, %v2043_v47  ;;  %v1416_v39 = vmax.f32 %v1195_v15, 0.0  ;;  %v6830_v37 = vadd.f32 %v6539_v13, %v6560_v28  ;;  %9876 = vst [vmem:[#allocation46_spill] sm:$0xff] %v6841_v56 }
 0x163   : > { %9874 = vst [vmem:[#allocation44_spill] sm:$0xff] %v6819_v43  ;;  %v5289_v35 = vpack.i.bf16 %v2043_v47, %v6819_v43  ;;  %v3096_v33 = vsel %vm3069_vm5, %v3093_v21, %v9607_v52  ;;  %v1388_v28 = vmax.f32 %v1119_v60, 0.0  ;;  %v9878_v60 = vrot.slane %v6716_v29, 7 }
 0x164   : > { %v1527_v50 = vmax.f32 %v1443_v53, %v1471_v61  ;;  %9877 = vst [vmem:[#allocation47_spill] sm:$0xff] %v6844_v31 }
 0x165   : > { %5280 = vrot.lane.b32.xlu1 %v6793_v11, %s9716_s22 }
 0x166   : > { %v6832_v16 = vmax.f32 %v1499_v25, %v1527_v50  ;;  %v2105_v25 = vrot.slane %v6747_v14, 2  ;;  %v1275_v50 = vpop.f32.mrf.mxu2 }
 0x167   : > { %v1346_v58 = vpop.f32.mrf.mxu3 }
 0x168   : > { %9875 = vst [vmem:[#allocation45_spill] sm:$0xff] %v6832_v16  ;;  %5255 = vrot.lane.b32.xlu0 %v5254_v19, %s9669_s16  ;;  %5290 = vrot.lane.b32.xlu2 %v5289_v35, %s9716_s22  ;;  %v1347_v53 = vadd.f32 %v6539_v13, %v1346_v58  ;;  %v1121_v15 = vpop.f32.mrf.mxu0  ;;  %v2423_v19 = vrot.slane %v6832_v16, 2  ;;  %v2487_v61 = vrot.slane %v6832_v16, 3  ;;  %v5269_v35 = vpack.i.bf16 %v6772_v30, %v6800_v4 }
 0x169   : > { %v2359_v52 = vrot.slane %v6832_v16, 1  ;;  %v3094_v58 = vsel %vm3069_vm5, %v9878_v60, %v3093_v21  ;;  %v6868_v30 = vpack.i.bf16 %v6806_v26, %v6747_v14  ;;  %v2108_v21 = vsel %vm1681_vm3, %v2105_v25, %v6844_v31 }
 0x16a   : > { %v1472_v11 = vmax.f32 %v1347_v53, 0.0  ;;  %v6859_v8 = vsel %vm1681_vm3, %v6844_v31, %v2423_v19  ;;  %v6863_v12 = vsel %vm1046_vm1, %v6841_v56, %v2487_v61  ;;  %v5294_v4 = vpack.i.bf16 %v3096_v33, %v3094_v58 }
 0x16b   : > { %4796 = vmatmul.msk.bf16.gmra.mxu0 %vm9778_vm2, %v5060_v34  ;;  %9879 = vst [vmem:[#allocation48_spill] sm:$0xff] %v6868_v30  ;;  %v2172_v53 = vsel %vm1046_vm1, %v2169_v32, %v6841_v56  ;;  %v1500_v60 = vmax.f32 %v1388_v28, %v1416_v39  ;;  %v6875_v44 = vsel %vm9780_vm4, %v2043_v47, %v2359_v52  ;;  %v1417_v39 = vmax.f32 %v6830_v37, 0.0 }
 0x16c   : > { %v1528_v29 = vmax.f32 %v1444_v42, %v1472_v11  ;;  %9880 = vst [vmem:[#allocation49_spill] sm:$0xff] %v6875_v44  ;;  %v6878_v22 = vpack.i.bf16 %v6859_v8, %v2108_v21  ;;  %v1274_v34 = vadd.f32 %v6539_v13, %v1273_v1  ;;  %v6886_v58 = vpack.i.bf16 %v6863_v12, %v2172_v53 }
 0x16d   : > { %5285 = vrot.lane.b32.xlu1 %v6868_v30, %s9667_s13  ;;  %v1122_v11 = vadd.f32 %v6539_v13, %v1121_v15  ;;  %v1276_v56 = vadd.f32 %v6539_v13, %v1275_v50  ;;  %v6907_v15 = vsel %vm1046_vm1, %v6745_v6, %v2169_v32  ;;  %v6911_v37 = vsel %vm1681_vm3, %v6729_v9, %v2105_v25 }
 0x16e   : > { %9881 = vst [vmem:[#allocation50_spill] sm:$0xff] %v6878_v22  ;;  %v6888_v31 = vmax.f32 %v1500_v60, %v1528_v29  ;;  %v1445_v33 = vmax.f32 %v1274_v34, 0.0  ;;  %v5309_v34 = vpack.i.bf16 %v2172_v53, %v6907_v15  ;;  %v1278_v30 = vpop.f32.mrf.mxu2  ;;  %v1200_v25 = vadd.f32 %v6539_v13, %v6569_v36 }
 0x16f   : > { %9882 = vst [vmem:[#allocation51_spill] sm:$0xff] %v6886_v58  ;;  %v1349_v47 = vpop.f32.mrf.mxu3  ;;  %v1389_v50 = vmax.f32 %v1122_v11, 0.0  ;;  %v1446_v32 = vmax.f32 %v1276_v56, 0.0  ;;  %v1203_v36 = vadd.f32 %v6539_v13, %v6580_v49  ;;  %v3097_v56 = vrot.slane %v6832_v16, 7 }
 0x170   : > { %9883 = vst [vmem:[#allocation52_spill] sm:$0xff] %v6888_v31  ;;  %5270 = vrot.lane.b32.xlu0 %v5269_v35, %s9679_s24  ;;  %5295 = vrot.lane.b32.xlu2 %v5294_v4, %s9679_s24  ;;  %v1350_v42 = vadd.f32 %v6539_v13, %v1349_v47  ;;  %v1123_v1 = vpop.f32.mrf.mxu0  ;;  %v6896_v28 = vrot.slane %v6888_v31, 2  ;;  %v6900_v29 = vrot.slane %v6888_v31, 3  ;;  %v6903_v35 = vrot.slane %v6888_v31, 1 }
 0x171   : > { %9887 = vst [vmem:[#allocation56_spill] sm:$0xff] %v6907_v15  ;;  %v5299_v47 = vpack.i.bf16 %v6819_v43, %v6778_v0  ;;  %v1124_v6 = vadd.f32 %v6539_v13, %v1123_v1  ;;  %v1501_v11 = vmax.f32 %v1389_v50, %v1417_v39  ;;  %v9620_v0 = vrot.slane %v6888_v31, 7 }
 0x172   : > { %9884 = vst [vmem:[#allocation53_spill] sm:$0xff] %v6896_v28  ;;  %v1473_v4 = vmax.f32 %v1350_v42, 0.0  ;;  %v6915_v60 = vsel %vm1681_vm3, %v2423_v19, %v6896_v28  ;;  %v5304_v42 = vpack.i.bf16 %v2108_v21, %v6911_v37  ;;  %v6924_v9 = vsel %vm1046_vm1, %v2487_v61, %v6900_v29  ;;  %v5061_v21 = vld [vmem:[%s6402_s29 + $0xa8] sm:$0xff] }
 0x173   : > { %9885 = vst [vmem:[#allocation54_spill] sm:$0xff] %v6900_v29  ;;  %v6928_v19 = vsel %vm9780_vm4, %v2359_v52, %v6903_v35  ;;  %v1390_v1 = vmax.f32 %v1124_v6, 0.0  ;;  %v1418_v14 = vmax.f32 %v1200_v25, 0.0  ;;  %v1279_v39 = vadd.f32 %v6539_v13, %v1278_v30 }
 0x174   : > { %9886 = vst [vmem:[#allocation55_spill] sm:$0xff] %v6903_v35  ;;  %v1529_v53 = vmax.f32 %v1445_v33, %v1473_v4  ;;  %v6954_v6 = vpack.i.bf16 %v6888_v31, %v6832_v16  ;;  %v3100_v49 = vsel %vm3069_vm5, %v3097_v56, %v9620_v0  ;;  %v1419_v25 = vmax.f32 %v1203_v36, 0.0 }
 0x175   : > { %9888 = vst [vmem:[#allocation57_spill] sm:$0xff] %v6911_v37  ;;  %5310 = vrot.lane.b32.xlu1 %v5309_v34, %s9703_s14  ;;  %v1502_v50 = vmax.f32 %v1390_v1, %v1418_v14 }
 0x176   : > { %9889 = vst [vmem:[#allocation58_spill] sm:$0xff] %v6915_v60  ;;  %v6946_v33 = vmax.f32 %v1501_v11, %v1529_v53  ;;  %v9895_v11 = vrot.slane %v6806_v26, 7 }
 0x177   : > { %9890 = vst [vmem:[#allocation59_spill] sm:$0xff] %v6924_v9  ;;  %v1351_v61 = vpop.f32.mrf.mxu3 }
 0x178   : > { %9891 = vst [vmem:[#allocation60_spill] sm:$0xff] %v6928_v19  ;;  %5300 = vrot.lane.b32.xlu0 %v5299_v47, %s9669_s16  ;;  %5305 = vrot.lane.b32.xlu2 %v5304_v42, %s9710_s15  ;;  %v1352_v34 = vadd.f32 %v6539_v13, %v1351_v61  ;;  %v1126_v43 = vpop.f32.mrf.mxu0  ;;  %v3042_v14 = vrot.slane %v6946_v33, 3  ;;  %v3017_v30 = vrot.slane %v6946_v33, 2  ;;  %v1447_v61 = vmax.f32 %v1279_v39, 0.0 }
 0x179   : > { %9892 = vst [vmem:[#allocation61_spill] sm:$0xff] %v6946_v33  ;;  %v1127_v47 = vadd.f32 %v6539_v13, %v1126_v43  ;;  %v1280_v43 = vpop.f32.mrf.mxu2  ;;  %v3098_v1 = vsel %vm3069_vm5, %v9895_v11, %v3097_v56  ;;  %v5349_v39 = vpack.i.bf16 %v6924_v9, %v6863_v12 }
 0x17a   : > { %v1474_v4 = vmax.f32 %v1352_v34, 0.0  ;;  %9893 = vst [vmem:[#allocation62_spill] sm:$0xff] %v6954_v6  ;;  %v2992_v34 = vrot.slane %v6946_v33, 1 }
 0x17b   : > { %4797 = vmatmul.msk.bf16.gmra.mxu0 %vm9778_vm2, %v5061_v21 }
 0x17c   : > { %v1530_v42 = vmax.f32 %v1446_v32, %v1474_v4  ;;  %v1391_v32 = vmax.f32 %v1127_v47, 0.0  ;;  %v5344_v47 = vpack.i.bf16 %v6915_v60, %v6859_v8 }
 0x17d   : > { %5315 = vrot.lane.b32.xlu1 %v6878_v22, %s9714_s25 }
 0x17e   : > { %v6961_v53 = vmax.f32 %v1502_v50, %v1530_v42  ;;  %v5329_v50 = vpack.i.bf16 %v3100_v49, %v3098_v1  ;;  %v1281_v42 = vadd.f32 %v6539_v13, %v1280_v43  ;;  %v6990_v49 = vsel %vm1046_vm1, %v6900_v29, %v3042_v14 }
 0x17f   : > { %v1354_v21 = vpop.f32.mrf.mxu3  ;;  %9899 = vst [vmem:[#allocation67_spill] sm:$0xff] %v6990_v49  ;;  %v6994_v43 = vsel %vm1681_vm3, %v6896_v28, %v3017_v30  ;;  %v1503_v12 = vmax.f32 %v1391_v32, %v1419_v25  ;;  %v2993_v1 = vsel %vm9780_vm4, %v6903_v35, %v2992_v34  ;;  %v1205_v32 = vadd.f32 %v6539_v13, %v6589_v2 }
 0x180   : > { %9894 = vst [vmem:[#allocation63_spill] sm:$0xff] %v6961_v53  ;;  %5325 = vrot.lane.b32.xlu0 %v6954_v6, %s9667_s13  ;;  %5320 = vrot.lane.b32.xlu2 %v6886_v58, %s9636_s30  ;;  %v1355_v36 = vadd.f32 %v6539_v13, %v1354_v21  ;;  %v1128_v4 = vpop.f32.mrf.mxu0  ;;  %v6976_v52 = vrot.slane %v6961_v53, 2  ;;  %v6983_v0 = vrot.slane %v6961_v53, 1  ;;  %v6986_v56 = vrot.slane %v6961_v53, 3 }
 0x181   : > { %9900 = vst [vmem:[#allocation68_spill] sm:$0xff] %v6994_v43  ;;  %v1129_v6 = vadd.f32 %v6539_v13, %v1128_v4  ;;  %v5062_v4 = vld [vmem:[%s6402_s29 + $0xb0] sm:$0xff]  ;;  %v1420_v2 = vmax.f32 %v1205_v32, 0.0  ;;  %v5359_v32 = vpack.i.bf16 %v6990_v49, %v6924_v9 }
 0x182   : > { %9896 = vst [vmem:[#allocation64_spill] sm:$0xff] %v6976_v52  ;;  %v1475_v21 = vmax.f32 %v1355_v36, 0.0  ;;  %v6998_v8 = vsel %vm1681_vm3, %v3017_v30, %v6976_v52  ;;  %v2995_v36 = vsel %vm9780_vm4, %v2992_v34, %v6983_v0  ;;  %v7011_v30 = vsel %vm1046_vm1, %v3042_v14, %v6986_v56 }
 0x183   : > { %9897 = vst [vmem:[#allocation65_spill] sm:$0xff] %v6983_v0  ;;  %v7007_v28 = vpack.i.bf16 %v2995_v36, %v2993_v1  ;;  %v3103_v14 = vrot.slane %v6961_v53, 7 }
 0x184   : > { %9898 = vst [vmem:[#allocation66_spill] sm:$0xff] %v6986_v56  ;;  %v1531_v29 = vmax.f32 %v1447_v61, %v1475_v21  ;;  %v1448_v61 = vmax.f32 %v1281_v42, 0.0  ;;  %v1392_v21 = vmax.f32 %v1129_v6, 0.0  ;;  %v5334_v6 = vpack.i.bf16 %v6928_v19, %v6875_v44 }
 0x185   : > { %9901 = vst [vmem:[#allocation69_spill] sm:$0xff] %v6998_v8  ;;  %5330 = vrot.lane.b32.xlu1 %v5329_v50, %s9679_s24 }
 0x186   : > { %9902 = vst [vmem:[#allocation70_spill] sm:$0xff] %v7007_v28  ;;  %v7018_v11 = vmax.f32 %v1503_v12, %v1531_v29 }
 0x187   : > { %9903 = vst [vmem:[#allocation71_spill] sm:$0xff] %v7011_v30  ;;  %v1356_v34 = vpop.f32.mrf.mxu3 }
 0x188   : > { %9904 = vst [vmem:[#allocation72_spill] sm:$0xff] %v7018_v11  ;;  %5345 = vrot.lane.b32.xlu0 %v5344_v47, %s9710_s15  ;;  %5350 = vrot.lane.b32.xlu2 %v5349_v39, %s9703_s14  ;;  %v1357_v50 = vadd.f32 %v6539_v13, %v1356_v34  ;;  %v1131_v1 = vpop.f32.mrf.mxu0  ;;  %v3105_v36 = vrot.slane %v7018_v11, 7  ;;  %v3237_v25 = vrot.slane %v7018_v11, 3  ;;  %v1504_v39 = vmax.f32 %v1392_v21, %v1420_v2 }
 0x189   : > { %v3212_v1 = vrot.slane %v7018_v11, 2 }
 0x18a   : > { %v1476_v29 = vmax.f32 %v1357_v50, 0.0  ;;  %v7028_v12 = vsel %vm3069_vm5, %v3103_v14, %v3105_v36  ;;  %v7032_v42 = vsel %vm1046_vm1, %v6986_v56, %v3237_v25  ;;  %v5354_v50 = vpack.i.bf16 %v6994_v43, %v6915_v60 }
 0x18b   : > { %9905 = vst [vmem:[#allocation73_spill] sm:$0xff] %v7028_v12  ;;  %4798 = vmatmul.msk.bf16.gmra.mxu0 %vm9778_vm2, %v5062_v4  ;;  %v3101_v4 = vrot.slane %v6946_v33, 7 }
 0x18c   : > { %9906 = vst [vmem:[#allocation74_spill] sm:$0xff] %v7032_v42  ;;  %v1532_v34 = vmax.f32 %v1448_v61, %v1476_v29  ;;  %v3187_v61 = vrot.slane %v7018_v11, 1 }
 0x18d   : > { %5335 = vrot.lane.b32.xlu1 %v5334_v6, %s9716_s22 }
 0x18e   : > { %v7046_v35 = vmax.f32 %v1504_v39, %v1532_v34  ;;  %v3213_v39 = vsel %vm1681_vm3, %v6976_v52, %v3212_v1  ;;  %v9908_v34 = vrot.slane %v6888_v31, 7  ;;  %v7070_v58 = vsel %vm9780_vm4, %v6983_v0, %v3187_v61 }
 0x18f   : > { %9910 = vst [vmem:[#allocation77_spill] sm:$0xff] %v7070_v58 }
 0x190   : > { %9907 = vst [vmem:[#allocation75_spill] sm:$0xff] %v7046_v35  ;;  %5360 = vrot.lane.b32.xlu0 %v5359_v32, %s9636_s30  ;;  %5355 = vrot.lane.b32.xlu2 %v5354_v50, %s9714_s25  ;;  %v1132_v21 = vpop.f32.mrf.mxu0  ;;  %v3107_v2 = vrot.slane %v7046_v35, 7  ;;  %v3214_v29 = vrot.slane %v7046_v35, 2  ;;  %v3239_v9 = vrot.slane %v7046_v35, 3  ;;  %v3102_v32 = vsel %vm3069_vm5, %v9908_v34, %v3101_v4  ;;  %s9696_s30 = smov 54  }
 0x191   : > { %v3104_v50 = vsel %vm3069_vm5, %v3101_v4, %v3103_v14  ;;  %v9632_v21 = vrot.slane %v7046_v35, 1 }
 0x192   : > { %v7064_v60 = vsel %vm3069_vm5, %v3105_v36, %v3107_v2  ;;  %v3215_v19 = vsel %vm1681_vm3, %v3212_v1, %v3214_v29  ;;  %v3240_v47 = vsel %vm1046_vm1, %v3237_v25, %v3239_v9  ;;  %v5379_v1 = vpack.i.bf16 %v3213_v39, %v6998_v8 }
 0x193   : > { %9909 = vst [vmem:[#allocation76_spill] sm:$0xff] %v7064_v60  ;;  %v7074_v34 = vpack.i.bf16 %v3214_v29, %v3215_v19  ;;  %v7076_v14 = vpack.i.bf16 %v3239_v9, %v3240_v47  ;;  %v7081_v36 = vsel %vm9780_vm4, %v3187_v61, %v9632_v21  ;;  %v5369_v4 = vpack.i.bf16 %v3104_v50, %v3102_v32  ;;  %v5063_v19 = vld [vmem:[%s6402_s29 + $0xb8] sm:$0xff]  ;;  %v1213_v9 = vpop.f32.mrf.mxu1 }
 0x194   : > { %9913 = vst [vmem:[#allocation80_spill] sm:$0xff] %v7081_v36  ;;  %v7093_v61 = vpack.i.bf16 %v6961_v53, %v6946_v33  ;;  %v1214_v29 = vadd.f32 %v6539_v13, %v1213_v9  ;;  %v1062_v39 = vadd.f32 %v6539_v13, %v6468_v41  ;;  %v1290_v32 = vadd.f32 %v6539_v13, %v6478_v45 }
 0x195   : > { %9911 = vst [vmem:[#allocation78_spill] sm:$0xff] %v7074_v34  ;;  %5340 = vrot.lane.b32.xlu1 %v5334_v6, %s9669_s16  ;;  %v1064_v9 = vadd.f32 %v6539_v13, %v6480_v46  ;;  %v1292_v41 = vadd.f32 %v6539_v13, %v6484_v48  ;;  %v1067_v46 = vadd.f32 %v6539_v13, %v6488_v51  ;;  %v9968_v34 = vld [vmem:[#allocation13_spill] sm:$0xff] }
 0x196   : > { %9912 = vst [vmem:[#allocation79_spill] sm:$0xff] %v7076_v14  ;;  %v1295_v48 = vadd.f32 %v6539_v13, %v6498_v55 }
 0x197   : > { %9914 = vst [vmem:[#allocation81_spill] sm:$0xff] %v7093_v61 }
 0x198   : > { %5380 = vrot.lane.b32.xlu0 %v5379_v1, %s9714_s25  ;;  %5370 = vrot.lane.b32.xlu2 %v5369_v4, %s9679_s24  ;;  %v1134_v47 = vpop.f32.mrf.mxu0  ;;  %v1421_v1 = vmax.f32 %v1214_v29, 0.0 }
 0x199   : > { %v1449_v47 = vmax.f32 %v1290_v32, 0.0  ;;  %v1450_v32 = vmax.f32 %v1292_v41, 0.0  ;;  %v1451_v41 = vmax.f32 %v1295_v48, 0.0 }
 0x19b   : > { %4799 = vmatmul.msk.bf16.gmra.mxu0 %vm9778_vm2, %v5063_v19  ;;  %v1215_v2 = vpop.f32.mrf.mxu1  ;;  %v1365_v19 = vmax.f32 %v1062_v39, 0.0  ;;  %v1505_v31 = vmax.f32 %v1421_v1, %v1449_v47  ;;  %v1366_v39 = vmax.f32 %v1064_v9, 0.0  ;;  %v1367_v9 = vmax.f32 %v1067_v46, 0.0 }
 0x19c   : > { %vm9797_vm2 = vcmask 539648  }
 0x19d   : > { %5365 = vrot.lane.b32.xlu1 %v7093_v61, %s9667_s13 }
 0x1a0   : > { %5375 = vrot.lane.b32.xlu2 %v7007_v28, %s9716_s22  ;;  %v1135_v6 = vpop.f32.mrf.mxu0 }
 0x1a1   : > { %v1216_v6 = vadd.f32 %v6539_v13, %v1215_v2  ;;  %v7114_v2 = vpop.permute.xlu2 %5220 }
 0x1a2   : > { %9916 = vst [vmem:[#allocation83_spill] sm:$0xff] %v7114_v2 }
 0x1a3   : > { %v1218_v25 = vpop.f32.mrf.mxu1  ;;  %v1422_v29 = vmax.f32 %v1216_v6, 0.0 }
 0x1a4   : > { %v1219_v1 = vadd.f32 %v6539_v13, %v1218_v25  ;;  %v1069_v25 = vadd.f32 %v6539_v13, %v6500_v57 }
 0x1a5   : > { %v1506_v33 = vmax.f32 %v1422_v29, %v1450_v32  ;;  %v1297_v29 = vadd.f32 %v6539_v13, %v6504_v59  ;;  %v7138_v59 = vld [vmem:[%s9831_s2] ss:$0 sm:$0xff]  ;;  %s9997_s2 = smov 36  }
 0x1a6   : > { %v1423_v47 = vmax.f32 %v1219_v1, 0.0  ;;  %v1368_v46 = vmax.f32 %v1069_v25, 0.0 }
 0x1a7   : > { %v1452_v57 = vmax.f32 %v1297_v29, 0.0 }
 0x1a8   : > { %v1137_v50 = vpop.f32.mrf.mxu0 }
 0x1a9   : > { %v1138_v4 = vadd.f32 %v6539_v13, %v1137_v50 }
 0x1ab   : > { %v1393_v21 = vmax.f32 %v1138_v4, 0.0 }
 0x1ad   : > { %v1477_v61 = vmax.f32 %v1365_v19, %v1393_v21  ;;  %v1220_v19 = vpop.f32.mrf.mxu1 }
 0x1ae   : > { %v1221_v51 = vadd.f32 %v6539_v13, %v1220_v19 }
 0x1af   : > { %v7110_v53 = vmax.f32 %v1477_v61, %v1505_v31 }
 0x1b0   : > { %v1139_v45 = vpop.f32.mrf.mxu0 }
 0x1b1   : > { %9915 = vst [vmem:[#allocation82_spill] sm:$0xff] %v7110_v53  ;;  %v1140_v50 = vadd.f32 %v6539_v13, %v1139_v45 }
 0x1b3   : > { %v1394_v4 = vmax.f32 %v1140_v50, 0.0  ;;  %v1507_v50 = vmax.f32 %v1423_v47, %v1451_v41  ;;  %v1582_v41 = vrot.slane %v7110_v53, 1 }
 0x1b5   : > { %v1478_v21 = vmax.f32 %v1366_v39, %v1394_v4  ;;  %v5226_v39 = vpop.permute.xlu2 %5225  ;;  %v1223_v19 = vpop.f32.mrf.mxu1 }
 0x1b7   : > { %v7120_v31 = vmax.f32 %v1478_v21, %v1506_v33 }
 0x1b8   : > { %v1142_v61 = vpop.f32.mrf.mxu0 }
 0x1b9   : > { %9917 = vst [vmem:[#allocation84_spill] sm:$0xff] %v7120_v31  ;;  %v1143_v6 = vadd.f32 %v6539_v13, %v1142_v61  ;;  %v1782_v4 = vrot.slane %v7120_v31, 3  ;;  %v1683_v1 = vrot.slane %v7120_v31, 2  ;;  %v1583_v21 = vrot.slane %v7120_v31, 1 }
 0x1ba   : > { %v1300_v13 = vadd.f32 %v7138_v59, %v6520_v3  ;;  %v1424_v61 = vmax.f32 %v1221_v51, 0.0  ;;  %v1224_v3 = vadd.f32 %v7138_v59, %v1223_v19  ;;  %v5228_v19 = vunpack.i.h.bf16 %v5226_v39 }
 0x1bb   : > { %v1395_v45 = vmax.f32 %v1143_v6, 0.0  ;;  %v1781_v6 = vrot.slane %v7110_v53, 3  ;;  %v1584_v22 = vsel %vm9780_vm4, %v1582_v41, %v1583_v21  ;;  %v5227_v41 = vunpack.i.l.bf16 %v5226_v39 }
 0x1bc   : > { %v2695_v39 = vsel %vm2677_vm6, %v6641_v18, %v5228_v19 }
 0x1bd   : > { %v1479_v55 = vmax.f32 %v1367_v9, %v1395_v45  ;;  %v1682_v9 = vrot.slane %v7110_v53, 2  ;;  %v5241_v58 = vpop.permute.xlu2 %5240 }
 0x1bf   : > { %v7128_v33 = vmax.f32 %v1479_v55, %v1507_v50  ;;  %v7130_v32 = vpop.permute.xlu1 %5235  ;;  %v1783_v55 = vsel %vm1046_vm1, %v1781_v6, %v1782_v4  ;;  %v1684_v51 = vsel %vm1681_vm3, %v1682_v9, %v1683_v1  ;;  %v1508_v9 = vmax.f32 %v1424_v61, %v1452_v57 }
 0x1c0   : > { %v1144_v47 = vpop.f32.mrf.mxu0  ;;  %v2694_v57 = vsel %vm2677_vm6, %v6639_v17, %v5227_v41 }
 0x1c1   : > { %v1145_v45 = vadd.f32 %v7138_v59, %v1144_v47  ;;  %v9653_v25 = vrot.slane %v7128_v33, 3  ;;  %v1685_v29 = vrot.slane %v7128_v33, 2  ;;  %v1585_v50 = vrot.slane %v7128_v33, 1 }
 0x1c2   : > { %v5231_v48 = vpop.permute.xlu0 %5230 }
 0x1c3   : > { %v1396_v44 = vmax.f32 %v1145_v45, 0.0  ;;  %v1785_v26 = vsel %vm1046_vm1, %v1782_v4, %v9653_v25  ;;  %v1686_v47 = vsel %vm1681_vm3, %v1683_v1, %v1685_v29  ;;  %v1586_v16 = vsel %vm9780_vm4, %v1583_v21, %v1585_v50 }
 0x1c4   : > { %v5394_v52 = vpack.i.bf16 %v1785_v26, %v1783_v55  ;;  %v5389_v6 = vpack.i.bf16 %v1686_v47, %v1684_v51  ;;  %v5384_v0 = vpack.i.bf16 %v1586_v16, %v1584_v22  ;;  %v5233_v36 = vunpack.i.h.bf16 %v5231_v48 }
 0x1c5   : > { %v1480_v45 = vmax.f32 %v1368_v46, %v1396_v44  ;;  %v5232_v56 = vunpack.i.l.bf16 %v5231_v48  ;;  %v1883_v1 = vrot.slane %v7128_v33, 4  ;;  %v1072_v26 = vadd.f32 %v7138_v59, %v6510_v63 }
 0x1c6   : > { %5395 = vrot.lane.b32.xlu2 %v5394_v52, %s9703_s14  ;;  %5390 = vrot.lane.b32.xlu1 %v5389_v6, %s9710_s15  ;;  %v1453_v21 = vmax.f32 %v1300_v13, 0.0  ;;  %v1425_v44 = vmax.f32 %v1224_v3, 0.0  ;;  %v1881_v46 = vrot.slane %v7120_v31, 4  ;;  %v5238_v63 = vunpack.i.h.bf16 %v7130_v32 }
 0x1c7   : > { %v7162_v4 = vpop.permute.xlu1 %5260  ;;  %v7169_v16 = vmax.f32 %v1480_v45, %v1508_v9  ;;  %5385 = vrot.lane.b32.xlu0 %v5384_v0, %s9669_s16  ;;  %v5237_v13 = vunpack.i.l.bf16 %v7130_v32  ;;  %v2715_v61 = vsel %vm2698_vm7, %v2694_v57, %v5232_v56  ;;  %v2716_v0 = vsel %vm2698_vm7, %v2695_v39, %v5233_v36 }
 0x1c8   : > { %9918 = vst [vmem:[#allocation85_spill] sm:$0xff] %v7162_v4  ;;  %v1147_v52 = vpop.f32.mrf.mxu0  ;;  %v1880_v3 = vrot.slane %v7110_v53, 4  ;;  %v1884_v55 = vsel %vm9779_vm0, %v1881_v46, %v1883_v1  ;;  %v1369_v51 = vmax.f32 %v1072_v26, 0.0  ;;  %v1509_v19 = vmax.f32 %v1425_v44, %v1453_v21  ;;  %v1225_v21 = vpop.f32.mrf.mxu1 }
 0x1c9   : > { %v1148_v48 = vadd.f32 %v7138_v59, %v1147_v52  ;;  %v5404_v6 = vpack.i.bf16 %v7169_v16, %v7128_v33  ;;  %v7192_v56 = vsel %vm2719_vm8, %v2715_v61, %v5237_v13  ;;  %v7195_v36 = vsel %vm2719_vm8, %v2716_v0, %v5238_v63  ;;  %v7208_v63 = vpop.permute.xlu2 %5265 }
 0x1ca   : > { %v7171_v22 = vpop.permute.xlu0 %5245  ;;  %v1882_v32 = vsel %vm9779_vm0, %v1880_v3, %v1881_v46  ;;  %9920 = vst [vmem:[#allocation87_spill] sm:$0xff] %v7192_v56  ;;  %v5243_v45 = vunpack.i.h.bf16 %v5241_v58  ;;  %v5242_v39 = vunpack.i.l.bf16 %v5241_v58  ;;  %v1074_v26 = vadd.f32 %v7138_v59, %v6522_v5 }
 0x1cb   : > { %9919 = vst [vmem:[#allocation86_spill] sm:$0xff] %v7171_v22  ;;  %v1397_v47 = vmax.f32 %v1148_v48, 0.0  ;;  %v5399_v41 = vpack.i.bf16 %v1884_v55, %v1882_v32  ;;  %v1687_v57 = vrot.slane %v7169_v16, 2  ;;  %v1885_v55 = vrot.slane %v7169_v16, 4 }
 0x1cc   : > { %9921 = vst [vmem:[#allocation88_spill] sm:$0xff] %v7208_v63  ;;  %v2757_v48 = vsel %vm2740_vm9, %v7192_v56, %v5242_v39  ;;  %v2758_v5 = vsel %vm2740_vm9, %v7195_v36, %v5243_v45  ;;  %v1370_v39 = vmax.f32 %v1074_v26, 0.0 }
 0x1cd   : > { %v1481_v9 = vmax.f32 %v1369_v51, %v1397_v47  ;;  %v1587_v51 = vrot.slane %v7169_v16, 1  ;;  %v1226_v47 = vadd.f32 %v7138_v59, %v1225_v21  ;;  %v1688_v32 = vsel %vm1681_vm3, %v1685_v29, %v1687_v57 }
 0x1ce   : > { %5405 = vrot.lane.b32.xlu1 %v5404_v6, %s9667_s13  ;;  %v1302_v21 = vadd.f32 %v7138_v59, %v6526_v7 }
 0x1cf   : > { %v7197_v52 = vpop.permute.xlu1 %5275  ;;  %v7202_v44 = vmax.f32 %v1481_v9, %v1509_v19  ;;  %5400 = vrot.lane.b32.xlu0 %v5399_v41, %s9679_s24 }
 0x1d0   : > { %v1149_v61 = vpop.f32.mrf.mxu0 }
 0x1d1   : > { %v1150_v0 = vadd.f32 %v7138_v59, %v1149_v61  ;;  %v9652_v3 = vrot.slane %v7202_v44, 2  ;;  %v9651_v41 = vrot.slane %v7202_v44, 4  ;;  %v1589_v45 = vrot.slane %v7202_v44, 1 }
 0x1d2   : > { %v7204_v46 = vpop.permute.xlu0 %5250 }
 0x1d3   : > { %v9650_v58 = vunpack.i.h.bf16 %v7204_v46  ;;  %v9649_v13 = vunpack.i.l.bf16 %v7204_v46  ;;  %v1690_v9 = vsel %vm1681_vm3, %v1687_v57, %v9652_v3  ;;  %v1888_v29 = vsel %vm9779_vm0, %v1885_v55, %v9651_v41 }
 0x1d4   : > { %v7237_v61 = vpack.i.bf16 %v1690_v9, %v1688_v32  ;;  %v1588_v57 = vsel %vm9780_vm4, %v1585_v50, %v1587_v51  ;;  %v1590_v26 = vsel %vm9780_vm4, %v1587_v51, %v1589_v45  ;;  %v1788_v50 = vrot.slane %v7202_v44, 3 }
 0x1d5   : > { %v2778_v19 = vsel %vm2761_vm10, %v2757_v48, %v9649_v13  ;;  %v2779_v6 = vsel %vm2761_vm10, %v2758_v5, %v9650_v58  ;;  %v1398_v48 = vmax.f32 %v1150_v0, 0.0  ;;  %v1886_v5 = vsel %vm9779_vm0, %v1883_v1, %v1885_v55 }
 0x1d6   : > { %v1426_v13 = vmax.f32 %v1226_v47, 0.0  ;;  %5415 = vrot.lane.b32.xlu2 %v7237_v61, %s9710_s15  ;;  %v5424_v0 = vpack.i.bf16 %v1888_v29, %v1886_v5  ;;  %v5409_v32 = vpack.i.bf16 %v1590_v26, %v1588_v57  ;;  %v1077_v1 = vadd.f32 %v7138_v59, %v6531_v10 }
 0x1d7   : > { %v7249_v7 = vpop.permute.xlu1 %5280  ;;  %v1454_v51 = vmax.f32 %v1302_v21, 0.0  ;;  %v1482_v47 = vmax.f32 %v1370_v39, %v1398_v48  ;;  %v1786_v21 = vrot.slane %v7169_v16, 3  ;;  %v7274_v48 = vpop.permute.xlu2 %5290 }
 0x1d8   : > { %v9655_v55 = vunpack.i.h.bf16 %v7249_v7  ;;  %v9654_v9 = vunpack.i.l.bf16 %v7249_v7  ;;  %5425 = vrot.lane.b32.xlu1 %v5424_v0, %s9679_s24  ;;  %5410 = vrot.lane.b32.xlu0 %v5409_v32, %s9669_s16  ;;  %v1152_v5 = vpop.f32.mrf.mxu0  ;;  %9923 = vst [vmem:[#allocation90_spill] sm:$0xff] %v7274_v48  ;;  %v1371_v26 = vmax.f32 %v1077_v1, 0.0 }
 0x1d9   : > { %v1510_v39 = vmax.f32 %v1426_v13, %v1454_v51  ;;  %v1153_v57 = vadd.f32 %v7138_v59, %v1152_v5  ;;  %v7280_v25 = vsel %vm1046_vm1, %v1786_v21, %v1788_v50 }
 0x1da   : > { %v7257_v58 = vpop.permute.xlu0 %5255  ;;  %v7266_v10 = vsel %vm2782_vm11, %v2778_v19, %v9654_v9  ;;  %v7271_v29 = vsel %vm2782_vm11, %v2779_v6, %v9655_v55  ;;  %v5262_v19 = vunpack.i.l.bf16 %v7162_v4  ;;  %v9924_v55 = vrot.slane %v7128_v33, 3 }
 0x1db   : > { %9922 = vst [vmem:[#allocation89_spill] sm:$0xff] %v7257_v58  ;;  %v5257_v41 = vunpack.i.l.bf16 %v7257_v58  ;;  %v7283_v9 = vmax.f32 %v1482_v47, %v1510_v39  ;;  %v1399_v6 = vmax.f32 %v1153_v57, 0.0 }
 0x1dc   : > { %v7288_v13 = vsel %vm1046_vm1, %v9924_v55, %v1786_v21 }
 0x1dd   : > { %v2696_v3 = vsel %vm2677_vm6, %v6659_v40, %v5257_v41  ;;  %v1483_v5 = vmax.f32 %v1371_v26, %v1399_v6  ;;  %v5419_v40 = vpack.i.bf16 %v7280_v25, %v7288_v13  ;;  %v5267_v41 = vunpack.i.l.bf16 %v7208_v63 }
 0x1de   : > { %v2717_v51 = vsel %vm2698_vm7, %v2696_v3, %v5262_v19  ;;  %5430 = vrot.lane.b32.xlu2 %v5409_v32, %s9716_s22  ;;  %v1591_v21 = vrot.slane %v7283_v9, 1  ;;  %v9657_v26 = vunpack.i.l.bf16 %v7274_v48 }
 0x1df   : > { %v7291_v1 = vpop.permute.xlu1 %5285  ;;  %v7301_v57 = vmax.f32 %v1483_v5, %v6551_v23  ;;  %v7307_v32 = vsel %vm2719_vm8, %v2717_v51, %v5267_v41  ;;  %v7316_v5 = vpop.permute.xlu2 %5295 }
 0x1e0   : > { %9925 = vst [vmem:[#allocation91_spill] sm:$0xff] %v7291_v1  ;;  %v9658_v47 = vunpack.i.l.bf16 %v7291_v1  ;;  %5420 = vrot.lane.b32.xlu0 %v5419_v40, %s9703_s14  ;;  %v1154_v3 = vpop.f32.mrf.mxu0  ;;  %v1592_v40 = vsel %vm9780_vm4, %v1589_v45, %v1591_v21  ;;  %v1082_v45 = vadd.f32 %v7138_v59, %v6558_v27  ;;  %v5444_v27 = vpack.i.bf16 %v7283_v9, %v7202_v44 }
 0x1e1   : > { %9927 = vst [vmem:[#allocation93_spill] sm:$0xff] %v7307_v32  ;;  %v9659_v6 = vrot.slane %v7301_v57, 1  ;;  %v9678_v58 = vrot.slane %v7301_v57, 4 }
 0x1e2   : > { %v7298_v39 = vpop.permute.xlu0 %5270  ;;  %9928 = vst [vmem:[#allocation94_spill] sm:$0xff] %v7316_v5 }
 0x1e3   : > { %9926 = vst [vmem:[#allocation92_spill] sm:$0xff] %v7298_v39  ;;  %v5272_v55 = vunpack.i.l.bf16 %v7298_v39  ;;  %v1594_v51 = vsel %vm9780_vm4, %v1591_v21, %v9659_v6  ;;  %v1691_v39 = vrot.slane %v7283_v9, 2 }
 0x1e4   : > { %v7325_v63 = vpack.i.bf16 %v1594_v51, %v1592_v40  ;;  %v1373_v51 = vmax.f32 %v1082_v45, 0.0 }
 0x1e5   : > { %v2759_v19 = vsel %vm2740_vm9, %v7307_v32, %v5272_v55 }
 0x1e6   : > { %v2780_v23 = vsel %vm2761_vm10, %v2759_v19, %v9658_v47  ;;  %5440 = vrot.lane.b32.xlu2 %v5424_v0, %s9696_s30  ;;  %v9662_v19 = vrot.slane %v7301_v57, 3  ;;  %5465 = vrot.lane.b32.xlu1 %v7325_v63, %s9669_s16  ;;  %s9936_s16 = smov 48  }
 0x1e7   : > { %v2801_v41 = vsel %vm2782_vm11, %v2780_v23, %v9657_v26  ;;  %v7327_v55 = vpop.permute.xlu1 %5310  ;;  %v1790_v23 = vrot.slane %v7283_v9, 3  ;;  %v7351_v4 = vpop.permute.xlu2 %5305 }
 0x1e8   : > { %9929 = vst [vmem:[#allocation95_spill] sm:$0xff] %v7327_v55  ;;  %5435 = vrot.lane.b32.xlu0 %v7237_v61, %s9714_s25  ;;  %v1157_v21 = vpop.f32.mrf.mxu0  ;;  %v1307_v55 = vadd.f32 %v7138_v59, %v6553_v24 }
 0x1e9   : > { %v1158_v40 = vadd.f32 %v7138_v59, %v1157_v21  ;;  %v7342_v0 = vsel %vm1046_vm1, %v1790_v23, %v9662_v19  ;;  %v1791_v47 = vsel %vm1046_vm1, %v1788_v50, %v1790_v23  ;;  %9930 = vst [vmem:[#allocation96_spill] sm:$0xff] %v7351_v4  ;;  %v9932_v23 = vrot.slane %v7202_v44, 2 }
 0x1ea   : > { %v7348_v61 = vpack.i.bf16 %v7342_v0, %v1791_v47  ;;  %v1155_v19 = vadd.f32 %v7138_v59, %v1154_v3  ;;  %v9937_v4 = vrot.slane %v7301_v57, 2 }
 0x1eb   : > { %v1401_v26 = vmax.f32 %v1158_v40, 0.0 }
 0x1ec   : > { %v1400_v24 = vmax.f32 %v1155_v19, 0.0  ;;  %v1694_v31 = vsel %vm1681_vm3, %v1691_v39, %v9937_v4 }
 0x1ed   : > { %v1485_v6 = vmax.f32 %v1373_v51, %v1401_v26  ;;  %v1692_v51 = vsel %vm1681_vm3, %v9932_v23, %v1691_v39  ;;  %v1456_v23 = vmax.f32 %v1307_v55, 0.0  ;;  %v9941_v39 = vld [vmem:[#allocation17_spill] sm:$0xff] }
 0x1ee   : > { %5445 = vrot.lane.b32.xlu2 %v5444_v27, %s9667_s13  ;;  %5475 = vrot.lane.b32.xlu1 %v7348_v61, %s9703_s14  ;;  %s9681_s13 = smov 66   ;;  %v5469_v55 = vpack.i.bf16 %v1694_v31, %v1692_v51 }
 0x1ef   : > { %v7353_v21 = vpop.permute.xlu1 %5315  ;;  %v7357_v45 = vmax.f32 %v1485_v6, %v6571_v38  ;;  %v5454_v38 = vpack.i.bf16 %v1692_v51, %v6700_v54  ;;  %v1231_v6 = vadd.f32 %v7138_v59, %v6508_v62  ;;  %v9934_v54 = vld [vmem:[#allocation15_spill] sm:$0xff]  ;;  %v1889_v62 = vrot.slane %v7283_v9, 4  ;;  %v7388_v3 = vpop.permute.xlu2 %5320 }
 0x1f0   : > { %9931 = vst [vmem:[#allocation97_spill] sm:$0xff] %v7353_v21  ;;  %v9665_v40 = vunpack.i.l.bf16 %v7353_v21  ;;  %5450 = vrot.lane.b32.xlu0 %v5444_v27, %s9726_s12  ;;  %v7363_v50 = vpop.f32.mrf.mxu0  ;;  %v1079_v27 = vadd.f32 %v7138_v59, %v6547_v20  ;;  %v1087_v53 = vadd.f32 %v7138_v59, %v9934_v54 }
 0x1f1   : > { %v1428_v54 = vmax.f32 %v1231_v6, 0.0 }
 0x1f2   : > { %v2822_v26 = vsel %vm9794_vm12, %v2801_v41, %v9665_v40  ;;  %v9933_v41 = vld [vmem:[#allocation29_spill] sm:$0xff]  ;;  %v1375_v14 = vmax.f32 %v1087_v53, 0.0 }
 0x1f3   : > { %v5459_v40 = vpack.i.bf16 %v1791_v47, %v9933_v41  ;;  %9935 = vst [vmem:[#allocation29_spill] sm:$0xff] %v7388_v3  ;;  %v1892_v47 = vsel %vm9779_vm0, %v1889_v62, %v9678_v58  ;;  %v1372_v41 = vmax.f32 %v1079_v27, 0.0  ;;  %v9939_v58 = vld [vmem:[#allocation31_spill] sm:$0xff]  ;;  %v1512_v4 = vmax.f32 %v1428_v54, %v1456_v23  ;;  %v9947_v54 = vld [vmem:[#allocation22_spill] sm:$0xff] }
 0x1f4   : > { %v5509_v27 = vpack.i.bf16 %v9939_v58, %v1694_v31  ;;  %v9944_v58 = vld [vmem:[#allocation20_spill] sm:$0xff] }
 0x1f5   : > { %v1484_v11 = vmax.f32 %v1372_v41, %v1400_v24 }
 0x1f6   : > { %5455 = vrot.lane.b32.xlu2 %v5454_v38, %s9714_s25  ;;  %5490 = vrot.lane.b32.xlu1 %v7325_v63, %s9681_s13  ;;  %s9685_s13 = smov 90  }
 0x1f8   : > { %5460 = vrot.lane.b32.xlu0 %v5459_v40, %s9936_s16  ;;  %v1162_v20 = vpop.f32.mrf.mxu0  ;;  %v9938_v40 = vrot.slane %v7202_v44, 4 }
 0x1f9   : > { %v1163_v38 = vadd.f32 %v7138_v59, %v1162_v20  ;;  %v9687_v20 = vunpack.i.l.bf16 %v7388_v3 }
 0x1fa   : > { %v1890_v19 = vsel %vm9779_vm0, %v9938_v40, %v1889_v62 }
 0x1fb   : > { %v1403_v22 = vmax.f32 %v1163_v38, 0.0  ;;  %v5479_v2 = vpack.i.bf16 %v1892_v47, %v1890_v19  ;;  %v7407_v53 = vsel %vm9793_vm13, %v2822_v26, %v9687_v20  ;;  %v9948_v19 = vrot.slane %v7301_v57, 3 }
 0x1fc   : > { %9940 = vst [vmem:[#allocation15_spill] sm:$0xff] %v7407_v53 }
 0x1fd   : > { %v1487_v35 = vmax.f32 %v1375_v14, %v1403_v22  ;;  %v7416_v14 = vmax.f32 %v1484_v11, %v1512_v4  ;;  %v7418_v22 = vpop.permute.xlu2 %5350  ;;  %v7428_v11 = vpop.permute.xlu0 %5300  ;;  %v9950_v4 = vld [vmem:[#allocation30_spill] sm:$0xff] }
 0x1fe   : > { %5480 = vrot.lane.b32.xlu2 %v5479_v2, %s9679_s24  ;;  %5510 = vrot.lane.b32.xlu1 %v5509_v27, %s9714_s25  ;;  %9943 = vst [vmem:[#allocation17_spill] sm:$0xff] %v7418_v22  ;;  %s9683_s24 = smov 72   ;;  %v9957_v22 = vld [vmem:[#allocation27_spill] sm:$0xff] }
 0x1ff   : > { %v7410_v6 = vmax.f32 %v1487_v35, %v9941_v39  ;;  %v5529_v31 = vpack.i.bf16 %v7416_v14, %v7301_v57  ;;  %v1092_v35 = vadd.f32 %v7138_v59, %v9944_v58  ;;  %9945 = vst [vmem:[#allocation20_spill] sm:$0xff] %v7428_v11  ;;  %v1794_v41 = vrot.slane %v7416_v14, 3  ;;  %v9951_v58 = vld [vmem:[#allocation39_spill] sm:$0xff] }
 0x200   : > { %5470 = vrot.lane.b32.xlu0 %v5469_v55, %s9710_s15  ;;  %v7414_v62 = vpop.f32.mrf.mxu0  ;;  %v5514_v39 = vpack.i.bf16 %v9950_v4, %v7342_v0 }
 0x201   : > { %9942 = vst [vmem:[#allocation31_spill] sm:$0xff] %v7410_v6  ;;  %v1377_v23 = vmax.f32 %v1092_v35, 0.0  ;;  %v1795_v27 = vsel %vm1046_vm1, %v9948_v19, %v1794_v41  ;;  %v10013_v21 = vrot.slane %v7410_v6, 3  ;;  %v10014_v56 = vrot.slane %v7410_v6, 2 }
 0x202   : > { %v5544_v35 = vpack.i.bf16 %v1795_v27, %v9951_v58 }
 0x205   : > { %v7431_v38 = vpop.permute.xlu2 %5355 }
 0x206   : > { %5495 = vrot.lane.b32.xlu2 %v5469_v55, %s9683_s24  ;;  %5530 = vrot.lane.b32.xlu1 %v5529_v31, %s9685_s13  ;;  %9946 = vst [vmem:[#allocation98_spill] sm:$0xff] %v7431_v38  ;;  %s9694_s24 = smov 84   ;;  %s9730_s13 = smov 78   ;;  %v7446_v55 = vpop.permute.xlu0 %5325 }
 0x207   : > { %9949 = vst [vmem:[#allocation22_spill] sm:$0xff] %v7446_v55 }
 0x208   : > { %5485 = vrot.lane.b32.xlu0 %v7325_v63, %s9716_s22  ;;  %v1167_v26 = vpop.f32.mrf.mxu0 }
 0x209   : > { %v1168_v51 = vadd.f32 %v7138_v59, %v1167_v26  ;;  %v9690_v26 = vrot.slane %v7357_v45, 3 }
 0x20b   : > { %v1405_v24 = vmax.f32 %v1168_v51, 0.0  ;;  %v7467_v4 = vsel %vm1046_vm1, %v1794_v41, %v9690_v26  ;;  %v1327_v41 = vadd.f32 %v7138_v59, %v9957_v22 }
 0x20d   : > { %v1489_v47 = vmax.f32 %v1377_v23, %v1405_v24  ;;  %v7452_v51 = vpop.permute.xlu2 %5370  ;;  %v9953_v23 = vld [vmem:[#allocation24_spill] sm:$0xff] }
 0x20e   : > { %5505 = vrot.lane.b32.xlu2 %v5479_v2, %s9694_s24  ;;  %5535 = vrot.lane.b32.xlu1 %v5529_v31, %s9726_s12  ;;  %9952 = vst [vmem:[#allocation30_spill] sm:$0xff] %v7452_v51  ;;  %v1097_v24 = vadd.f32 %v7138_v59, %v9953_v23  ;;  %v9956_v51 = vld [vmem:[#allocation19_spill] sm:$0xff]  ;;  %v7482_v26 = vpop.permute.xlu0 %5345  ;;  %s9961_s24 = smov 6  }
 0x20f   : > { %v7436_v40 = vmax.f32 %v1489_v47, %v9947_v54  ;;  %v7458_v47 = vpop.permute.xlu1 %5330  ;;  %v1595_v54 = vrot.slane %v7416_v14, 1  ;;  %9958 = vst [vmem:[#allocation19_spill] sm:$0xff] %v7482_v26  ;;  %v9965_v26 = vrot.slane %v7301_v57, 2 }
 0x210   : > { %5500 = vrot.lane.b32.xlu0 %v7348_v61, %s9730_s13  ;;  %v7441_v63 = vpop.f32.mrf.mxu0  ;;  %v9693_v61 = vrot.slane %v7357_v45, 1  ;;  %9954 = vst [vmem:[#allocation24_spill] sm:$0xff] %v7458_v47  ;;  %v1379_v23 = vmax.f32 %v1097_v24, 0.0  ;;  %v9959_v24 = vld [vmem:[#allocation25_spill] sm:$0xff]  ;;  %v9966_v47 = vld [vmem:[#allocation12_spill] sm:$0xff] }
 0x215   : > { %v7494_v22 = vpop.permute.xlu2 %5375 }
 0x216   : > { %5515 = vrot.lane.b32.xlu2 %v5514_v39, %s9936_s16  ;;  %5545 = vrot.lane.b32.xlu1 %v5544_v35, %s9936_s16  ;;  %v1598_v39 = vsel %vm9780_vm4, %v1595_v54, %v9693_v61  ;;  %v7473_v35 = vpack.i.bf16 %v7467_v4, %v1795_v27  ;;  %v9705_v27 = vrot.slane %v7357_v45, 2  ;;  %v9960_v61 = vld [vmem:[#allocation26_spill] sm:$0xff]  ;;  %9962 = vst [vmem:[#allocation27_spill] sm:$0xff] %v7494_v22 }
 0x218   : > { %5520 = vrot.lane.b32.xlu0 %v5479_v2, %s9696_s30  ;;  %v1172_v0 = vpop.f32.mrf.mxu0  ;;  %v9955_v2 = vrot.slane %v7301_v57, 1  ;;  %s9963_s30 = smov 30  }
 0x219   : > { %v1173_v19 = vadd.f32 %v7138_v59, %v1172_v0  ;;  %v1251_v0 = vadd.f32 %v7138_v59, %v9956_v51  ;;  %v1695_v51 = vrot.slane %v7416_v14, 2 }
 0x21a   : > { %v1596_v53 = vsel %vm9780_vm4, %v9955_v2, %v1595_v54 }
 0x21b   : > { %v1407_v20 = vmax.f32 %v1173_v19, 0.0  ;;  %v5549_v55 = vpack.i.bf16 %v1598_v39, %v1596_v53  ;;  %v1099_v19 = vadd.f32 %v7138_v59, %v9959_v24  ;;  %v1436_v53 = vmax.f32 %v1251_v0, 0.0 }
 0x21c   : > { %v1464_v39 = vmax.f32 %v1327_v41, 0.0  ;;  %v1696_v58 = vsel %vm1681_vm3, %v9965_v26, %v1695_v51  ;;  %v7516_v26 = vpop.permute.xlu0 %5360 }
 0x21d   : > { %v1491_v38 = vmax.f32 %v1379_v23, %v1407_v20  ;;  %v7497_v23 = vpop.permute.xlu1 %5335  ;;  %9971 = vst [vmem:[#allocation26_spill] sm:$0xff] %v7516_v26 }
 0x21e   : > { %5560 = vrot.lane.b32.xlu2 %v7473_v35, %s9703_s14  ;;  %5550 = vrot.lane.b32.xlu1 %v5549_v55, %s9961_s24  ;;  %9964 = vst [vmem:[#allocation25_spill] sm:$0xff] %v7497_v23  ;;  %v1520_v22 = vmax.f32 %v1436_v53, %v1464_v39  ;;  %v1084_v23 = vadd.f32 %v7138_v59, %v9966_v47  ;;  %s9969_s14 = smov 66   ;;  %v1893_v39 = vrot.slane %v7416_v14, 4 }
 0x21f   : > { %v7490_v54 = vmax.f32 %v1491_v38, %v9960_v61  ;;  %v1698_v38 = vsel %vm1681_vm3, %v1695_v51, %v9705_v27  ;;  %v1380_v61 = vmax.f32 %v1099_v19, 0.0  ;;  %v1312_v19 = vadd.f32 %v7138_v59, %v9968_v34 }
 0x220   : > { %5525 = vrot.lane.b32.xlu0 %v5529_v31, %s9963_s30  ;;  %v1174_v20 = vpop.f32.mrf.mxu0  ;;  %v1160_v31 = vadd.f32 %v7138_v59, %v7363_v50  ;;  %v5554_v41 = vpack.i.bf16 %v1698_v38, %v1696_v58  ;;  %v9709_v50 = vrot.slane %v7357_v45, 4  ;;  %v7522_v47 = vpop.permute.xlu2 %5395  ;;  %v5594_v26 = vpack.i.bf16 %v6911_v37, %v1698_v38 }
 0x221   : > { %v1175_v2 = vadd.f32 %v7138_v59, %v1174_v20  ;;  %v9967_v20 = vld [vmem:[#allocation10_spill] sm:$0xff]  ;;  %9972 = vst [vmem:[#allocation12_spill] sm:$0xff] %v7522_v47  ;;  %v9974_v47 = vrot.slane %v7301_v57, 4  ;;  %v9991_v37 = vrot.slane %v7357_v45, 2 }
 0x222   : > { %v1236_v11 = vadd.f32 %v7138_v59, %v9967_v20  ;;  %v1402_v53 = vmax.f32 %v1160_v31, 0.0  ;;  %v9712_v31 = vrot.slane %v7490_v54, 1 }
 0x223   : > { %v1408_v24 = vmax.f32 %v1175_v2, 0.0  ;;  %v9970_v2 = vld [vmem:[#allocation37_spill] sm:$0xff] }
 0x224   : > { %v5539_v27 = vpack.i.bf16 %v1696_v58, %v9970_v2  ;;  %v1458_v58 = vmax.f32 %v1312_v19, 0.0  ;;  %v9713_v2 = vrot.slane %v7490_v54, 4  ;;  %v9975_v19 = vrot.slane %v6639_v17, 1 }
 0x225   : > { %v1492_v0 = vmax.f32 %v1380_v61, %v1408_v24  ;;  %v1374_v61 = vmax.f32 %v1084_v23, 0.0  ;;  %v1430_v24 = vmax.f32 %v1236_v11, 0.0  ;;  %v1894_v11 = vsel %vm9779_vm0, %v9974_v47, %v1893_v39 }
 0x226   : > { %5575 = vrot.lane.b32.xlu2 %v5549_v55, %s9969_s14  ;;  %5555 = vrot.lane.b32.xlu1 %v5554_v41, %s9710_s15  ;;  %s9977_s15 = smov 24  }
 0x227   : > { %v7518_v51 = vmax.f32 %v1492_v0, %v1520_v22  ;;  %v7528_v22 = vpop.permute.xlu1 %5340  ;;  %v1896_v0 = vsel %vm9779_vm0, %v1893_v39, %v9709_v50 }
 0x228   : > { %5540 = vrot.lane.b32.xlu0 %v5539_v27, %s9714_s25  ;;  %9973 = vst [vmem:[#allocation10_spill] sm:$0xff] %v7528_v22  ;;  %v1486_v27 = vmax.f32 %v1374_v61, %v1402_v53  ;;  %v9976_v53 = vrot.slane %v6639_v17, 4  ;;  %v1514_v61 = vmax.f32 %v1430_v24, %v1458_v58  ;;  %v5564_v47 = vpack.i.bf16 %v1896_v0, %v1894_v11 }
 0x229   : > { %v1611_v34 = vrot.slane %v7518_v51, 1  ;;  %v1909_v20 = vrot.slane %v7518_v51, 4 }
 0x22a   : > { %v7553_v39 = vmax.f32 %v1486_v27, %v1514_v61  ;;  %v9989_v27 = vrot.slane %v7357_v45, 1 }
 0x22b   : > { %v1612_v23 = vsel %vm9780_vm4, %v9712_v31, %v1611_v34  ;;  %v1614_v22 = vsel %vm9780_vm4, %v1611_v34, %v9975_v19  ;;  %v1910_v50 = vsel %vm9779_vm0, %v9713_v2, %v1909_v20  ;;  %v1912_v38 = vsel %vm9779_vm0, %v1909_v20, %v9976_v53  ;;  %v7562_v2 = vpop.permute.xlu0 %5380 }
 0x22c   : > { %v7558_v34 = vpack.i.bf16 %v1614_v22, %v1612_v23  ;;  %v7560_v19 = vpack.i.bf16 %v1912_v38, %v1910_v50  ;;  %9978 = vst [vmem:[#allocation13_spill] sm:$0xff] %v7562_v2  ;;  %v5614_v24 = vpack.i.bf16 %v7553_v39, %v7357_v45  ;;  %v9718_v20 = vrot.slane %v7410_v6, 1 }
 0x22d   : > { %v1599_v22 = vrot.slane %v7553_v39, 1  ;;  %v9724_v53 = vrot.slane %v7410_v6, 2  ;;  %v5599_v38 = vpack.i.bf16 %v6907_v15, %v7467_v4  ;;  %v9733_v61 = vrot.slane %v7553_v39, 7 }
 0x22e   : > { %5595 = vrot.lane.b32.xlu2 %v5594_v26, %s9714_s25  ;;  %5570 = vrot.lane.b32.xlu1 %v5549_v55, %s9716_s22  ;;  %s9980_s25 = smov 90   ;;  %s9981_s22 = smov 72   ;;  %v9992_v2 = vrot.slane %v7410_v6, 3 }
 0x22f   : > { %v7566_v58 = vpop.permute.xlu1 %5365  ;;  %v1600_v11 = vsel %vm9780_vm4, %v9989_v27, %v1599_v22  ;;  %v1798_v27 = vrot.slane %v7553_v39, 3 }
 0x230   : > { %5565 = vrot.lane.b32.xlu0 %v5564_v47, %s9977_s15  ;;  %v7556_v31 = vpop.permute.xlu2 %5415  ;;  %9979 = vst [vmem:[#allocation99_spill] sm:$0xff] %v7566_v58 }
 0x231   : > { %v1801_v58 = vsel %vm1046_vm1, %v1798_v27, %v9992_v2 }
 0x236   : > { %5615 = vrot.lane.b32.xlu2 %v5614_v24, %s9980_s25  ;;  %5585 = vrot.lane.b32.xlu1 %v7473_v35, %s9730_s13  ;;  %s9995_s13 = smov 18  }
 0x238   : > { %5580 = vrot.lane.b32.xlu0 %v5554_v41, %s9981_s22  ;;  %v7572_v55 = vpop.permute.xlu2 %5430  ;;  %v7576_v50 = vpop.permute.xlu1 %5390  ;;  %v1602_v41 = vsel %vm9780_vm4, %v1599_v22, %v9718_v20  ;;  %v1699_v20 = vrot.slane %v7553_v39, 2 }
 0x239   : > { %9982 = vst [vmem:[#allocation100_spill] sm:$0xff] %v7572_v55  ;;  %v7574_v26 = vpop.permute.xlu0 %5385  ;;  %v5629_v23 = vpack.i.bf16 %v1602_v41, %v1600_v11  ;;  %v3070_v41 = vrot.slane %v7357_v45, 7 }
 0x23a   : > { %9983 = vst [vmem:[#allocation101_spill] sm:$0xff] %v7574_v26  ;;  %v1702_v4 = vsel %vm1681_vm3, %v1699_v20, %v9724_v53  ;;  %v9993_v53 = vrot.slane %v7357_v45, 3 }
 0x23b   : > { %9984 = vst [vmem:[#allocation102_spill] sm:$0xff] %v7576_v50 }
 0x23c   : > { %v1799_v55 = vsel %vm1046_vm1, %v9993_v53, %v1798_v27 }
 0x23e   : > { %5620 = vrot.lane.b32.xlu2 %v5614_v24, %s9726_s12  ;;  %5605 = vrot.lane.b32.xlu1 %v5564_v47, %s9985_s0  ;;  %s9994_s12 = smov 12  }
 0x240   : > { %5590 = vrot.lane.b32.xlu0 %v5564_v47, %s9986_s1  ;;  %v7583_v0 = vpop.permute.xlu2 %5440  ;;  %v7598_v47 = vpop.permute.xlu1 %5405 }
 0x241   : > { %9987 = vst [vmem:[#allocation103_spill] sm:$0xff] %v7583_v0  ;;  %v7585_v35 = vpop.permute.xlu0 %5400 }
 0x242   : > { %9988 = vst [vmem:[#allocation104_spill] sm:$0xff] %v7585_v35  ;;  %v9732_v35 = vrot.slane %v7410_v6, 4 }
 0x243   : > { %9990 = vst [vmem:[#allocation105_spill] sm:$0xff] %v7598_v47  ;;  %v5639_v47 = vpack.i.bf16 %v1801_v58, %v1799_v55  ;;  %v9996_v58 = vrot.slane %v7357_v45, 4 }
 0x246   : > { %5630 = vrot.lane.b32.xlu2 %v5629_v23, %s9961_s24  ;;  %5610 = vrot.lane.b32.xlu1 %v5614_v24, %s9963_s30  ;;  %v3072_v24 = vsel %vm3069_vm5, %v3070_v41, %v9733_v61 }
 0x247   : > { %v5624_v15 = vpack.i.bf16 %v3072_v24, %v3070_v41 }
 0x248   : > { %5600 = vrot.lane.b32.xlu0 %v5599_v38, %s9936_s16  ;;  %v7604_v22 = vpop.permute.xlu2 %5445  ;;  %v1700_v38 = vsel %vm1681_vm3, %v9991_v37, %v1699_v20  ;;  %v1897_v20 = vrot.slane %v7553_v39, 4 }
 0x249   : > { %v5634_v0 = vpack.i.bf16 %v1702_v4, %v1700_v38  ;;  %v1165_v38 = vadd.f32 %v7138_v59, %v7414_v62 }
 0x24a   : > { %v7611_v11 = vpop.permute.xlu0 %5410  ;;  %v7632_v2 = vpop.permute.xlu1 %5425  ;;  %v1900_v53 = vsel %vm9779_vm0, %v1897_v20, %v9732_v35  ;;  %v1898_v55 = vsel %vm9779_vm0, %v9996_v58, %v1897_v20  ;;  %v10000_v35 = vld [vmem:[#allocation16_spill] sm:$0xff]  ;;  %v10001_v20 = vld [vmem:[#allocation11_spill] sm:$0xff]  ;;  %v10002_v58 = vld [vmem:[#allocation18_spill] sm:$0xff] }
 0x24b   : > { %v5644_v4 = vpack.i.bf16 %v1900_v53, %v1898_v55  ;;  %v1089_v61 = vadd.f32 %v7138_v59, %v10000_v35  ;;  %v1241_v53 = vadd.f32 %v7138_v59, %v10001_v20  ;;  %v1317_v55 = vadd.f32 %v7138_v59, %v10002_v58 }
 0x24c   : > { %v1404_v50 = vmax.f32 %v1165_v38, 0.0  ;;  %v5427_v49 = vunpack.i.l.bf16 %v7632_v2 }
 0x24d   : > { %v1376_v62 = vmax.f32 %v1089_v61, 0.0  ;;  %v1432_v43 = vmax.f32 %v1241_v53, 0.0  ;;  %v1460_v35 = vmax.f32 %v1317_v55, 0.0 }
 0x24e   : > { %5635 = vrot.lane.b32.xlu2 %v5634_v0, %s9994_s12  ;;  %5625 = vrot.lane.b32.xlu1 %v5624_v15, %s9977_s15 }
 0x24f   : > { %v1488_v20 = vmax.f32 %v1376_v62, %v1404_v50  ;;  %v1516_v3 = vmax.f32 %v1432_v43, %v1460_v35  ;;  %v9756_v43 = vrot.slane %v7436_v40, 3 }
 0x250   : > { %5640 = vrot.lane.b32.xlu0 %v5639_v47, %s9995_s13  ;;  %v7629_v37 = vpop.permute.xlu2 %5455 }
 0x251   : > { %v7670_v58 = vmax.f32 %v1488_v20, %v1516_v3  ;;  %v3073_v3 = vrot.slane %v7410_v6, 7 }
 0x252   : > { %v7634_v41 = vpop.permute.xlu0 %5420 }
 0x253   : > { %10006 = vst [vmem:[#allocation18_spill] sm:$0xff] %v7670_v58  ;;  %v5689_v61 = vpack.i.bf16 %v7670_v58, %v7410_v6  ;;  %v9750_v50 = vrot.slane %v7670_v58, 7  ;;  %v1802_v53 = vrot.slane %v7670_v58, 3  ;;  %v1703_v35 = vrot.slane %v7670_v58, 2 }
 0x255   : > { %v3076_v62 = vsel %vm3069_vm5, %v3073_v3, %v9750_v50  ;;  %v1803_v50 = vsel %vm1046_vm1, %v10013_v21, %v1802_v53  ;;  %v1704_v1 = vsel %vm1681_vm3, %v10014_v56, %v1703_v35 }
 0x256   : > { %5650 = vrot.lane.b32.xlu2 %v5629_v23, %s9997_s2  ;;  %5645 = vrot.lane.b32.xlu1 %v5644_v4, %s9977_s15 }
 0x258   : > { %5655 = vrot.lane.b32.xlu0 %v5634_v0, %s9998_s26  ;;  %v7645_v15 = vpop.permute.xlu2 %5480  ;;  %v7647_v27 = vpop.permute.xlu1 %5465 }
 0x25a   : > { %v7649_v24 = vpop.permute.xlu0 %5435 }
 0x25b   : > { %9999 = vst [vmem:[#allocation106_spill] sm:$0xff] %v7649_v24 }
 0x25e   : > { %5660 = vrot.lane.b32.xlu2 %v5639_v47, %s9936_s16  ;;  %5670 = vrot.lane.b32.xlu1 %v5634_v0, %s9981_s22 }
 0x260   : > { %5665 = vrot.lane.b32.xlu0 %v5629_v23, %s9969_s14  ;;  %v7662_v24 = vpop.permute.xlu2 %5495  ;;  %v7664_v26 = vpop.permute.xlu1 %5475 }
 0x261   : > { %10003 = vst [vmem:[#allocation16_spill] sm:$0xff] %v7662_v24  ;;  %v10012_v24 = vrot.slane %v7436_v40, 2 }
 0x262   : > { %v7666_v8 = vpop.permute.xlu0 %5450 }
 0x263   : > { %10004 = vst [vmem:[#allocation11_spill] sm:$0xff] %v7666_v8 }
 0x266   : > { %5675 = vrot.lane.b32.xlu2 %v5639_v47, %s10005_s19  ;;  %5680 = vrot.lane.b32.xlu1 %v5644_v4, %s9986_s1  ;;  %v1805_v47 = vsel %vm1046_vm1, %v1802_v53, %v9756_v43  ;;  %v9759_v43 = vrot.slane %v7436_v40, 1 }
 0x267   : > { %v5719_v48 = vpack.i.bf16 %v1805_v47, %v1803_v50  ;;  %v10017_v50 = vld [vmem:[#allocation14_spill] sm:$0xff] }
 0x268   : > { %5685 = vrot.lane.b32.xlu0 %v5644_v4, %s9985_s0  ;;  %v7673_v0 = vpop.permute.xlu2 %5505  ;;  %v7675_v23 = vpop.permute.xlu1 %5490  ;;  %v1246_v47 = vadd.f32 %v7138_v59, %v10017_v50 }
 0x269   : > { %10007 = vst [vmem:[#allocation107_spill] sm:$0xff] %v7673_v0 }
 0x26a   : > { %10008 = vst [vmem:[#allocation108_spill] sm:$0xff] %v7675_v23  ;;  %v7677_v38 = vpop.permute.xlu0 %5460  ;;  %v1706_v23 = vsel %vm1681_vm3, %v1703_v35, %v10012_v24 }
 0x26b   : > { %10009 = vst [vmem:[#allocation109_spill] sm:$0xff] %v7677_v38  ;;  %v5714_v32 = vpack.i.bf16 %v1706_v23, %v1704_v1  ;;  %v10016_v1 = vrot.slane %v7410_v6, 1 }
 0x26e   : > { %5690 = vrot.lane.b32.xlu2 %v5689_v61, %s9963_s30  ;;  %5700 = vrot.lane.b32.xlu1 %v5689_v61, %s10010_s23 }
 0x270   : > { %5695 = vrot.lane.b32.xlu0 %v5689_v61, %s9980_s25  ;;  %v7688_v4 = vpop.permute.xlu2 %5515  ;;  %v7691_v55 = vpop.permute.xlu1 %5510  ;;  %v10011_v61 = vrot.slane %v7553_v39, 7 }
 0x272   : > { %v7697_v20 = vpop.permute.xlu0 %5470  ;;  %v3074_v0 = vsel %vm3069_vm5, %v10011_v61, %v3073_v3  ;;  %v1603_v3 = vrot.slane %v7670_v58, 1  ;;  %v10019_v61 = vld [vmem:[#allocation23_spill] sm:$0xff] }
 0x273   : > { %v5704_v8 = vpack.i.bf16 %v3076_v62, %v3074_v0  ;;  %v10018_v62 = vld [vmem:[#allocation21_spill] sm:$0xff] }
 0x274   : > { %v1606_v21 = vsel %vm9780_vm4, %v1603_v3, %v9759_v43  ;;  %v1604_v23 = vsel %vm9780_vm4, %v10016_v1, %v1603_v3  ;;  %v1094_v35 = vadd.f32 %v7138_v59, %v10018_v62  ;;  %v9765_v43 = vrot.slane %v7436_v40, 4 }
 0x275   : > { %v5709_v53 = vpack.i.bf16 %v1606_v21, %v1604_v23  ;;  %v1434_v1 = vmax.f32 %v1246_v47, 0.0 }
 0x276   : > { %5705 = vrot.lane.b32.xlu2 %v5704_v8, %s9977_s15  ;;  %5720 = vrot.lane.b32.xlu1 %v5719_v48, %s9995_s13  ;;  %v1170_v8 = vadd.f32 %v7138_v59, %v7441_v63  ;;  %v1901_v63 = vrot.slane %v7670_v58, 4  ;;  %v1378_v21 = vmax.f32 %v1094_v35, 0.0 }
 0x278   : > { %5715 = vrot.lane.b32.xlu0 %v5714_v32, %s9994_s12  ;;  %v7719_v24 = vpop.permute.xlu2 %5560  ;;  %v7721_v0 = vpop.permute.xlu1 %5530  ;;  %v1406_v5 = vmax.f32 %v1170_v8, 0.0 }
 0x279   : > { %10015 = vst [vmem:[#allocation110_spill] sm:$0xff] %v7721_v0  ;;  %v1322_v0 = vadd.f32 %v7138_v59, %v10019_v61  ;;  %v1904_v59 = vsel %vm9779_vm0, %v1901_v63, %v9765_v43  ;;  %v10021_v61 = vrot.slane %v7410_v6, 4  ;;  %v5423_v43 = vunpack.i.h.bf16 %v7634_v41 }
 0x27a   : > { %v7726_v56 = vpop.permute.xlu0 %5485  ;;  %v1490_v8 = vmax.f32 %v1378_v21, %v1406_v5  ;;  %v5413_v21 = vunpack.i.h.bf16 %v7611_v11 }
 0x27b   : > { %v1462_v23 = vmax.f32 %v1322_v0, 0.0  ;;  %v1902_v42 = vsel %vm9779_vm0, %v10021_v61, %v1901_v63  ;;  %v5412_v63 = vunpack.i.l.bf16 %v7611_v11  ;;  %v5422_v11 = vunpack.i.l.bf16 %v7634_v41 }
 0x27c   : > { %v7756_v12 = vpack.i.bf16 %v1904_v59, %v1902_v42  ;;  %v3077_v59 = vrot.slane %v7436_v40, 7 }
 0x27d   : > { %v1518_v60 = vmax.f32 %v1434_v1, %v1462_v23  ;;  %v2681_v1 = vsel %vm2677_vm6, %v7169_v16, %v5413_v21  ;;  %v10022_v21 = vrot.slane %v7670_v58, 7 }
 0x27e   : > { %5710 = vrot.lane.b32.xlu2 %v5709_v53, %s9961_s24  ;;  %5735 = vrot.lane.b32.xlu1 %v5714_v32, %s9998_s26 }
 0x27f   : > { %v7760_v0 = vmax.f32 %v1490_v8, %v1518_v60  ;;  %v2680_v8 = vsel %vm2677_vm6, %v7128_v33, %v5412_v63  ;;  %v3078_v30 = vsel %vm3069_vm5, %v10022_v21, %v3077_v59 }
 0x280   : > { %5730 = vrot.lane.b32.xlu0 %v5709_v53, %s9997_s2  ;;  %v7744_v3 = vpop.permute.xlu2 %5575  ;;  %v7746_v50 = vpop.permute.xlu1 %5535 }
 0x281   : > { %v7783_v23 = vpack.i.bf16 %v7760_v0, %v7436_v40  ;;  %v1806_v61 = vrot.slane %v7760_v0, 3 }
 0x282   : > { %v7751_v62 = vpop.permute.xlu0 %5500 }
 0x283   : > { %10020 = vst [vmem:[#allocation14_spill] sm:$0xff] %v7751_v62 }
 0x286   : > { %5725 = vrot.lane.b32.xlu2 %v7756_v12, %s9977_s15  ;;  %5750 = vrot.lane.b32.xlu1 %v5714_v32, %s9981_s22  ;;  %v9770_v32 = vrot.slane %v7760_v0, 7 }
 0x288   : > { %5740 = vrot.lane.b32.xlu0 %v5719_v48, %s9936_s16  ;;  %v7764_v47 = vpop.permute.xlu2 %5595  ;;  %v7767_v35 = vpop.permute.xlu1 %5545  ;;  %v3080_v33 = vsel %vm3069_vm5, %v3077_v59, %v9770_v32  ;;  %v1607_v32 = vrot.slane %v7760_v0, 1  ;;  %v10024_v59 = vrot.slane %v7436_v40, 3 }
 0x289   : > { %v9764_v5 = vunpack.i.h.bf16 %v7764_v47  ;;  %v5784_v62 = vpack.i.bf16 %v3080_v33, %v3078_v30  ;;  %v10026_v30 = vrot.slane %v7490_v54, 3 }
 0x28a   : > { %v7770_v42 = vpop.permute.xlu0 %5520  ;;  %v1807_v21 = vsel %vm1046_vm1, %v10024_v59, %v1806_v61  ;;  %v10029_v59 = vrot.slane %v7760_v0, 4 }
 0x28b   : > { %v7777_v60 = vsel %vm9794_vm12, %v7271_v29, %v9764_v5  ;;  %v1707_v29 = vrot.slane %v7760_v0, 2  ;;  %v5417_v5 = vunpack.i.l.bf16 %v7556_v31  ;;  %v1809_v33 = vsel %vm1046_vm1, %v1806_v61, %v10026_v30 }
 0x28c   : > { %v5447_v61 = vunpack.i.l.bf16 %v7604_v22 }
 0x28d   : > { %v2701_v16 = vsel %vm2698_vm7, %v2680_v8, %v5417_v5  ;;  %v10023_v8 = vrot.slane %v7436_v40, 2 }
 0x28e   : > { %5745 = vrot.lane.b32.xlu2 %v5709_v53, %s9969_s14  ;;  %5765 = vrot.lane.b32.xlu1 %v7756_v12, %s9985_s0  ;;  %v5418_v53 = vunpack.i.h.bf16 %v7556_v31  ;;  %v2722_v6 = vsel %vm2719_vm8, %v2701_v16, %v5422_v11  ;;  %v5428_v31 = vunpack.i.h.bf16 %v7632_v2 }
 0x28f   : > { %v1708_v58 = vsel %vm1681_vm3, %v10023_v8, %v1707_v29  ;;  %v2743_v16 = vsel %vm2740_vm9, %v2722_v6, %v5427_v49  ;;  %v10028_v8 = vrot.slane %v7436_v40, 1  ;;  %v5473_v49 = vunpack.i.h.bf16 %v7697_v20 }
 0x290   : > { %5755 = vrot.lane.b32.xlu0 %v5719_v48, %s10005_s19  ;;  %v7803_v63 = vpop.permute.xlu2 %5615  ;;  %v7808_v41 = vpop.permute.xlu1 %5550  ;;  %v2702_v48 = vsel %vm2698_vm7, %v2681_v1, %v5418_v53  ;;  %v10025_v1 = vrot.slane %v7490_v54, 2  ;;  %v5448_v6 = vunpack.i.h.bf16 %v7604_v22  ;;  %v5483_v22 = vunpack.i.h.bf16 %v7645_v15 }
 0x291   : > { %v2723_v5 = vsel %vm2719_vm8, %v2702_v48, %v5423_v43  ;;  %v10027_v43 = vrot.slane %v7490_v54, 1  ;;  %v5468_v48 = vunpack.i.h.bf16 %v7647_v27  ;;  %v1608_v2 = vsel %vm9780_vm4, %v10028_v8, %v1607_v32 }
 0x292   : > { %v7817_v28 = vpop.permute.xlu0 %5525  ;;  %v1710_v11 = vsel %vm1681_vm3, %v1707_v29, %v10025_v1  ;;  %v10030_v29 = vrot.slane %v7436_v40, 4  ;;  %v2744_v30 = vsel %vm2740_vm9, %v2723_v5, %v5428_v31  ;;  %v7859_v8 = vpack.i.bf16 %v1809_v33, %v1807_v21 }
 0x293   : > { %v1610_v53 = vsel %vm9780_vm4, %v1607_v32, %v10027_v43  ;;  %v5467_v43 = vunpack.i.l.bf16 %v7647_v27  ;;  %v7857_v32 = vpack.i.bf16 %v1710_v11, %v1708_v58  ;;  %v5472_v31 = vunpack.i.l.bf16 %v7697_v20 }
 0x294   : > { %v7847_v1 = vsel %vm9779_vm0, %v10030_v29, %v10029_v59  ;;  %v7861_v59 = vpack.i.bf16 %v1610_v53, %v1608_v2  ;;  %v5458_v29 = vunpack.i.h.bf16 %v7629_v37  ;;  %v2764_v27 = vsel %vm2761_vm10, %v2743_v16, %v5447_v61 }
 0x295   : > { %v2765_v21 = vsel %vm2761_vm10, %v2744_v30, %v5448_v6  ;;  %v2682_v20 = vsel %vm2677_vm6, %v7202_v44, %v5467_v43  ;;  %v5478_v33 = vunpack.i.h.bf16 %v7664_v26  ;;  %v5477_v2 = vunpack.i.l.bf16 %v7664_v26 }
 0x296   : > { %5775 = vrot.lane.b32.xlu2 %v7783_v23, %s9980_s25  ;;  %5785 = vrot.lane.b32.xlu1 %v5784_v62, %s9977_s15  ;;  %v2683_v62 = vsel %vm2677_vm6, %v7283_v9, %v5468_v48  ;;  %v5463_v61 = vunpack.i.h.bf16 %v7677_v38  ;;  %v5488_v9 = vunpack.i.h.bf16 %v7726_v56  ;;  %v2703_v30 = vsel %vm2698_vm7, %v2682_v20, %v5472_v31 }
 0x297   : > { %v2704_v53 = vsel %vm2698_vm7, %v2683_v62, %v5473_v49  ;;  %v9776_v44 = vunpack.i.l.bf16 %v7767_v35  ;;  %v5553_v43 = vunpack.i.h.bf16 %v7808_v41  ;;  %v5552_v49 = vunpack.i.l.bf16 %v7808_v41 }
 0x298   : > { %5760 = vrot.lane.b32.xlu0 %v7756_v12, %s9986_s1  ;;  %v7868_v5 = vpop.permute.xlu2 %5620  ;;  %v5556_v11 = vpop.permute.xlu1 %5555  ;;  %v5487_v12 = vunpack.i.l.bf16 %v7726_v56  ;;  %v2725_v6 = vsel %vm2719_vm8, %v2704_v53, %v5478_v33  ;;  %v5517_v56 = vunpack.i.l.bf16 %v7688_v4  ;;  %v5512_v31 = vunpack.i.l.bf16 %v7691_v55 }
 0x299   : > { %v5558_v62 = vunpack.i.h.bf16 %v5556_v11  ;;  %v5557_v58 = vunpack.i.l.bf16 %v5556_v11  ;;  %v2724_v11 = vsel %vm2719_vm8, %v2703_v30, %v5477_v2  ;;  %v2786_v20 = vsel %vm2782_vm11, %v2765_v21, %v5488_v9 }
 0x29a   : > { %v7880_v16 = vpop.permute.xlu0 %5540  ;;  %v2785_v38 = vsel %vm2782_vm11, %v2764_v27, %v5487_v12  ;;  %v5563_v27 = vunpack.i.h.bf16 %v7719_v24  ;;  %v2685_v33 = vsel %vm2677_vm6, %v7416_v14, %v5553_v43  ;;  %v2684_v53 = vsel %vm2677_vm6, %v7301_v57, %v5552_v49 }
 0x29b   : > { %v9777_v48 = vunpack.i.l.bf16 %v7880_v16  ;;  %v2746_v12 = vsel %vm2740_vm9, %v2725_v6, %v5483_v22  ;;  %v5562_v21 = vunpack.i.l.bf16 %v7719_v24  ;;  %v2806_v9 = vsel %vm9794_vm12, %v2785_v38, %v5458_v29 }
 0x29c   : > { %v2705_v30 = vsel %vm2698_vm7, %v2684_v53, %v5557_v58  ;;  %v2807_v14 = vsel %vm9794_vm12, %v2786_v20, %v5512_v31  ;;  %v5523_v57 = vunpack.i.h.bf16 %v7770_v42  ;;  %v5522_v22 = vunpack.i.l.bf16 %v7770_v42 }
 0x29d   : > { %v2820_v26 = vsel %vm9794_vm12, %v7266_v10, %v9777_v48  ;;  %v5528_v10 = vunpack.i.h.bf16 %v7817_v28  ;;  %v2827_v38 = vsel %vm9793_vm13, %v2806_v9, %v5463_v61  ;;  %v7932_v58 = vsel %vm2719_vm8, %v2705_v30, %v5562_v21 }
 0x29e   : > { %5780 = vrot.lane.b32.xlu2 %v7783_v23, %s10010_s23  ;;  %v7902_v41 = vsel %vm9793_vm13, %v2820_v26, %v9776_v44  ;;  %5795 = vrot.lane.b32.xlu1 %v7857_v32, %s9994_s12  ;;  %v2706_v26 = vsel %vm2698_vm7, %v2685_v33, %v5558_v62  ;;  %v2828_v42 = vsel %vm9793_vm13, %v2807_v14, %v5517_v56  ;;  %v5538_v56 = vunpack.i.h.bf16 %v7746_v50 }
 0x29f   : > { %10031 = vst [vmem:[#allocation21_spill] sm:$0xff] %v7902_v41  ;;  %v2767_v6 = vsel %vm2761_vm10, %v2746_v12, %v5528_v10  ;;  %v7935_v62 = vsel %vm2719_vm8, %v2706_v26, %v5563_v27  ;;  %v2848_v10 = vsel %vm9807_vm14, %v2827_v38, %v5522_v22  ;;  %v2849_v33 = vsel %vm9807_vm14, %v2828_v42, %v5523_v57  ;;  %v10170_v41 = vld [vmem:[#allocation38_spill] sm:$0xff] }
 0x2a0   : > { %5770 = vrot.lane.b32.xlu0 %v7783_v23, %s9963_s30  ;;  %v7918_v2 = vpop.permute.xlu2 %5630  ;;  %v5571_v44 = vpop.permute.xlu1 %5570  ;;  %v5597_v23 = vunpack.i.l.bf16 %v7764_v47  ;;  %v5537_v53 = vunpack.i.l.bf16 %v7746_v50  ;;  %v10033_v21 = vrot.slane %v7490_v54, 4  ;;  %v10034_v9 = vrot.slane %v7760_v0, 4 }
 0x2a1   : > { %v5573_v43 = vunpack.i.h.bf16 %v5571_v44  ;;  %v5633_v27 = vunpack.i.h.bf16 %v7918_v2  ;;  %v5578_v26 = vunpack.i.h.bf16 %v7744_v3  ;;  %v5577_v14 = vunpack.i.l.bf16 %v7744_v3 }
 0x2a2   : > { %v5566_v49 = vpop.permute.xlu0 %5565  ;;  %v1908_v30 = vsel %vm9779_vm0, %v10034_v9, %v10033_v21  ;;  %v5527_v57 = vunpack.i.l.bf16 %v7817_v28  ;;  %v2869_v50 = vsel %vm9817_vm15, %v2848_v10, %v5537_v53  ;;  %v5572_v22 = vunpack.i.l.bf16 %v5571_v44 }
 0x2a3   : > { %v5568_v24 = vunpack.i.h.bf16 %v5566_v49  ;;  %v5567_v48 = vunpack.i.l.bf16 %v5566_v49  ;;  %v2788_v29 = vsel %vm2782_vm11, %v2767_v6, %v5573_v43  ;;  %vm9782_vm0 = vcmask 588800  }
 0x2a4   : > { %v7947_v61 = vsel %vm9794_vm12, %v2788_v29, %v5597_v23  ;;  %v2687_v23 = vsel %vm2677_vm6, %v7553_v39, %v5633_v27  ;;  %vm9781_vm4 = vcmask 637952   ;;  %v2890_v44 = vsel %vm9797_vm2, %v2869_v50, %v5577_v14 }
 0x2a5   : > { %v7940_v31 = vsel %vm2740_vm9, %v7935_v62, %v5568_v24  ;;  %v7944_v20 = vsel %vm2740_vm9, %v7932_v58, %v5567_v48  ;;  %v10032_v48 = vunpack.i.l.bf16 %v7645_v15  ;;  %v7991_v53 = vpack.i.bf16 %v1908_v30, %v7847_v1 }
 0x2a6   : > { %5800 = vrot.lane.b32.xlu2 %v7859_v8, %s9995_s13  ;;  %5810 = vrot.lane.b32.xlu1 %v7861_v59, %s9997_s2  ;;  %v5548_v30 = vunpack.i.h.bf16 %v7767_v35 }
 0x2a7   : > { %v2745_v12 = vsel %vm2740_vm9, %v2724_v11, %v10032_v48  ;;  %v2870_v11 = vsel %vm9817_vm15, %v2849_v33, %v5538_v56  ;;  %v5543_v56 = vunpack.i.h.bf16 %v7880_v16 }
 0x2a8   : > { %5790 = vrot.lane.b32.xlu0 %v7861_v59, %s9961_s24  ;;  %v7971_v15 = vpop.permute.xlu2 %5635  ;;  %v5586_v49 = vpop.permute.xlu1 %5585  ;;  %v2766_v42 = vsel %vm2761_vm10, %v2745_v12, %v5527_v57  ;;  %v2891_v10 = vsel %vm9797_vm2, %v2870_v11, %v5578_v26  ;;  %v10035_v26 = vunpack.i.h.bf16 %v7197_v52  ;;  %v5622_v57 = vunpack.i.l.bf16 %v7868_v5 }
 0x2a9   : > { %v5638_v43 = vunpack.i.h.bf16 %v7971_v15  ;;  %v5588_v3 = vunpack.i.h.bf16 %v5586_v49  ;;  %v5587_v6 = vunpack.i.l.bf16 %v5586_v49  ;;  %v2787_v33 = vsel %vm2782_vm11, %v2766_v42, %v5572_v22 }
 0x2aa   : > { %v5581_v28 = vpop.permute.xlu0 %5580  ;;  %v2808_v21 = vsel %vm9794_vm12, %v2787_v33, %v5543_v56  ;;  %v3294_v1 = vsel %vm2740_vm9, %v7195_v36, %v10035_v26  ;;  %v1711_v22 = vrot.slane %v7518_v51, 2  ;;  %v10037_v33 = vrot.slane %v6639_v17, 2 }
 0x2ab   : > { %v7979_v24 = vsel %vm2698_vm7, %v2687_v23, %v5638_v43  ;;  %v5583_v38 = vunpack.i.h.bf16 %v5581_v28  ;;  %v5582_v29 = vunpack.i.l.bf16 %v5581_v28  ;;  %v2829_v43 = vsel %vm9793_vm13, %v2808_v21, %v5548_v30 }
 0x2ac   : > { %v8048_v26 = vpack.i.bf16 %v7518_v51, %v7490_v54  ;;  %v10040_v30 = vunpack.i.h.bf16 %v7764_v47 }
 0x2ad   : > { %v2911_v39 = vsel %vm9782_vm0, %v2890_v44, %v5582_v29  ;;  %v2912_v27 = vsel %vm9782_vm0, %v2891_v10, %v5583_v38  ;;  %vm2971_vm0 = vcmask 736256  }
 0x2ae   : > { %5815 = vrot.lane.b32.xlu2 %v7857_v32, %s9998_s26  ;;  %v2932_v48 = vsel %vm9781_vm4, %v2911_v39, %v5587_v6  ;;  %v2933_v12 = vsel %vm9781_vm4, %v2912_v27, %v5588_v3  ;;  %5835 = vrot.lane.b32.xlu1 %v7859_v8, %s10005_s19  ;;  %vm2950_vm4 = vcmask 687104   ;;  %v5618_v3 = vunpack.i.h.bf16 %v7803_v63 }
 0x2af   : > { %v5617_v6 = vunpack.i.l.bf16 %v7803_v63  ;;  %v10036_v63 = vrot.slane %v7490_v54, 2  ;;  %v1714_v39 = vsel %vm1681_vm3, %v1711_v22, %v10037_v33  ;;  %v10038_v27 = vunpack.i.h.bf16 %v7204_v46 }
 0x2b0   : > { %5805 = vrot.lane.b32.xlu0 %v7991_v53, %s9977_s15  ;;  %v8000_v9 = vpop.permute.xlu2 %5650  ;;  %v5606_v14 = vpop.permute.xlu1 %5605 }
 0x2b1   : > { %v5607_v50 = vunpack.i.l.bf16 %v5606_v14  ;;  %v1712_v10 = vsel %vm1681_vm3, %v10036_v63, %v1711_v22  ;;  %v5623_v22 = vunpack.i.h.bf16 %v7868_v5 }
 0x2b2   : > { %v5591_v11 = vpop.permute.xlu0 %5590 }
 0x2b3   : > { %v5593_v49 = vunpack.i.h.bf16 %v5591_v11  ;;  %v5592_v23 = vunpack.i.l.bf16 %v5591_v11  ;;  %v2850_v36 = vsel %vm9807_vm14, %v2829_v43, %v5607_v50  ;;  %v8055_v11 = vpack.i.bf16 %v1714_v39, %v1712_v10 }
 0x2b4   : > { %v8016_v29 = vsel %vm9817_vm15, %v2850_v36, %v5622_v57  ;;  %v9790_v43 = vunpack.i.l.bf16 %v8000_v9  ;;  %v5632_v39 = vunpack.i.l.bf16 %v7918_v2 }
 0x2b5   : > { %v2953_v28 = vsel %vm2950_vm4, %v2932_v48, %v5592_v23  ;;  %v2954_v38 = vsel %vm2950_vm4, %v2933_v12, %v5593_v49  ;;  %v10039_v48 = vunpack.i.h.bf16 %v7249_v7 }
 0x2b6   : > { %5830 = vrot.lane.b32.xlu2 %v7857_v32, %s9981_s22  ;;  %v8021_v42 = vsel %vm2971_vm0, %v2953_v28, %v5617_v6  ;;  %v8024_v44 = vsel %vm2971_vm0, %v2954_v38, %v5618_v3  ;;  %5840 = vrot.lane.b32.xlu1 %v7991_v53, %s9986_s1  ;;  %v3314_v32 = vsel %vm2761_vm10, %v3294_v1, %v10038_v27  ;;  %v9788_v3 = vunpack.i.h.bf16 %v8000_v9 }
 0x2b7   : > { %v3334_v12 = vsel %vm2782_vm11, %v3314_v32, %v10039_v48  ;;  %v5608_v6 = vunpack.i.h.bf16 %v5606_v14  ;;  %v5637_v27 = vunpack.i.l.bf16 %v7971_v15  ;;  %v1810_v48 = vrot.slane %v7518_v51, 3 }
 0x2b8   : > { %5820 = vrot.lane.b32.xlu0 %v7859_v8, %s9936_s16  ;;  %v8039_v56 = vpop.permute.xlu2 %5660  ;;  %v8044_v21 = vpop.permute.xlu1 %5610  ;;  %v3354_v57 = vsel %vm9794_vm12, %v3334_v12, %v10040_v30  ;;  %v10041_v30 = vrot.slane %v7490_v54, 3 }
 0x2b9   : > { %v9791_v1 = vunpack.i.h.bf16 %v8044_v21  ;;  %v9792_v8 = vunpack.i.l.bf16 %v8044_v21 }
 0x2ba   : > { %v5601_v50 = vpop.permute.xlu0 %5600 }
 0x2bb   : > { %v5603_v49 = vunpack.i.h.bf16 %v5601_v50  ;;  %v5602_v23 = vunpack.i.l.bf16 %v5601_v50  ;;  %v2768_v47 = vsel %vm2761_vm10, %v7944_v20, %v9792_v8  ;;  %v2769_v36 = vsel %vm2761_vm10, %v7940_v31, %v9791_v1 }
 0x2bc   : > { %v2789_v38 = vsel %vm2782_vm11, %v2768_v47, %v9790_v43 }
 0x2bd   : > { %v8070_v5 = vsel %vm9793_vm13, %v7777_v60, %v5603_v49  ;;  %v8073_v28 = vsel %vm9793_vm13, %v3354_v57, %v5603_v49  ;;  %v2830_v14 = vsel %vm9793_vm13, %v7947_v61, %v5602_v23  ;;  %v2790_v60 = vsel %vm2782_vm11, %v2769_v36, %v9788_v3 }
 0x2be   : > { %v2851_v20 = vsel %vm9807_vm14, %v2830_v14, %v5608_v6  ;;  %5860 = vrot.lane.b32.xlu2 %v8055_v11, %s9994_s12  ;;  %5845 = vrot.lane.b32.xlu1 %v8048_v26, %s9963_s30  ;;  %v1811_v57 = vsel %vm1046_vm1, %v10041_v30, %v1810_v48 }
 0x2bf   : > { %v2872_v31 = vsel %vm9817_vm15, %v2851_v20, %v5623_v22 }
 0x2c0   : > { %5825 = vrot.lane.b32.xlu0 %v7861_v59, %s9969_s14  ;;  %v8091_v61 = vpop.permute.xlu2 %5675  ;;  %v8093_v63 = vpop.permute.xlu1 %5625  ;;  %v2686_v59 = vsel %vm2677_vm6, %v7357_v45, %v5632_v39  ;;  %v10042_v45 = vrot.slane %v6639_v17, 3 }
 0x2c1   : > { %v2707_v15 = vsel %vm2698_vm7, %v2686_v59, %v5637_v27  ;;  %v3083_v59 = vrot.slane %v7518_v51, 7 }
 0x2c2   : > { %v5641_v10 = vpop.permute.xlu0 %5640  ;;  %v1813_v6 = vsel %vm1046_vm1, %v1810_v48, %v10042_v45  ;;  %vm10044_vm1 = vcmask 588800  }
 0x2c3   : > { %v5643_v33 = vunpack.i.h.bf16 %v5641_v10  ;;  %v5642_v12 = vunpack.i.l.bf16 %v5641_v10  ;;  %v9784_v10 = vunpack.i.h.bf16 %v8039_v56  ;;  %vm10045_vm3 = vmmov %vm10044_vm1 }
 0x2c5   : > { %v8099_v32 = vsel %vm2719_vm8, %v7979_v24, %v5643_v33  ;;  %v8117_v50 = vsel %vm2719_vm8, %v2707_v15, %v5642_v12  ;;  %v9783_v33 = vunpack.i.l.bf16 %v8039_v56  ;;  %v5864_v15 = vpack.i.bf16 %v1813_v6, %v1811_v57 }
 0x2c6   : > { %5875 = vrot.lane.b32.xlu2 %v7558_v34, %s9997_s2  ;;  %5855 = vrot.lane.b32.xlu1 %v7558_v34, %s9961_s24 }
 0x2c8   : > { %5850 = vrot.lane.b32.xlu0 %v8048_v26, %s9980_s25  ;;  %v8110_v2 = vpop.permute.xlu2 %5690  ;;  %v5646_v24 = vpop.permute.xlu1 %5645 }
 0x2c9   : > { %v5648_v22 = vunpack.i.h.bf16 %v5646_v24  ;;  %v5647_v49 = vunpack.i.l.bf16 %v5646_v24  ;;  %v9789_v47 = vunpack.i.h.bf16 %v8110_v2  ;;  %v9787_v36 = vunpack.i.l.bf16 %v8110_v2 }
 0x2ca   : > { %v8119_v23 = vpop.permute.xlu0 %5655 }
 0x2cb   : > { %v9786_v14 = vunpack.i.h.bf16 %v8119_v23  ;;  %v9785_v20 = vunpack.i.l.bf16 %v8119_v23  ;;  %v2749_v39 = vsel %vm2740_vm9, %v8117_v50, %v5647_v49  ;;  %v2750_v27 = vsel %vm2740_vm9, %v8099_v32, %v5648_v22 }
 0x2cc   : > { %v8160_v22 = vsel %vm2761_vm10, %v2750_v27, %v9789_v47  ;;  %v5678_v27 = vunpack.i.h.bf16 %v8091_v61  ;;  %v5677_v47 = vunpack.i.l.bf16 %v8091_v61 }
 0x2cd   : > { %v2810_v48 = vsel %vm9794_vm12, %v2789_v38, %v9785_v20  ;;  %v2811_v12 = vsel %vm9794_vm12, %v2790_v60, %v9786_v14  ;;  %v3081_v38 = vrot.slane %v7490_v54, 7  ;;  %v8155_v60 = vsel %vm2761_vm10, %v2749_v39, %v9787_v36 }
 0x2ce   : > { %5885 = vrot.lane.b32.xlu2 %v8055_v11, %s9998_s26  ;;  %v2831_v24 = vsel %vm9793_vm13, %v2810_v48, %v9783_v33  ;;  %v2832_v30 = vsel %vm9793_vm13, %v2811_v12, %v9784_v10  ;;  %5870 = vrot.lane.b32.xlu1 %v7560_v19, %s9977_s15  ;;  %v10043_v39 = vrot.slane %v7760_v0, 7  ;;  %vm10046_vm13 = vcmask 637952  }
 0x2cf   : > { %v3084_v48 = vsel %vm3069_vm5, %v3081_v38, %v3083_v59  ;;  %vm10047_vm12 = vmmov %vm10046_vm13 }
 0x2d0   : > { %5865 = vrot.lane.b32.xlu0 %v5864_v15, %s9995_s13  ;;  %v8163_v49 = vpop.permute.xlu2 %5705  ;;  %v5671_v45 = vpop.permute.xlu1 %5670  ;;  %v3082_v36 = vsel %vm3069_vm5, %v10043_v39, %v3081_v38 }
 0x2d1   : > { %v5673_v12 = vunpack.i.h.bf16 %v5671_v45  ;;  %v5672_v33 = vunpack.i.l.bf16 %v5671_v45  ;;  %v5879_v3 = vpack.i.bf16 %v3084_v48, %v3082_v36  ;;  %v10048_v48 = vrot.slane %v6641_v18, 7 }
 0x2d2   : > { %v5666_v10 = vpop.permute.xlu0 %5665 }
 0x2d3   : > { %v5668_v20 = vunpack.i.h.bf16 %v5666_v10  ;;  %v5667_v14 = vunpack.i.l.bf16 %v5666_v10  ;;  %v5889_v10 = vpack.i.bf16 %v7288_v13, %v1811_v57 }
 0x2d5   : > { %v2892_v43 = vsel %vm9797_vm2, %v8016_v29, %v5667_v14  ;;  %v2893_v1 = vsel %vm9797_vm2, %v2872_v31, %v5668_v20  ;;  %v3085_v31 = vrot.slane %v6639_v17, 7 }
 0x2d6   : > { %v2913_v8 = vsel %vm10044_vm1, %v2892_v43, %v5672_v33  ;;  %v2914_v45 = vsel %vm10045_vm3, %v2893_v1, %v5673_v12  ;;  %5915 = vrot.lane.b32.xlu2 %v7991_v53, %s9985_s0  ;;  %5880 = vrot.lane.b32.xlu1 %v5879_v3, %s9977_s15  ;;  %v10049_v12 = vld [vmem:[#allocation70_spill] sm:$0xff] }
 0x2d7   : > { %v2934_v36 = vsel %vm10046_vm13, %v2913_v8, %v5677_v47  ;;  %v2935_v61 = vsel %vm10047_vm12, %v2914_v45, %v5678_v27  ;;  %v3086_v53 = vsel %vm3069_vm5, %v3083_v59, %v3085_v31  ;;  %v5894_v47 = vpack.i.bf16 %v1813_v6, %v7280_v25 }
 0x2d8   : > { %5890 = vrot.lane.b32.xlu0 %v5889_v10, %s9936_s16  ;;  %v5711_v29 = vpop.permute.xlu2 %5710  ;;  %v5681_v14 = vpop.permute.xlu1 %5680  ;;  %v3088_v17 = vsel %vm3069_vm5, %v3085_v31, %v10048_v48  ;;  %vm3654_vm5 = vcmask 1042432   ;;  %vm10057_vm12 = vcmask 343040  }
 0x2d9   : > { %v5683_v43 = vunpack.i.h.bf16 %v5681_v14  ;;  %v5682_v20 = vunpack.i.l.bf16 %v5681_v14  ;;  %v5899_v39 = vpack.i.bf16 %v3088_v17, %v3086_v53  ;;  %v5627_v14 = vunpack.i.l.bf16 %v8093_v63  ;;  %v10050_v17 = vld [vmem:[#allocation18_spill] sm:$0xff]  ;;  %vm10059_vm13 = vmmov %vm10057_vm12 }
 0x2da   : > { %v5686_v1 = vpop.permute.xlu0 %5685  ;;  %v5713_v31 = vunpack.i.h.bf16 %v5711_v29  ;;  %v5628_v53 = vunpack.i.h.bf16 %v8093_v63  ;;  %vm10060_vm1 = vmmov %vm10057_vm12 }
 0x2db   : > { %v5688_v33 = vunpack.i.h.bf16 %v5686_v1  ;;  %v5687_v38 = vunpack.i.l.bf16 %v5686_v1  ;;  %v2955_v13 = vsel %vm2950_vm4, %v2934_v36, %v5682_v20  ;;  %v2956_v3 = vsel %vm2950_vm4, %v2935_v61, %v5683_v43  ;;  %vm10061_vm3 = vmmov %vm10060_vm1 }
 0x2dc   : > { %v5712_v43 = vunpack.i.l.bf16 %v5711_v29  ;;  %v3283_v29 = vsel %vm2740_vm9, %v7932_v58, %v5627_v14 }
 0x2dd   : > { %v2852_v8 = vsel %vm9807_vm14, %v2831_v24, %v5687_v38  ;;  %v2853_v57 = vsel %vm9807_vm14, %v2832_v30, %v5688_v33 }
 0x2de   : > { %5930 = vrot.lane.b32.xlu2 %v10049_v12, %s9961_s24  ;;  %5895 = vrot.lane.b32.xlu1 %v5894_v47, %s9936_s16  ;;  %v10051_v12 = vld [vmem:[#allocation31_spill] sm:$0xff] }
 0x2e0   : > { %5900 = vrot.lane.b32.xlu0 %v5899_v39, %s9977_s15  ;;  %v5726_v59 = vpop.permute.xlu2 %5725  ;;  %v5701_v27 = vpop.permute.xlu1 %5700  ;;  %v2688_v39 = vsel %vm2677_vm6, %v10051_v12, %v5712_v43 }
 0x2e1   : > { %v5703_v45 = vunpack.i.h.bf16 %v5701_v27  ;;  %v5702_v24 = vunpack.i.l.bf16 %v5701_v27  ;;  %v5728_v27 = vunpack.i.h.bf16 %v5726_v59  ;;  %v5727_v63 = vunpack.i.l.bf16 %v5726_v59 }
 0x2e2   : > { %v5696_v10 = vpop.permute.xlu0 %5695 }
 0x2e3   : > { %v5698_v30 = vunpack.i.h.bf16 %v5696_v10  ;;  %v5697_v36 = vunpack.i.l.bf16 %v5696_v10  ;;  %v2873_v25 = vsel %vm9817_vm15, %v2852_v8, %v5702_v24  ;;  %v2874_v18 = vsel %vm9817_vm15, %v2853_v57, %v5703_v45  ;;  %v3561_v10 = vld [vmem:[%s9579_s3 + $0x48] sm:$0x7] }
 0x2e5   : > { %v8200_v6 = vsel %vm2971_vm0, %v2955_v13, %v5697_v36  ;;  %v8203_v61 = vsel %vm2971_vm0, %v2956_v3, %v5698_v30  ;;  %v3284_v30 = vsel %vm2740_vm9, %v7935_v62, %v5628_v53 }
 0x2e6   : > { %5945 = vrot.lane.b32.xlu2 %v5864_v15, %s10005_s19 }
 0x2e8   : > { %5920 = vrot.lane.b32.xlu0 %v8048_v26, %s10010_s23  ;;  %v5746_v20 = vpop.permute.xlu2 %5745  ;;  %v5721_v38 = vpop.permute.xlu1 %5720  ;;  %v2689_v26 = vsel %vm2677_vm6, %v10050_v17, %v5713_v31  ;;  %v10052_v31 = vunpack.i.l.bf16 %v8044_v21 }
 0x2e9   : > { %v5748_v1 = vunpack.i.h.bf16 %v5746_v20  ;;  %v5747_v33 = vunpack.i.l.bf16 %v5746_v20  ;;  %v5723_v13 = vunpack.i.h.bf16 %v5721_v38  ;;  %v5722_v8 = vunpack.i.l.bf16 %v5721_v38 }
 0x2ea   : > { %v5716_v57 = vpop.permute.xlu0 %5715  ;;  %v3303_v43 = vsel %vm2761_vm10, %v3283_v29, %v10052_v31  ;;  %v10053_v20 = vunpack.i.h.bf16 %v8044_v21  ;;  %v10054_v21 = vunpack.i.l.bf16 %v8000_v9  ;;  %v10055_v29 = vunpack.i.h.bf16 %v8000_v9 }
 0x2eb   : > { %v2894_v3 = vsel %vm9797_vm2, %v2873_v25, %v5747_v33  ;;  %v2895_v15 = vsel %vm9797_vm2, %v2874_v18, %v5748_v1  ;;  %v5718_v47 = vunpack.i.h.bf16 %v5716_v57  ;;  %v5717_v48 = vunpack.i.l.bf16 %v5716_v57 }
 0x2ec   : > { %v3603_v25 = vunpack.c.l.b16 %v3561_v10  ;;  %v3304_v1 = vsel %vm2761_vm10, %v3284_v30, %v10053_v20  ;;  %v5707_v33 = vunpack.i.l.bf16 %v8163_v49 }
 0x2ed   : > { %v2710_v45 = vsel %vm2698_vm7, %v2689_v26, %v5718_v47  ;;  %v2709_v24 = vsel %vm2698_vm7, %v2688_v39, %v5717_v48  ;;  %v3323_v48 = vsel %vm2782_vm11, %v3303_v43, %v10054_v21  ;;  %v3324_v17 = vsel %vm2782_vm11, %v3304_v1, %v10055_v29 }
 0x2ee   : > { %v8226_v58 = vsel %vm2719_vm8, %v2709_v24, %v5722_v8  ;;  %v8229_v36 = vsel %vm2719_vm8, %v2710_v45, %v5723_v13  ;;  %v3613_v14 = vpack.c.b16 %v3603_v25, %v3603_v25  ;;  %v10056_v26 = vunpack.i.h.bf16 %v8119_v23 }
 0x2ef   : > { %v8233_v59 = vsel %vm2740_vm9, %v8226_v58, %v5727_v63  ;;  %v8237_v18 = vsel %vm2740_vm9, %v8229_v36, %v5728_v27  ;;  %v3285_v39 = vsel %vm2740_vm9, %v8117_v50, %v5707_v33  ;;  %v10058_v45 = vunpack.i.l.bf16 %v8119_v23 }
 0x2f0   : > { %5935 = vrot.lane.b32.xlu0 %v8055_v11, %s9981_s22  ;;  %v8241_v62 = vpop.permute.xlu2 %5775  ;;  %v8250_v38 = vpop.permute.xlu1 %5735  ;;  %v3656_v8 = vsel %vm3654_vm5, %v3613_v14, 0  ;;  %v3344_v12 = vsel %vm10057_vm12, %v3324_v17, %v10056_v26  ;;  %v10062_v50 = vunpack.i.h.bf16 %v8039_v56  ;;  %vm10063_vm5 = vcmask 392192   ;;  %v10066_v14 = vld [vmem:[#allocation67_spill] sm:$0xff] }
 0x2f1   : > { %v5738_v53 = vunpack.i.h.bf16 %v8250_v38  ;;  %v5737_v13 = vunpack.i.l.bf16 %v8250_v38  ;;  %3723 = vmatpush.bf16.msrb.mxu2 %v3656_v8  ;;  %v3343_v9 = vsel %vm10059_vm13, %v3323_v48, %v10058_v45  ;;  %v10068_v43 = vunpack.i.l.bf16 %v8039_v56  ;;  %vm10069_vm12 = vmmov %vm10063_vm5 }
 0x2f2   : > { %v8254_v11 = vpop.permute.xlu0 %5730  ;;  %v3364_v30 = vsel %vm10063_vm5, %v3344_v12, %v10062_v50  ;;  %vm10070_vm13 = vcmask 588800   ;;  %vm10073_vm2 = vmmov %vm10063_vm5  ;;  %v10074_v50 = vld [vmem:[#allocation76_spill] sm:$0xff] }
 0x2f3   : > { %v5733_v57 = vunpack.i.h.bf16 %v8254_v11  ;;  %v5732_v47 = vunpack.i.l.bf16 %v8254_v11  ;;  %v3363_v20 = vsel %vm10069_vm12, %v3343_v9, %v10068_v43  ;;  %v3404_v29 = vrot.slane %v3364_v30, 1  ;;  %vm10072_vm12 = vmmov %vm10063_vm5  ;;  %v10075_v30 = vld [vmem:[#allocation73_spill] sm:$0xff] }
 0x2f4   : > { %v3403_v12 = vrot.slane %v3363_v20, 1 }
 0x2f5   : > { %v2791_v27 = vsel %vm2782_vm11, %v8155_v60, %v5732_v47  ;;  %v2792_v63 = vsel %vm2782_vm11, %v8160_v22, %v5733_v57  ;;  %v10064_v60 = vunpack.i.l.bf16 %v8110_v2  ;;  %v10065_v22 = vld [vmem:[#allocation71_spill] sm:$0xff] }
 0x2f6   : > { %v2812_v24 = vsel %vm10060_vm1, %v2791_v27, %v5737_v13  ;;  %v2813_v10 = vsel %vm10061_vm3, %v2792_v63, %v5738_v53  ;;  %v10067_v23 = vpack.i.bf16 %v10065_v22, %v10066_v14  ;;  %vm10071_vm1 = vmmov %vm10070_vm13 }
 0x2f7   : > { %v3305_v25 = vsel %vm2761_vm10, %v3285_v39, %v10064_v60  ;;  %v10076_v60 = vpack.i.bf16 %v10074_v50, %v10075_v30 }
 0x2f8   : > { %5950 = vrot.lane.b32.xlu0 %v10067_v23, %s9995_s13  ;;  %v5781_v31 = vpop.permute.xlu2 %5780  ;;  %v3325_v1 = vsel %vm2782_vm11, %v3305_v25, %v5732_v47  ;;  %v5751_v33 = vpop.permute.xlu1 %5750 }
 0x2f9   : > { %v5753_v8 = vunpack.i.h.bf16 %v5751_v33  ;;  %v5752_v21 = vunpack.i.l.bf16 %v5751_v33  ;;  %v3345_v56 = vsel %vm10061_vm3, %v3325_v1, %v5737_v13  ;;  %v5783_v43 = vunpack.i.h.bf16 %v5781_v31 }
 0x2fa   : > { %v8296_v48 = vpop.permute.xlu0 %5740  ;;  %v5782_v20 = vunpack.i.l.bf16 %v5781_v31 }
 0x2fb   : > { %v9800_v17 = vunpack.i.h.bf16 %v8296_v48  ;;  %v5742_v26 = vunpack.i.l.bf16 %v8296_v48  ;;  %v2915_v39 = vsel %vm10070_vm13, %v2894_v3, %v5752_v21  ;;  %v2916_v27 = vsel %vm10071_vm1, %v2895_v15, %v5753_v8 }
 0x2fc   : > { %vm10077_vm13 = vcmask 1046528  }
 0x2fd   : > { %v2833_v63 = vsel %vm10063_vm5, %v2812_v24, %v5742_v26  ;;  %v2834_v47 = vsel %vm10072_vm12, %v2813_v10, %v9800_v17  ;;  %v8308_v45 = vsel %vm10073_vm2, %v3345_v56, %v5742_v26  ;;  %v3405_v15 = vsel %vm10077_vm13, %v3403_v12, %v3404_v29  ;;  %vm10078_vm1 = vmmov %vm10077_vm13 }
 0x2fe   : > { %v9799_v9 = vrot.slane %v8308_v45, 1  ;;  %vm10079_vm2 = vcmask 637952   ;;  %vm10093_vm5 = vcmask 343040   ;;  %vm10099_vm13 = vcmask 392192  }
 0x2ff   : > { %vm10080_vm3 = vmmov %vm10079_vm2 }
 0x300   : > { %5970 = vrot.lane.b32.xlu0 %v10076_v60, %s9977_s15  ;;  %v8315_v3 = vpop.permute.xlu2 %5800  ;;  %v3407_v13 = vsel %vm10078_vm1, %v3404_v29, %v9799_v9  ;;  %v5766_v24 = vpop.permute.xlu1 %5765  ;;  %vm10096_vm12 = vmmov %vm10093_vm5 }
 0x301   : > { %v5904_v10 = vpack.i.bf16 %v3407_v13, %v3405_v15  ;;  %v5768_v25 = vunpack.i.h.bf16 %v5766_v24  ;;  %v5767_v14 = vunpack.i.l.bf16 %v5766_v24  ;;  %v5777_v13 = vunpack.i.l.bf16 %v8241_v62  ;;  %vm10101_vm1 = vmmov %vm10099_vm13 }
 0x302   : > { %v5756_v23 = vpop.permute.xlu0 %5755 }
 0x303   : > { %v5758_v1 = vunpack.i.h.bf16 %v5756_v23  ;;  %v5757_v33 = vunpack.i.l.bf16 %v5756_v23  ;;  %5905 = vrot.lane.b32.xlu1 %v5904_v10, %s6272_s17  ;;  %v2854_v8 = vsel %vm9807_vm14, %v2833_v63, %v5767_v14  ;;  %v2855_v21 = vsel %vm9807_vm14, %v2834_v47, %v5768_v25  ;;  %v10081_v47 = vld [vmem:[#allocation74_spill] sm:$0xff] }
 0x304   : > { %v8327_v12 = vsel %vm9817_vm15, %v2854_v8, %v5782_v20  ;;  %v8330_v56 = vsel %vm9817_vm15, %v2855_v21, %v5783_v43  ;;  %v10083_v10 = vld [vmem:[#allocation94_spill] sm:$0xff]  ;;  %v5277_v14 = vunpack.i.l.bf16 %v7197_v52  ;;  %v10087_v52 = vld [vmem:[#allocation87_spill] sm:$0xff] }
 0x305   : > { %v2936_v26 = vsel %vm10079_vm2, %v2915_v39, %v5757_v33  ;;  %v2937_v29 = vsel %vm10080_vm3, %v2916_v27, %v5758_v1  ;;  %v10082_v39 = vpack.i.bf16 %v10081_v47, %v10065_v22  ;;  %v5778_v27 = vunpack.i.h.bf16 %v8241_v62  ;;  %v10084_v1 = vld [vmem:[#allocation93_spill] sm:$0xff]  ;;  %v10085_v33 = vld [vmem:[#allocation91_spill] sm:$0xff]  ;;  %vm10105_vm2 = vmmov %vm10093_vm5 }
 0x306   : > { %v5297_v25 = vunpack.i.l.bf16 %v10083_v10  ;;  %vm10106_vm3 = vmmov %vm10105_vm2 }
 0x308   : > { %v8332_v31 = vpop.permute.xlu2 %5815  ;;  %v8334_v50 = vpop.permute.xlu1 %5785  ;;  %v3295_v62 = vsel %vm2740_vm9, %v10084_v1, %v5297_v25  ;;  %v10091_v25 = vld [vmem:[#allocation97_spill] sm:$0xff] }
 0x309   : > { %v5788_v30 = vunpack.i.h.bf16 %v8334_v50 }
 0x30a   : > { %v5761_v60 = vpop.permute.xlu0 %5760 }
 0x30b   : > { %v5763_v63 = vunpack.i.h.bf16 %v5761_v60  ;;  %v5762_v15 = vunpack.i.l.bf16 %v5761_v60  ;;  %5910 = vrot.lane.b32.xlu1 %v10082_v39, %s9936_s16  ;;  %v8345_v24 = vsel %vm2740_vm9, %v8229_v36, %v5788_v30  ;;  %v10086_v36 = vunpack.i.l.bf16 %v10085_v33  ;;  %v10088_v60 = vld [vmem:[#allocation90_spill] sm:$0xff] }
 0x30d   : > { %v2957_v23 = vsel %vm2950_vm4, %v2936_v26, %v5762_v15  ;;  %v2958_v43 = vsel %vm2950_vm4, %v2937_v29, %v5763_v63  ;;  %v3315_v8 = vsel %vm2761_vm10, %v3295_v62, %v10086_v36  ;;  %v3293_v26 = vsel %vm2740_vm9, %v10087_v52, %v5277_v14  ;;  %v10097_v52 = vld [vmem:[#allocation29_spill] sm:$0xff] }
 0x30e   : > { %v8352_v20 = vsel %vm2971_vm0, %v2957_v23, %v5777_v13  ;;  %v8355_v22 = vsel %vm2971_vm0, %v2958_v43, %v5778_v27  ;;  %v10089_v63 = vunpack.i.l.bf16 %v10088_v60  ;;  %v10090_v27 = vunpack.i.l.bf16 %v7204_v46  ;;  %v10169_v60 = vld [vmem:[#allocation95_spill] sm:$0xff] }
 0x30f   : > { %v10092_v14 = vunpack.i.l.bf16 %v10091_v25  ;;  %v10094_v43 = vunpack.i.l.bf16 %v7249_v7  ;;  %v10095_v46 = vunpack.i.l.bf16 %v7880_v16  ;;  %v10098_v7 = vunpack.i.l.bf16 %v10097_v52 }
 0x310   : > { %v8362_v21 = vpop.permute.xlu2 %5830  ;;  %v5796_v30 = vpop.permute.xlu1 %5795  ;;  %v3335_v15 = vsel %vm2782_vm11, %v3315_v8, %v10089_v63  ;;  %v3313_v13 = vsel %vm2761_vm10, %v3293_v26, %v10090_v27  ;;  %v5113_v8 = vld [vmem:[%s9579_s3 + $0x38] sm:$0xff]  ;;  %v3424_v27 = vrot.slane %v8073_v28, 1  ;;  %v5708_v28 = vunpack.i.h.bf16 %v8163_v49 }
 0x311   : > { %v3355_v23 = vsel %vm10093_vm5, %v3335_v15, %v10092_v14  ;;  %v3333_v1 = vsel %vm2782_vm11, %v3313_v13, %v10094_v43  ;;  %3658 = vmatpush.bf16.msrb.mxu1 %v5113_v8  ;;  %v9802_v43 = vunpack.i.h.bf16 %v8332_v31  ;;  %v10103_v8 = vld [vmem:[#allocation68_spill] sm:$0xff]  ;;  %vm10107_vm5 = vcmask 1046528  }
 0x312   : > { %v8366_v29 = vpop.permute.xlu0 %5770  ;;  %v3353_v36 = vsel %vm10096_vm12, %v3333_v1, %v10095_v46  ;;  %v8399_v26 = vsel %vm10099_vm13, %v3355_v23, %v10098_v7  ;;  %v5817_v1 = vunpack.i.l.bf16 %v8332_v31  ;;  %vm10108_vm12 = vmmov %vm10107_vm5 }
 0x313   : > { %v9798_v47 = vunpack.i.h.bf16 %v8366_v29  ;;  %v5772_v39 = vunpack.i.l.bf16 %v8366_v29  ;;  %5925 = vrot.lane.b32.xlu1 %v7558_v34, %s9969_s14  ;;  %v9804_v15 = vrot.slane %v8399_v26, 1  ;;  %vm10110_vm13 = vmmov %vm10105_vm2 }
 0x315   : > { %v2772_v62 = vsel %vm2761_vm10, %v8233_v59, %v5772_v39  ;;  %v2773_v34 = vsel %vm2761_vm10, %v8237_v18, %v9798_v47  ;;  %v10100_v59 = vunpack.i.l.bf16 %v7767_v35 }
 0x317   : > { %v8406_v18 = vsel %vm10101_vm1, %v3353_v36, %v10100_v59  ;;  %v10102_v36 = vld [vmem:[#allocation69_spill] sm:$0xff] }
 0x318   : > { %v8401_v63 = vpop.permute.xlu2 %5860  ;;  %v8408_v16 = vpop.permute.xlu1 %5810  ;;  %v10104_v7 = vpack.i.bf16 %v10102_v36, %v10103_v8  ;;  %v9801_v59 = vrot.slane %v8406_v18, 1 }
 0x319   : > { %v9803_v13 = vunpack.i.h.bf16 %v8408_v16  ;;  %v5812_v14 = vunpack.i.l.bf16 %v8408_v16 }
 0x31a   : > { %v5791_v23 = vpop.permute.xlu0 %5790  ;;  %v3425_v49 = vsel %vm10107_vm5, %v9801_v59, %v3424_v27  ;;  %v5803_v59 = vunpack.i.h.bf16 %v8315_v3  ;;  %vm10114_vm5 = vmmov %vm10101_vm1 }
 0x31b   : > { %v5793_v46 = vunpack.i.h.bf16 %v5791_v23  ;;  %v5792_v35 = vunpack.i.l.bf16 %v5791_v23  ;;  %5940 = vrot.lane.b32.xlu1 %v10104_v7, %s9994_s12  ;;  %v2793_v47 = vsel %vm2782_vm11, %v2772_v62, %v5812_v14  ;;  %v2794_v9 = vsel %vm2782_vm11, %v2773_v34, %v9803_v13 }
 0x31c   : > { %v2814_v17 = vsel %vm10105_vm2, %v2793_v47, %v5817_v1  ;;  %v2815_v23 = vsel %vm10106_vm3, %v2794_v9, %v9802_v43  ;;  %v3427_v62 = vsel %vm10108_vm12, %v3424_v27, %v9804_v15  ;;  %v5798_v34 = vunpack.i.h.bf16 %v5796_v30  ;;  %vm10113_vm3 = vmmov %vm10101_vm1 }
 0x31d   : > { %v2691_v36 = vsel %vm2677_vm6, %v7760_v0, %v5793_v46  ;;  %v2690_v8 = vsel %vm2677_vm6, %v7436_v40, %v5792_v35  ;;  %v5797_v47 = vunpack.i.l.bf16 %v5796_v30  ;;  %v3286_v7 = vsel %vm2740_vm9, %v8099_v32, %v5708_v28  ;;  %vm10115_vm12 = vmmov %vm10101_vm1 }
 0x31e   : > { %v2712_v0 = vsel %vm2698_vm7, %v2691_v36, %v5798_v34  ;;  %v5954_v35 = vpack.i.bf16 %v3427_v62, %v3425_v49  ;;  %v5802_v43 = vunpack.i.l.bf16 %v8315_v3  ;;  %v10109_v27 = vunpack.i.h.bf16 %v8110_v2 }
 0x31f   : > { %v2711_v46 = vsel %vm2698_vm7, %v2690_v8, %v5797_v47  ;;  %v5787_v32 = vunpack.i.l.bf16 %v8334_v50  ;;  %v8462_v3 = vsel %vm2719_vm8, %v2712_v0, %v5803_v59 }
 0x320   : > { %v8442_v9 = vpop.permute.xlu2 %5875  ;;  %v8446_v40 = vpop.permute.xlu1 %5835  ;;  %v3306_v30 = vsel %vm2761_vm10, %v3286_v7, %v10109_v27  ;;  %v8459_v8 = vsel %vm2719_vm8, %v2711_v46, %v5802_v43  ;;  %v5833_v46 = vunpack.i.h.bf16 %v8362_v21  ;;  %v10116_v27 = vrot.slane %v8308_v45, 1 }
 0x321   : > { %v3326_v36 = vsel %vm2782_vm11, %v3306_v30, %v5733_v57  ;;  %v3287_v11 = vsel %vm2740_vm9, %v8226_v58, %v5787_v32  ;;  %v10111_v57 = vunpack.i.h.bf16 %v8296_v48  ;;  %v10112_v58 = vld [vmem:[#allocation28_spill] sm:$0xff]  ;;  %v5838_v32 = vunpack.i.h.bf16 %v8446_v40 }
 0x322   : > { %v5806_v13 = vpop.permute.xlu0 %5805  ;;  %v3307_v59 = vsel %vm2761_vm10, %v3287_v11, %v5772_v39 }
 0x323   : > { %v5808_v28 = vunpack.i.h.bf16 %v5806_v13  ;;  %v5807_v15 = vunpack.i.l.bf16 %v5806_v13  ;;  %5955 = vrot.lane.b32.xlu1 %v5954_v35, %s6272_s17  ;;  %v3346_v13 = vsel %vm10110_vm13, %v3326_v36, %v5738_v53  ;;  %v5832_v35 = vunpack.i.l.bf16 %v8362_v21 }
 0x324   : > { %v3366_v43 = vsel %vm10101_vm1, %v3346_v13, %v10111_v57  ;;  %vm10117_vm13 = vcmask 1046528   ;;  %v5837_v36 = vunpack.i.l.bf16 %v8446_v40  ;;  %v5112_v57 = vld [vmem:[%s9579_s3 + $0x30] sm:$0xff] }
 0x325   : > { %v2753_v2 = vsel %vm2740_vm9, %v8459_v8, %v5807_v15  ;;  %v2754_v50 = vsel %vm2740_vm9, %v8462_v3, %v5808_v28  ;;  %v3327_v15 = vsel %vm2782_vm11, %v3307_v59, %v5812_v14  ;;  %v3408_v47 = vrot.slane %v3366_v43, 1  ;;  %vm10118_vm1 = vmmov %vm10117_vm13  ;;  %3659 = vmatpush.bf16.msrb.mxu1 %v5112_v57 }
 0x326   : > { %v3347_v48 = vsel %vm10105_vm2, %v3327_v15, %v5817_v1  ;;  %v5878_v1 = vunpack.i.h.bf16 %v8442_v9  ;;  %vm10120_vm2 = vcmask 539648  }
 0x327   : > { %v3409_v30 = vsel %vm10117_vm13, %v10116_v27, %v3408_v47  ;;  %vm10124_vm13 = vcmask 343040  }
 0x328   : > { %v8477_v49 = vpop.permute.xlu2 %5885  ;;  %v5841_v62 = vpop.permute.xlu1 %5840 }
 0x329   : > { %v9808_v43 = vunpack.i.h.bf16 %v8477_v49  ;;  %v5887_v59 = vunpack.i.l.bf16 %v8477_v49 }
 0x32a   : > { %v8480_v34 = vpop.permute.xlu0 %5820 }
 0x32b   : > { %v9806_v38 = vunpack.i.h.bf16 %v8480_v34  ;;  %v5822_v53 = vunpack.i.l.bf16 %v8480_v34  ;;  %5975 = vrot.lane.b32.xlu1 %v10112_v58, %s9980_s25 }
 0x32d   : > { %v2835_v7 = vsel %vm10113_vm3, %v2814_v17, %v5822_v53  ;;  %v2836_v39 = vsel %vm10114_vm5, %v2815_v23, %v9806_v38  ;;  %v8492_v14 = vsel %vm10115_vm12, %v3347_v48, %v5822_v53  ;;  %v5877_v17 = vunpack.i.l.bf16 %v8442_v9  ;;  %vm10121_vm3 = vmmov %vm10120_vm2 }
 0x32e   : > { %v9805_v0 = vrot.slane %v8492_v14, 1  ;;  %vm10122_vm5 = vcmask 588800   ;;  %v10161_v9 = vrot.slane %v8492_v14, 1 }
 0x32f   : > { %vm10123_vm12 = vmmov %vm10122_vm5 }
 0x330   : > { %v5916_v23 = vpop.permute.xlu2 %5915  ;;  %v3411_v28 = vsel %vm10118_vm1, %v3408_v47, %v9805_v0  ;;  %v8507_v21 = vpop.permute.xlu1 %5845  ;;  %v5842_v0 = vunpack.i.l.bf16 %v5841_v62  ;;  %vm10125_vm1 = vmmov %vm10124_vm13 }
 0x331   : > { %v5918_v13 = vunpack.i.h.bf16 %v5916_v23  ;;  %v5917_v11 = vunpack.i.l.bf16 %v5916_v23  ;;  %v5959_v45 = vpack.i.bf16 %v3411_v28, %v3409_v30  ;;  %v5848_v15 = vunpack.i.h.bf16 %v8507_v21  ;;  %v10119_v23 = vld [vmem:[#allocation78_spill] sm:$0xff] }
 0x332   : > { %v5847_v53 = vunpack.i.l.bf16 %v8507_v21  ;;  %v5826_v47 = vpop.permute.xlu0 %5825  ;;  %v5843_v28 = vunpack.i.h.bf16 %v5841_v62  ;;  %v5108_v21 = vld [vmem:[%s9579_s3 + $0x10] sm:$0xff] }
 0x333   : > { %v8517_v40 = vsel %vm9807_vm14, %v2835_v7, %v5917_v11  ;;  %v8520_v48 = vsel %vm9807_vm14, %v2836_v39, %v5918_v13  ;;  %v5828_v27 = vunpack.i.h.bf16 %v5826_v47  ;;  %v5827_v30 = vunpack.i.l.bf16 %v5826_v47  ;;  %5960 = vrot.lane.b32.xlu2 %v5959_v45, %s6272_s17  ;;  %5995 = vrot.lane.b32.xlu1 %v10119_v23, %s9998_s26  ;;  %v5086_v47 = vld [vmem:[%s6402_s29 + $0x170] sm:$0xff] }
 0x334   : > { %v2774_v38 = vsel %vm2761_vm10, %v2753_v2, %v5847_v53  ;;  %v2775_v7 = vsel %vm2761_vm10, %v2754_v50, %v5848_v15  ;;  %vm10126_vm14 = vcmask 637952  }
 0x335   : > { %v2795_v39 = vsel %vm2782_vm11, %v2774_v38, %v5877_v17  ;;  %v2796_v13 = vsel %vm2782_vm11, %v2775_v7, %v5878_v1  ;;  %v2896_v62 = vsel %vm10120_vm2, %v8327_v12, %v5827_v30  ;;  %v2897_v11 = vsel %vm10121_vm3, %v8330_v56, %v5828_v27  ;;  %vm10127_vm2 = vmmov %vm10126_vm14 }
 0x336   : > { %v2917_v2 = vsel %vm10122_vm5, %v2896_v62, %v5832_v35  ;;  %v2918_v45 = vsel %vm10123_vm12, %v2897_v11, %v5833_v46  ;;  %v8546_v50 = vsel %vm10124_vm13, %v2795_v39, %v5887_v59  ;;  %v8551_v38 = vsel %vm10125_vm1, %v2796_v13, %v9808_v43  ;;  %vm10139_vm5 = vmmov %vm10125_vm1 }
 0x337   : > { %v2938_v57 = vsel %vm10126_vm14, %v2917_v2, %v5837_v36  ;;  %v2939_v12 = vsel %vm10127_vm2, %v2918_v45, %v5838_v32  ;;  %vm10128_vm3 = vcmask 203776   ;;  %v5862_v11 = vunpack.i.l.bf16 %v8401_v63  ;;  %vm10138_vm14 = vmmov %vm10125_vm1 }
 0x338   : > { %v2959_v56 = vsel %vm2950_vm4, %v2938_v57, %v5842_v0  ;;  %v2960_v35 = vsel %vm2950_vm4, %v2939_v12, %v5843_v28  ;;  %v5856_v46 = vpop.permute.xlu1 %5855  ;;  %4822 = vmatmul.msk.bf16.gmra.mxu2 %vm10128_vm3, %v5086_v47  ;;  %v5111_v28 = vld [vmem:[%s9579_s3 + $0x28] sm:$0xff]  ;;  %v10130_v47 = vld [vmem:[#allocation72_spill] sm:$0xff]  ;;  %vm10140_vm12 = vmmov %vm10128_vm3  ;;  %vm10141_vm13 = vcmask 392192  }
 0x339   : > { %v5858_v36 = vunpack.i.h.bf16 %v5856_v46  ;;  %v5857_v7 = vunpack.i.l.bf16 %v5856_v46  ;;  %3660 = vmatpush.bf16.msrb.mxu1 %v5111_v28  ;;  %vm10142_vm1 = vmmov %vm10141_vm13 }
 0x33a   : > { %v5851_v27 = vpop.permute.xlu0 %5850  ;;  %vm10145_vm2 = vmmov %vm10139_vm5 }
 0x33b   : > { %v5853_v30 = vunpack.i.h.bf16 %v5851_v27  ;;  %v5852_v23 = vunpack.i.l.bf16 %v5851_v27  ;;  %5965 = vrot.lane.b32.xlu2 %v7560_v19, %s9986_s1  ;;  %6010 = vrot.lane.b32.xlu1 %v10112_v58, %s10010_s23  ;;  %v2693_v39 = vsel %vm2677_vm6, %v7518_v51, %v5858_v36  ;;  %v2692_v13 = vsel %vm2677_vm6, %v7490_v54, %v5857_v7  ;;  %v10132_v51 = vld [vmem:[#allocation33_spill] sm:$0xff]  ;;  %v10133_v54 = vld [vmem:[#allocation83_spill] sm:$0xff]  ;;  %v10134_v36 = vld [vmem:[#allocation86_spill] sm:$0xff] }
 0x33c   : > { %v5863_v58 = vunpack.i.h.bf16 %v8401_v63  ;;  %v9809_v27 = vunpack.i.h.bf16 %v10133_v54  ;;  %v2713_v63 = vsel %vm2698_vm7, %v2692_v13, %v5862_v11  ;;  %v9811_v7 = vunpack.i.h.bf16 %v10134_v36  ;;  %vm10149_vm3 = vmmov %vm10142_vm1 }
 0x33d   : > { %v8564_v32 = vsel %vm2971_vm0, %v2959_v56, %v5852_v23  ;;  %v8567_v0 = vsel %vm2971_vm0, %v2960_v35, %v5853_v30  ;;  %v10129_v35 = vld [vmem:[#allocation75_spill] sm:$0xff]  ;;  %v9816_v30 = vunpack.i.l.bf16 %v10133_v54  ;;  %v9815_v28 = vunpack.i.l.bf16 %v10134_v36 }
 0x33e   : > { %v10131_v46 = vpack.i.bf16 %v10129_v35, %v10130_v47  ;;  %v2714_v23 = vsel %vm2698_vm7, %v2693_v39, %v5863_v58  ;;  %v9814_v47 = vunpack.i.l.bf16 %v7629_v37  ;;  %v9810_v13 = vunpack.i.h.bf16 %v7691_v55 }
 0x33f   : > { %v10136_v58 = vunpack.i.h.bf16 %v8366_v29  ;;  %v10137_v29 = vunpack.i.h.bf16 %v8408_v16 }
 0x340   : > { %v5871_v62 = vpop.permute.xlu1 %5870 }
 0x341   : > { %v5873_v2 = vunpack.i.h.bf16 %v5871_v62  ;;  %v5872_v45 = vunpack.i.l.bf16 %v5871_v62  ;;  %v3308_v11 = vsel %vm2761_vm10, %v8345_v24, %v10136_v58 }
 0x342   : > { %v5866_v57 = vpop.permute.xlu0 %5865 }
 0x343   : > { %v5868_v12 = vunpack.i.h.bf16 %v5866_v57  ;;  %v5867_v56 = vunpack.i.l.bf16 %v5866_v57  ;;  %5980 = vrot.lane.b32.xlu2 %v10131_v46, %s9963_s30  ;;  %6025 = vrot.lane.b32.xlu1 %v10132_v51, %s9981_s22  ;;  %v10135_v46 = vld [vmem:[#allocation109_spill] sm:$0xff]  ;;  %s6277_s30 = smov 80  }
 0x344   : > { %v9813_v51 = vunpack.i.l.bf16 %v10135_v46 }
 0x345   : > { %v8591_v62 = vsel %vm2719_vm8, %v2714_v23, %v5868_v12  ;;  %v8594_v57 = vsel %vm2719_vm8, %v2713_v63, %v5867_v56  ;;  %v9812_v63 = vunpack.i.h.bf16 %v7688_v4  ;;  %v3328_v23 = vsel %vm2782_vm11, %v3308_v11, %v10137_v29 }
 0x346   : > { %v2756_v43 = vsel %vm2740_vm9, %v8591_v62, %v5873_v2  ;;  %v2755_v39 = vsel %vm2740_vm9, %v8594_v57, %v5872_v45  ;;  %v5110_v2 = vld [vmem:[%s9579_s3 + $0x20] sm:$0xff]  ;;  %v5087_v45 = vld [vmem:[%s6402_s29 + $0x178] sm:$0xff] }
 0x347   : > { %v2777_v12 = vsel %vm2761_vm10, %v2756_v43, %v9809_v27  ;;  %v2776_v56 = vsel %vm2761_vm10, %v2755_v39, %v9816_v30  ;;  %3661 = vmatpush.bf16.msrb.mxu1 %v5110_v2  ;;  %v10143_v2 = vld [vmem:[#allocation101_spill] sm:$0xff] }
 0x348   : > { %v2797_v24 = vsel %vm2782_vm11, %v2776_v56, %v9815_v28  ;;  %v2798_v43 = vsel %vm2782_vm11, %v2777_v12, %v9811_v7  ;;  %v5881_v39 = vpop.permute.xlu1 %5880  ;;  %4823 = vmatmul.msk.bf16.gmra.mxu2 %vm10140_vm12, %v5087_v45  ;;  %v10146_v45 = vld [vmem:[#allocation79_spill] sm:$0xff]  ;;  %v10147_v7 = vld [vmem:[#allocation66_spill] sm:$0xff]  ;;  %vm10157_vm12 = vmmov %vm10142_vm1 }
 0x349   : > { %v2818_v58 = vsel %vm10138_vm14, %v2797_v24, %v9814_v47  ;;  %v2819_v16 = vsel %vm10139_vm5, %v2798_v43, %v9810_v13  ;;  %v5883_v27 = vunpack.i.h.bf16 %v5881_v39  ;;  %v5882_v11 = vunpack.i.l.bf16 %v5881_v39  ;;  %vm10150_vm14 = vmmov %vm10142_vm1 }
 0x34a   : > { %v8633_v29 = vpop.permute.xlu0 %5890  ;;  %v8639_v12 = vsel %vm10141_vm13, %v2819_v16, %v9812_v63  ;;  %v8644_v56 = vsel %vm10142_vm1, %v2818_v58, %v9813_v51  ;;  %v5388_v24 = vunpack.i.h.bf16 %v10143_v2  ;;  %v10144_v43 = vunpack.i.h.bf16 %v8332_v31  ;;  %v5109_v16 = vld [vmem:[%s9579_s3 + $0x18] sm:$0xff]  ;;  %vm10154_vm5 = vmmov %vm10145_vm2 }
 0x34b   : > { %v5892_v13 = vunpack.i.l.bf16 %v8633_v29  ;;  %6000 = vrot.lane.b32.xlu2 %v10146_v45, %s9936_s16  ;;  %3058 = vrot.lane.b32.xlu1 %v10147_v7, %s9995_s13  ;;  %v5387_v58 = vunpack.i.l.bf16 %v10143_v2  ;;  %v10148_v63 = vunpack.i.h.bf16 %v8480_v34  ;;  %v10151_v2 = vld [vmem:[#allocation20_spill] sm:$0xff]  ;;  %v10152_v34 = vld [vmem:[#allocation102_spill] sm:$0xff]  ;;  %vm10162_vm13 = vcmask 1046528   ;;  %s6276_s13 = smov 32  }
 0x34c   : > { %v3348_v39 = vsel %vm10145_vm2, %v3328_v23, %v10144_v43  ;;  %v3289_v23 = vsel %vm2740_vm9, %v8459_v8, %v5882_v11  ;;  %v3290_v43 = vsel %vm2740_vm9, %v8462_v3, %v5883_v27  ;;  %3662 = vmatpush.bf16.msrb.mxu1 %v5109_v16  ;;  %v5302_v51 = vunpack.i.l.bf16 %v10151_v2  ;;  %vm10163_vm1 = vmmov %vm10162_vm13 }
 0x34d   : > { %v3368_v31 = vsel %vm10149_vm3, %v3348_v39, %v10148_v63  ;;  %v3309_v7 = vsel %vm2761_vm10, %v3289_v23, %v5847_v53  ;;  %v8671_v45 = vsel %vm10150_vm14, %v8546_v50, %v5892_v13  ;;  %v5393_v47 = vunpack.i.h.bf16 %v10152_v34  ;;  %v10153_v53 = vld [vmem:[#allocation84_spill] sm:$0xff]  ;;  %v10156_v23 = vld [vmem:[#allocation82_spill] sm:$0xff]  ;;  %vm10165_vm2 = vmmov %vm10149_vm3 }
 0x34e   : > { %v3310_v8 = vsel %vm2761_vm10, %v3290_v43, %v5848_v15  ;;  %v3329_v3 = vsel %vm2782_vm11, %v3309_v7, %v5877_v17  ;;  %v5392_v27 = vunpack.i.l.bf16 %v10152_v34  ;;  %v2679_v63 = vsel %vm2677_vm6, %v10153_v53, %v5388_v24  ;;  %v10155_v39 = vld [vmem:[#allocation96_spill] sm:$0xff]  ;;  %vm10167_vm3 = vmmov %vm10154_vm5 }
 0x34f   : > { %v3412_v50 = vrot.slane %v3368_v31, 1  ;;  %v3349_v11 = vsel %vm10154_vm5, %v3329_v3, %v5887_v59  ;;  %v5308_v16 = vunpack.i.h.bf16 %v10155_v39  ;;  %v2678_v17 = vsel %vm2677_vm6, %v10156_v23, %v5387_v58  ;;  %v10158_v3 = vld [vmem:[#allocation35_spill] sm:$0xff]  ;;  %v10159_v15 = vld [vmem:[#allocation12_spill] sm:$0xff]  ;;  %vm10168_vm14 = vmmov %vm10165_vm2 }
 0x350   : > { %v3369_v43 = vsel %vm10157_vm12, %v3349_v11, %v5892_v13  ;;  %v5307_v24 = vunpack.i.l.bf16 %v10155_v39  ;;  %v5303_v31 = vunpack.i.h.bf16 %v10151_v2  ;;  %v8697_v34 = vpop.permute.xlu1 %5895  ;;  %v3330_v59 = vsel %vm2782_vm11, %v3310_v8, %v5878_v1  ;;  %3663 = vmatpush.bf16.msrb.mxu1 %v5108_v21  ;;  %v10160_v23 = vld [vmem:[#allocation40_spill] sm:$0xff]  ;;  %vm10175_vm5 = vmmov %vm10167_vm3 }
 0x351   : > { %v3414_v7 = vrot.slane %v3369_v43, 1  ;;  %v3262_v53 = vsel %vm2677_vm6, %v10158_v3, %v5302_v51  ;;  %v5398_v28 = vunpack.i.h.bf16 %v10159_v15  ;;  %v2700_v58 = vsel %vm2698_vm7, %v2679_v63, %v5393_v47  ;;  %v5107_v51 = vld [vmem:[%s9579_s3 + $0x8] sm:$0xff]  ;;  %v10164_v47 = vld [vmem:[#allocation104_spill] sm:$0xff]  ;;  %vm10177_vm12 = vmmov %vm10165_vm2 }
 0x352   : > { %v5898_v13 = vunpack.i.h.bf16 %v8697_v34  ;;  %v5901_v11 = vpop.permute.xlu0 %5900  ;;  %v2699_v2 = vsel %vm2698_vm7, %v2678_v17, %v5392_v27  ;;  %v3413_v1 = vsel %vm10162_vm13, %v10161_v9, %v3412_v50  ;;  %v5402_v63 = vunpack.i.l.bf16 %v10164_v47  ;;  %vm10181_vm13 = vmmov %vm10163_vm1 }
 0x353   : > { %v5902_v39 = vunpack.i.l.bf16 %v5901_v11  ;;  %6050 = vrot.lane.b32.xlu1 %v10160_v23, %s9980_s25  ;;  %v3415_v8 = vsel %vm10163_vm1, %v3412_v50, %v3414_v7  ;;  %v10166_v27 = vunpack.i.h.bf16 %v8477_v49  ;;  %v5397_v14 = vunpack.i.l.bf16 %v10159_v15  ;;  %v10172_v15 = vld [vmem:[#allocation105_spill] sm:$0xff] }
 0x354   : > { %v8720_v21 = vsel %vm10165_vm2, %v8551_v38, %v5898_v13  ;;  %v5984_v43 = vpack.i.bf16 %v3415_v8, %v3413_v1  ;;  %v5403_v9 = vunpack.i.h.bf16 %v10164_v47  ;;  %3664 = vmatpush.bf16.msrb.mxu1 %v5107_v51  ;;  %v5312_v3 = vunpack.i.l.bf16 %v10169_v60  ;;  %vm10189_vm2 = vmmov %vm10167_vm3 }
 0x355   : > { %v3350_v17 = vsel %vm10167_vm3, %v3330_v59, %v10166_v27  ;;  %v3291_v30 = vsel %vm2740_vm9, %v8594_v57, %v5902_v39  ;;  %v3263_v38 = vsel %vm2677_vm6, %v10170_v41, %v5303_v31  ;;  %v3269_v49 = vsel %vm2698_vm7, %v3262_v53, %v5307_v24  ;;  %v5114_v27 = vld [vmem:[%s9579_s3 + $0x40] sm:$0xff]  ;;  %vm10190_vm3 = vmmov %vm10189_vm2 }
 0x356   : > { %v3370_v50 = vsel %vm10168_vm14, %v3350_v17, %v5898_v13  ;;  %v10171_v59 = vunpack.i.l.bf16 %v10133_v54  ;;  %5985 = vrot.lane.b32.xlu0 %v5984_v43, %s6272_s17  ;;  %v5407_v8 = vunpack.i.l.bf16 %v10172_v15  ;;  %v2720_v13 = vsel %vm2719_vm8, %v2699_v2, %v5397_v14  ;;  %v10178_v14 = vld [vmem:[#allocation24_spill] sm:$0xff]  ;;  %3724 = vmatpush.bf16.msrb.mxu2 %v5114_v27  ;;  %vm10193_vm14 = vmmov %vm10177_vm12 }
 0x357   : > { %v2721_v57 = vsel %vm2719_vm8, %v2700_v58, %v5398_v28  ;;  %v10173_v39 = vunpack.i.l.bf16 %v10134_v36  ;;  %v5408_v31 = vunpack.i.h.bf16 %v10172_v15  ;;  %v2741_v24 = vsel %vm2740_vm9, %v2720_v13, %v5402_v63  ;;  %v5106_v28 = vld [vmem:[%s9579_s3] sm:$0xff] }
 0x358   : > { %v3311_v1 = vsel %vm2761_vm10, %v3291_v30, %v10171_v59  ;;  %v3416_v53 = vrot.slane %v3370_v50, 1  ;;  %v10174_v47 = vunpack.i.l.bf16 %v7629_v37  ;;  %v5313_v58 = vunpack.i.h.bf16 %v10169_v60  ;;  %3665 = vmatpush.bf16.msrb.mxu1 %v5106_v28  ;;  %v10179_v60 = vld [vmem:[#allocation100_spill] sm:$0xff] }
 0x359   : > { %v3331_v51 = vsel %vm2782_vm11, %v3311_v1, %v10173_v39  ;;  %v3270_v2 = vsel %vm2698_vm7, %v3263_v38, %v5308_v16  ;;  %v2742_v17 = vsel %vm2740_vm9, %v2721_v57, %v5403_v9  ;;  %v10176_v63 = vunpack.i.l.bf16 %v10135_v46 }
 0x35a   : > { %v3351_v30 = vsel %vm10175_vm5, %v3331_v51, %v10174_v47  ;;  %v3276_v43 = vsel %vm2719_vm8, %v3269_v49, %v5312_v3  ;;  %v5332_v50 = vunpack.i.l.bf16 %v10178_v14  ;;  %v5903_v59 = vunpack.i.h.bf16 %v5901_v11  ;;  %v5921_v1 = vpop.permute.xlu0 %5920  ;;  %v10180_v3 = vld [vmem:[#allocation106_spill] sm:$0xff]  ;;  %v10182_v47 = vld [vmem:[#allocation80_spill] sm:$0xff]  ;;  %vm10194_vm5 = vmmov %vm10177_vm12 }
 0x35b   : > { %v8761_v37 = vsel %vm10177_vm12, %v3351_v30, %v10176_v63  ;;  %v5433_v13 = vunpack.i.h.bf16 %v10179_v60  ;;  %v2762_v16 = vsel %vm2761_vm10, %v2741_v24, %v5407_v8  ;;  %v5923_v9 = vunpack.i.h.bf16 %v5921_v1  ;;  %6060 = vrot.lane.b32.xlu1 %v10160_v23, %s10010_s23  ;;  %v10183_v30 = vld [vmem:[#allocation77_spill] sm:$0xff] }
 0x35c   : > { %v3418_v15 = vrot.slane %v8761_v37, 1  ;;  %v5922_v38 = vunpack.i.l.bf16 %v5921_v1  ;;  %v2763_v46 = vsel %vm2761_vm10, %v2742_v17, %v5408_v31  ;;  %v5438_v49 = vunpack.i.h.bf16 %v10180_v3  ;;  %v10186_v17 = vld [vmem:[#allocation39_spill] sm:$0xff]  ;;  %v10188_v1 = vld [vmem:[#allocation25_spill] sm:$0xff] }
 0x35d   : > { %v3417_v11 = vsel %vm10181_vm13, %v3414_v7, %v3416_v53  ;;  %v5437_v39 = vunpack.i.l.bf16 %v10180_v3  ;;  %v8783_v51 = vsel %vm9817_vm15, %v8520_v48, %v5923_v9  ;;  %v5432_v31 = vunpack.i.l.bf16 %v10179_v60  ;;  %v10192_v3 = vld [vmem:[#allocation22_spill] sm:$0xff] }
 0x35e   : > { %v3419_v57 = vsel %vm10163_vm1, %v3416_v53, %v3418_v15  ;;  %v8779_v8 = vsel %vm9817_vm15, %v8517_v40, %v5922_v38  ;;  %v5893_v24 = vunpack.i.h.bf16 %v8633_v29  ;;  %v5897_v7 = vunpack.i.l.bf16 %v8697_v34  ;;  %v10187_v29 = vld [vmem:[#allocation56_spill] sm:$0xff]  ;;  %vm10202_vm1 = vmmov %vm10189_vm2 }
 0x35f   : > { %v6014_v23 = vpack.i.bf16 %v3419_v57, %v3417_v11  ;;  %v3292_v53 = vsel %vm2740_vm9, %v8591_v62, %v5903_v59  ;;  %v10184_v27 = vpack.i.bf16 %v10182_v47, %v10183_v30  ;;  %v3277_v40 = vsel %vm2719_vm8, %v3270_v2, %v5313_v58  ;;  %v10195_v57 = vld [vmem:[#allocation103_spill] sm:$0xff]  ;;  %v10199_v47 = vld [vmem:[#allocation98_spill] sm:$0xff] }
 0x360   : > { %v10185_v48 = vunpack.i.h.bf16 %v10083_v10  ;;  %v6074_v63 = vpack.i.bf16 %v10187_v29, %v10186_v17  ;;  %v3297_v34 = vsel %vm2740_vm9, %v3277_v40, %v5332_v50  ;;  %v5338_v62 = vunpack.i.h.bf16 %v10188_v1  ;;  %v10200_v40 = vld [vmem:[#allocation11_spill] sm:$0xff]  ;;  %v10203_v29 = vld [vmem:[#allocation34_spill] sm:$0xff] }
 0x361   : > { %5990 = vrot.lane.b32.xlu0 %v10184_v27, %s9997_s2  ;;  %6015 = vrot.lane.b32.xlu2 %v6014_v23, %s6272_s17  ;;  %v2783_v59 = vsel %vm2782_vm11, %v2762_v16, %v5432_v31  ;;  %v2784_v60 = vsel %vm2782_vm11, %v2763_v46, %v5433_v13  ;;  %v5337_v9 = vunpack.i.l.bf16 %v10188_v1  ;;  %v10191_v2 = vunpack.i.h.bf16 %v10133_v54 }
 0x362   : > { %v3296_v28 = vsel %vm2740_vm9, %v3276_v43, %v10185_v48  ;;  %v2804_v58 = vsel %vm10189_vm2, %v2783_v59, %v5437_v39  ;;  %v2805_v10 = vsel %vm10190_vm3, %v2784_v60, %v5438_v49  ;;  %v5288_v38 = vunpack.i.h.bf16 %v10085_v33  ;;  %vm10204_vm2 = vmmov %vm10202_vm1  ;;  %v10206_v59 = vld [vmem:[#allocation26_spill] sm:$0xff] }
 0x363   : > { %v3312_v43 = vsel %vm2761_vm10, %v3292_v53, %v10191_v2  ;;  %v5327_v50 = vunpack.i.l.bf16 %v10192_v3  ;;  %v2825_v11 = vsel %vm10193_vm14, %v2804_v58, %v5893_v24  ;;  %v2826_v16 = vsel %vm10194_vm5, %v2805_v10, %v5897_v7  ;;  %6075 = vrot.lane.b32.xlu1 %v6074_v63, %s10005_s19  ;;  %vm10205_vm3 = vmmov %vm10202_vm1 }
 0x364   : > { %v5443_v13 = vunpack.i.h.bf16 %v10195_v57  ;;  %v5442_v46 = vunpack.i.l.bf16 %v10195_v57  ;;  %v3316_v54 = vsel %vm2761_vm10, %v3296_v28, %v5288_v38  ;;  %v10196_v39 = vunpack.i.h.bf16 %v10134_v36  ;;  %vm10209_vm14 = vmmov %vm10194_vm5 }
 0x365   : > { %v3317_v49 = vsel %vm2761_vm10, %v3297_v34, %v5327_v50  ;;  %v3336_v31 = vsel %vm2782_vm11, %v3316_v54, %v5337_v9  ;;  %vm10197_vm12 = vcmask 441344   ;;  %v5357_v30 = vunpack.i.l.bf16 %v10199_v47 }
 0x366   : > { %v3332_v23 = vsel %vm2782_vm11, %v3312_v43, %v10196_v39  ;;  %v3337_v24 = vsel %vm2782_vm11, %v3317_v49, %v5338_v62  ;;  %v2846_v7 = vsel %vm10197_vm12, %v2825_v11, %v5442_v46  ;;  %vm10198_vm13 = vmmov %vm10197_vm12  ;;  %v5318_v27 = vunpack.i.h.bf16 %v10091_v25  ;;  %v10215_v46 = vld [vmem:[#allocation16_spill] sm:$0xff] }
 0x367   : > { %v2847_v53 = vsel %vm10198_vm13, %v2826_v16, %v5443_v13  ;;  %v5453_v48 = vunpack.i.h.bf16 %v10200_v40  ;;  %v5452_v28 = vunpack.i.l.bf16 %v10200_v40  ;;  %v10201_v36 = vunpack.i.h.bf16 %v7691_v55  ;;  %vm10210_vm12 = vmmov %vm10194_vm5  ;;  %v10214_v16 = vld [vmem:[#allocation10_spill] sm:$0xff]  ;;  %v10220_v40 = vld [vmem:[#allocation64_spill] sm:$0xff] }
 0x368   : > { %v3356_v63 = vsel %vm10204_vm2, %v3336_v31, %v5318_v27  ;;  %v3357_v34 = vsel %vm10205_vm3, %v3337_v24, %v5357_v30  ;;  %v5323_v62 = vunpack.i.h.bf16 %v10097_v52  ;;  %v5362_v60 = vunpack.i.l.bf16 %v10206_v59  ;;  %v10213_v52 = vld [vmem:[#allocation48_spill] sm:$0xff]  ;;  %v10216_v31 = vld [vmem:[#allocation65_spill] sm:$0xff] }
 0x369   : > { %6005 = vrot.lane.b32.xlu0 %v7560_v19, %s9985_s0  ;;  %v3352_v17 = vsel %vm10202_vm1, %v3332_v23, %v10201_v36  ;;  %6020 = vrot.lane.b32.xlu2 %v10203_v29, %s9969_s14  ;;  %v2867_v25 = vsel %vm9817_vm15, %v2846_v7, %v5452_v28  ;;  %v2868_v1 = vsel %vm9817_vm15, %v2847_v53, %v5453_v48  ;;  %v10207_v19 = vld [vmem:[#allocation108_spill] sm:$0xff]  ;;  %v10208_v58 = vunpack.i.h.bf16 %v7688_v4  ;;  %v10219_v53 = vld [vmem:[#allocation14_spill] sm:$0xff]  ;;  %v10221_v48 = vld [vmem:[#allocation19_spill] sm:$0xff] }
 0x36a   : > { %v5493_v9 = vunpack.i.h.bf16 %v10207_v19  ;;  %v5492_v55 = vunpack.i.l.bf16 %v10207_v19  ;;  %v3376_v2 = vsel %vm10194_vm5, %v3356_v63, %v5323_v62  ;;  %v8853_v43 = vsel %vm10210_vm12, %v3357_v34, %v5362_v60  ;;  %v10223_v63 = vld [vmem:[#allocation42_spill] sm:$0xff] }
 0x36b   : > { %v3372_v10 = vsel %vm10209_vm14, %v3352_v17, %v10208_v58  ;;  %vm10211_vm13 = vcmask 539648   ;;  %6090 = vrot.lane.b32.xlu1 %v10213_v52, %s9980_s25  ;;  %v5343_v57 = vunpack.i.h.bf16 %v10214_v16  ;;  %v5342_v13 = vunpack.i.l.bf16 %v10214_v16  ;;  %v10222_v17 = vld [vmem:[#allocation45_spill] sm:$0xff] }
 0x36c   : > { %v2888_v50 = vsel %vm10211_vm13, %v2867_v25, %v5492_v55  ;;  %vm10212_vm1 = vmmov %vm10211_vm13  ;;  %v5498_v4 = vunpack.i.h.bf16 %v10215_v46  ;;  %v5497_v54 = vunpack.i.l.bf16 %v10215_v46  ;;  %v3420_v49 = vrot.slane %v3372_v10, 1  ;;  %v10234_v16 = vld [vmem:[#allocation49_spill] sm:$0xff] }
 0x36d   : > { %v2889_v11 = vsel %vm10212_vm1, %v2868_v1, %v5493_v9  ;;  %v3428_v39 = vrot.slane %v3376_v2, 1  ;;  %v3430_v23 = vrot.slane %v8853_v43, 1  ;;  %vm10217_vm2 = vcmask 588800   ;;  %v10229_v9 = vld [vmem:[#allocation107_spill] sm:$0xff] }
 0x36e   : > { %v2909_v24 = vsel %vm10217_vm2, %v2888_v50, %v5497_v54  ;;  %vm10218_vm3 = vmmov %vm10217_vm2  ;;  %v5503_v30 = vunpack.i.h.bf16 %v10219_v53  ;;  %v5502_v27 = vunpack.i.l.bf16 %v10219_v53  ;;  %v5348_v28 = vunpack.i.h.bf16 %v10221_v48 }
 0x36f   : > { %v2910_v7 = vsel %vm10218_vm3, %v2889_v11, %v5498_v4  ;;  %v5347_v36 = vunpack.i.l.bf16 %v10221_v48  ;;  %v3265_v29 = vsel %vm2677_vm6, %v10222_v17, %v5343_v57  ;;  %v3264_v34 = vsel %vm2677_vm6, %v10223_v63, %v5342_v13  ;;  %v10235_v57 = vld [vmem:[#allocation44_spill] sm:$0xff] }
 0x370   : > { %vm10224_vm14 = vcmask 1046528   ;;  %v10225_v1 = vrot.slane %v8406_v18, 1  ;;  %vm10227_vm12 = vcmask 637952   ;;  %v5508_v55 = vunpack.i.h.bf16 %v10229_v9 }
 0x371   : > { %3008 = vrot.lane.b32.xlu0 %v10216_v31, %s9961_s24  ;;  %3033 = vrot.lane.b32.xlu2 %v10220_v40, %s9994_s12  ;;  %v3421_v25 = vsel %vm10224_vm14, %v3418_v15, %v3420_v49  ;;  %vm10226_vm5 = vmmov %vm10224_vm14  ;;  %v2930_v60 = vsel %vm10227_vm12, %v2909_v24, %v5502_v27  ;;  %v5507_v58 = vunpack.i.l.bf16 %v10229_v9  ;;  %v10230_v10 = vrot.slane %v8399_v26, 1  ;;  %v10233_v15 = vld [vmem:[#allocation17_spill] sm:$0xff]  ;;  %s6275_s24 = smov 112  }
 0x372   : > { %v3423_v62 = vsel %vm10226_vm5, %v3420_v49, %v10225_v1  ;;  %vm10228_vm13 = vmmov %vm10227_vm12  ;;  %v5353_v18 = vunpack.i.h.bf16 %v10233_v15  ;;  %v5352_v50 = vunpack.i.l.bf16 %v10233_v15  ;;  %v3271_v11 = vsel %vm2698_vm7, %v3264_v34, %v5347_v36  ;;  %v10237_v49 = vld [vmem:[#allocation110_spill] sm:$0xff]  ;;  %v10240_v15 = vld [vmem:[#allocation27_spill] sm:$0xff] }
 0x373   : > { %v2931_v19 = vsel %vm10228_vm13, %v2910_v7, %v5503_v30  ;;  %vm10231_vm1 = vmmov %vm10226_vm5  ;;  %v10236_v13 = vpack.i.bf16 %v10234_v16, %v10235_v57  ;;  %v3272_v46 = vsel %vm2698_vm7, %v3265_v29, %v5348_v28  ;;  %v6029_v26 = vpack.i.bf16 %v3423_v62, %v3421_v25  ;;  %v10238_v29 = vld [vmem:[#allocation99_spill] sm:$0xff]  ;;  %v10239_v62 = vld [vmem:[#allocation30_spill] sm:$0xff] }
 0x374   : > { %v3429_v2 = vsel %vm10231_vm1, %v10230_v10, %v3428_v39  ;;  %vm10232_vm2 = vmmov %vm10231_vm1  ;;  %v2951_v4 = vsel %vm2950_vm4, %v2930_v60, %v5507_v58  ;;  %v2952_v54 = vsel %vm2950_vm4, %v2931_v19, %v5508_v55  ;;  %v5532_v31 = vunpack.i.l.bf16 %v10237_v49  ;;  %v8921_v10 = vpop.permute.xlu2 %5930  ;;  %v10241_v16 = vld [vmem:[#allocation32_spill] sm:$0xff] }
 0x375   : > { %v3431_v37 = vsel %vm10232_vm2, %v3428_v39, %v3430_v23  ;;  %6105 = vrot.lane.b32.xlu1 %v10236_v13, %s9969_s14  ;;  %v5533_v39 = vunpack.i.h.bf16 %v10237_v49  ;;  %v5906_v24 = vpop.permute.xlu1 %5905  ;;  %vm3502_vm3 = vcmask 785408   ;;  %v5333_v53 = vunpack.i.h.bf16 %v10178_v14 }
 0x376   : > { %v6039_v7 = vpack.i.bf16 %v3431_v37, %v3429_v2  ;;  %v3278_v30 = vsel %vm2719_vm8, %v3271_v11, %v5352_v50  ;;  %v5908_v27 = vunpack.i.h.bf16 %v5906_v24  ;;  %v5907_v40 = vunpack.i.l.bf16 %v5906_v24 }
 0x377   : > { %v3279_v48 = vsel %vm2719_vm8, %v3272_v46, %v5353_v18  ;;  %vm3623_vm14 = vcmask 179200   ;;  %v2972_v28 = vsel %vm2971_vm0, %v2951_v4, %v5532_v31  ;;  %v2973_v36 = vsel %vm2971_vm0, %v2952_v54, %v5533_v39  ;;  %v10243_v4 = vld [vmem:[#allocation13_spill] sm:$0xff] }
 0x378   : > { %v5367_v34 = vunpack.i.l.bf16 %v10238_v29  ;;  %v3524_v25 = vpack.c.bf16 %v5908_v27, %v5907_v40  ;;  %v3503_v14 = vsel %vm3502_vm3, %v2972_v28, %v5907_v40  ;;  %v3504_v1 = vsel %vm3502_vm3, %v2973_v36, %v5908_v27 }
 0x379   : > { %6030 = vrot.lane.b32.xlu0 %v6029_v26, %s6272_s17  ;;  %6040 = vrot.lane.b32.xlu2 %v6039_v7, %s6272_s17  ;;  %v5372_v60 = vunpack.i.l.bf16 %v10239_v62  ;;  %v3298_v19 = vsel %vm2740_vm9, %v3278_v30, %v5333_v53  ;;  %v3523_v9 = vpack.c.bf16 %v3504_v1, %v3503_v14  ;;  %v5328_v55 = vunpack.i.h.bf16 %v10192_v3  ;;  %v5936_v7 = vpop.permute.xlu0 %5935 }
 0x37a   : > { %4876 = vmatmul.msk.bf16.vlgmr.msrb.gmra.mxu2 %vm3623_vm14, %v3524_v25  ;;  %v5378_v18 = vunpack.i.h.bf16 %v10240_v15  ;;  %v5377_v50 = vunpack.i.l.bf16 %v10240_v15  ;;  %v10242_v13 = vrot.slane %v10129_v35, 1  ;;  %v5358_v26 = vunpack.i.h.bf16 %v10199_v47 }
 0x37b   : > { %v3299_v58 = vsel %vm2740_vm9, %v3279_v48, %v5372_v60  ;;  %3666 = vmatmul.bf16.vlgmr.msrb.gmra.mxu1 %v3523_v9  ;;  %v3318_v2 = vsel %vm2761_vm10, %v3298_v19, %v5328_v55  ;;  %v5382_v54 = vunpack.i.l.bf16 %v10243_v4  ;;  %vm10244_vm5 = vcmask 343040   ;;  %v10248_v48 = vld [vmem:[#allocation36_spill] sm:$0xff] }
 0x37c   : > { %v3319_v37 = vsel %vm2761_vm10, %v3299_v58, %v5367_v34  ;;  %v3338_v46 = vsel %vm2782_vm11, %v3318_v2, %v5377_v50  ;;  %vm10245_vm12 = vmmov %vm10244_vm5  ;;  %v5363_v31 = vunpack.i.h.bf16 %v10206_v59  ;;  %vm10246_vm13 = vcmask 392192   ;;  %v5946_v53 = vpop.permute.xlu2 %5945  ;;  %v10249_v34 = vld [vmem:[#allocation41_spill] sm:$0xff] }
 0x37d   : > { %v8927_v11 = vpop.permute.xlu1 %5910  ;;  %v3339_v3 = vsel %vm2782_vm11, %v3319_v37, %v5378_v18  ;;  %v3358_v39 = vsel %vm10245_vm12, %v3338_v46, %v5358_v26  ;;  %vm10247_vm1 = vmmov %vm10246_vm13  ;;  %v5938_v28 = vunpack.i.h.bf16 %v5936_v7  ;;  %v5937_v36 = vunpack.i.l.bf16 %v5936_v7  ;;  %v10256_v18 = vld [vmem:[#allocation37_spill] sm:$0xff] }
 0x37e   : > { %v5912_v57 = vunpack.i.l.bf16 %v8927_v11  ;;  %v3359_v49 = vsel %vm10244_vm5, %v3339_v3, %v5382_v54  ;;  %v3378_v35 = vsel %vm10247_vm1, %v3358_v39, %v5363_v31  ;;  %vm10250_vm2 = vcmask 539648   ;;  %v10257_v50 = vld [vmem:[#allocation57_spill] sm:$0xff] }
 0x37f   : > { %vm10251_vm5 = vmmov %vm10250_vm2  ;;  %v3432_v14 = vrot.slane %v3378_v35, 1  ;;  %vm10252_vm12 = vcmask 588800   ;;  %vm10254_vm1 = vcmask 1046528   ;;  %v5948_v3 = vunpack.i.h.bf16 %v5946_v53 }
 0x380   : > { %v8943_v24 = vsel %vm10246_vm13, %v3359_v49, %v5912_v57  ;;  %vm10253_vm13 = vmmov %vm10252_vm12  ;;  %v5947_v57 = vunpack.i.l.bf16 %v5946_v53  ;;  %v10260_v49 = vld [vmem:[#allocation43_spill] sm:$0xff]  ;;  %v2551_v35 = vrot.slane %v10222_v17, 4 }
 0x381   : > { %6035 = vrot.lane.b32.xlu0 %v10241_v16, %s10005_s19  ;;  %3203 = vrot.lane.b32.xlu2 %v10242_v13, %s9997_s2  ;;  %v3434_v27 = vrot.slane %v8943_v24, 1  ;;  %vm10255_vm15 = vmmov %vm10254_vm1  ;;  %v6069_v16 = vpack.i.bf16 %v10257_v50, %v10256_v18 }
 0x382   : > { %v3433_v9 = vsel %vm10255_vm15, %v3430_v23, %v3432_v14  ;;  %vm10258_vm15 = vcmask 637952  }
 0x383   : > { %v3435_v19 = vsel %vm10254_vm1, %v3432_v14, %v3434_v27  ;;  %vm10277_vm1 = vcmask 343040  }
 0x385   : > { %v5926_v30 = vpop.permute.xlu1 %5925 }
 0x386   : > { %v5928_v40 = vunpack.i.h.bf16 %v5926_v30  ;;  %v5927_v47 = vunpack.i.l.bf16 %v5926_v30 }
 0x388   : > { %v2899_v59 = vsel %vm10250_vm2, %v8783_v51, %v5928_v40  ;;  %v2898_v25 = vsel %vm10251_vm5, %v8779_v8, %v5927_v47  ;;  %v6079_v51 = vpack.i.bf16 %v3435_v19, %v3433_v9  ;;  %vm10259_vm2 = vmmov %vm10258_vm15  ;;  %vm10262_vm5 = vcmask 1043456   ;;  %v10265_v9 = vld [vmem:[#allocation51_spill] sm:$0xff] }
 0x389   : > { %6045 = vrot.lane.b32.xlu0 %v10248_v48, %s9986_s1  ;;  %6065 = vrot.lane.b32.xlu2 %v10249_v34, %s9969_s14  ;;  %v2920_v1 = vsel %vm10252_vm12, %v2899_v59, %v5938_v28  ;;  %v2919_v60 = vsel %vm10253_vm13, %v2898_v25, %v5937_v36  ;;  %v2235_v34 = vrot.slane %v10223_v63, 4  ;;  %vm10264_vm12 = vmmov %vm10262_vm5 }
 0x38a   : > { %vm10275_vm13 = vmmov %vm10262_vm5 }
 0x38b   : > { %v2552_v25 = vsel %vm10262_vm5, %v2235_v34, %v2551_v35 }
 0x38d   : > { %v5961_v55 = vpop.permute.xlu2 %5960  ;;  %v8963_v58 = vpop.permute.xlu1 %5940 }
 0x38e   : > { %v5963_v2 = vunpack.i.h.bf16 %v5961_v55  ;;  %v5962_v37 = vunpack.i.l.bf16 %v5961_v55  ;;  %v10266_v55 = vld [vmem:[#allocation46_spill] sm:$0xff] }
 0x390   : > { %v3526_v8 = vpack.c.bf16 %v5963_v2, %v5962_v37  ;;  %v3505_v15 = vsel %vm3502_vm3, %v8021_v42, %v5962_v37  ;;  %v3506_v43 = vsel %vm3502_vm3, %v8024_v44, %v5963_v2  ;;  %v2940_v42 = vsel %vm10258_vm15, %v2919_v60, %v5947_v57  ;;  %v5951_v2 = vpop.permute.xlu0 %5950  ;;  %v10268_v37 = vld [vmem:[#allocation55_spill] sm:$0xff]  ;;  %vm10278_vm15 = vmmov %vm10277_vm1 }
 0x391   : > { %6055 = vrot.lane.b32.xlu0 %v10248_v48, %s9985_s0  ;;  %6080 = vrot.lane.b32.xlu2 %v6079_v51, %s6272_s17  ;;  %v3525_v23 = vpack.c.bf16 %v3506_v43, %v3505_v15  ;;  %v2941_v44 = vsel %vm10259_vm2, %v2920_v1, %v5948_v3  ;;  %v10261_v48 = vld [vmem:[#allocation50_spill] sm:$0xff]  ;;  %v10263_v1 = vrot.slane %v10170_v41, 4  ;;  %vm10279_vm2 = vcmask 392192  }
 0x392   : > { %4877 = vmatmul.msk.bf16.gmra.mxu2 %vm3623_vm14, %v3526_v8  ;;  %v10267_v41 = vld [vmem:[#allocation62_spill] sm:$0xff]  ;;  %v10269_v8 = vld [vmem:[#allocation60_spill] sm:$0xff]  ;;  %vm10280_vm5 = vmmov %vm10279_vm2 }
 0x393   : > { %3671 = vmatmul.bf16.gmra.mxu1 %v3525_v23  ;;  %v2236_v60 = vsel %vm10264_vm12, %v10263_v1, %v2235_v34  ;;  %vm10281_vm12 = vcmask 1046528  }
 0x394   : > { %v6124_v63 = vpack.i.bf16 %v2552_v25, %v2236_v60  ;;  %v6134_v18 = vpack.i.bf16 %v2235_v34, %v2236_v60 }
 0x395   : > { %v5966_v13 = vpop.permute.xlu2 %5965  ;;  %v8975_v46 = vpop.permute.xlu1 %5955 }
 0x396   : > { %v5968_v26 = vunpack.i.h.bf16 %v5966_v13  ;;  %v5967_v54 = vunpack.i.l.bf16 %v5966_v13  ;;  %v5958_v40 = vunpack.i.h.bf16 %v8975_v46  ;;  %v5957_v47 = vunpack.i.l.bf16 %v8975_v46 }
 0x398   : > { %v2961_v39 = vsel %vm2950_vm4, %v2940_v42, %v5967_v54  ;;  %v2962_v31 = vsel %vm2950_vm4, %v2941_v44, %v5968_v26  ;;  %v9046_v13 = vpop.permute.xlu0 %5970  ;;  %v5932_v26 = vunpack.i.l.bf16 %v8921_v10  ;;  %v10271_v42 = vld [vmem:[#allocation52_spill] sm:$0xff] }
 0x399   : > { %6070 = vrot.lane.b32.xlu0 %v6069_v16, %s9981_s22  ;;  %6095 = vrot.lane.b32.xlu2 %v10260_v49, %s9985_s0  ;;  %v2553_v44 = vrot.slane %v10271_v42, 4 }
 0x39b   : > { %v2554_v1 = vsel %vm10275_vm13, %v2551_v35, %v2553_v44  ;;  %v5373_v35 = vunpack.i.h.bf16 %v10239_v62  ;;  %vm10282_vm13 = vmmov %vm10281_vm12 }
 0x39d   : > { %v5976_v7 = vpop.permute.xlu1 %5975  ;;  %v9012_v19 = vpop.permute.xlu2 %5980 }
 0x39e   : > { %v5978_v53 = vunpack.i.h.bf16 %v5976_v7  ;;  %v5977_v30 = vunpack.i.l.bf16 %v5976_v7 }
 0x3a0   : > { %v2983_v28 = vsel %vm2971_vm0, %v2962_v31, %v5978_v53  ;;  %v2982_v36 = vsel %vm2971_vm0, %v2961_v39, %v5977_v30  ;;  %v10272_v39 = vld [vmem:[#allocation53_spill] sm:$0xff]  ;;  %v10273_v31 = vld [vmem:[#allocation58_spill] sm:$0xff]  ;;  %v5943_v53 = vunpack.i.h.bf16 %v8963_v58 }
 0x3a1   : > { %6085 = vrot.lane.b32.xlu0 %v10260_v49, %s9986_s1  ;;  %6110 = vrot.lane.b32.xlu2 %v10261_v48, %s9981_s22  ;;  %v8997_v59 = vsel %vm3502_vm3, %v2982_v36, %v5957_v47  ;;  %v9002_v17 = vsel %vm3502_vm3, %v2983_v28, %v5958_v40  ;;  %v10274_v7 = vpack.i.bf16 %v10272_v39, %v10273_v31 }
 0x3a2   : > { %v3533_v14 = vpack.c.bf16 %v9002_v17, %v8997_v59  ;;  %v3266_v48 = vsel %vm2677_vm6, %v10271_v42, %v5932_v26  ;;  %v5982_v42 = vunpack.i.l.bf16 %v9012_v19 }
 0x3a5   : > { %v9019_v51 = vpop.permute.xlu2 %6000  ;;  %v9049_v54 = vpop.permute.xlu1 %5995 }
 0x3a9   : > { %6100 = vrot.lane.b32.xlu0 %v10213_v52, %s10010_s23  ;;  %6125 = vrot.lane.b32.xlu2 %v6124_v63, %s9986_s1  ;;  %v10270_v52 = vpack.i.bf16 %v10268_v37, %v10269_v8  ;;  %v5952_v63 = vunpack.i.l.bf16 %v5951_v2  ;;  %v5953_v8 = vunpack.i.h.bf16 %v5951_v2  ;;  %v5368_v2 = vunpack.i.h.bf16 %v10238_v29 }
 0x3b1   : > { %6115 = vrot.lane.b32.xlu0 %v10265_v9, %s10005_s19  ;;  %2211 = vrot.lane.b32.xlu2 %v10266_v55, %s9936_s16 }
 0x3b9   : > { %6130 = vrot.lane.b32.xlu0 %v10267_v41, %s9980_s25  ;;  %6145 = vrot.lane.b32.xlu2 %v10270_v52, %s9969_s14 }
 0x3bb   : > { %v9027_v15 = vpop.permute.xlu2 %6015  ;;  %v1283_v3 = vpop.f32.mrf.mxu2 }
 0x3bc   : > { %v6018_v43 = vunpack.i.h.bf16 %v9027_v15  ;;  %v6017_v23 = vunpack.i.l.bf16 %v9027_v15 }
 0x3be   : > { %v9035_v50 = vsel %vm3502_vm3, %v8352_v20, %v6017_v23  ;;  %v9041_v16 = vsel %vm3502_vm3, %v8355_v22, %v6018_v43  ;;  %v5942_v20 = vunpack.i.l.bf16 %v8963_v58  ;;  %v5933_v22 = vunpack.i.h.bf16 %v8921_v10  ;;  %v10276_v10 = vld [vmem:[#allocation61_spill] sm:$0xff] }
 0x3bf   : > { %v3529_v57 = vpack.c.bf16 %v9041_v16, %v9035_v50  ;;  %v5998_v50 = vunpack.i.h.bf16 %v9049_v54 }
 0x3c0   : > { %v3273_v36 = vsel %vm2698_vm7, %v3266_v48, %v5942_v20  ;;  %v3267_v60 = vsel %vm2677_vm6, %v10276_v10, %v5933_v22  ;;  %v5997_v48 = vunpack.i.l.bf16 %v9049_v54 }
 0x3c1   : > { %6135 = vrot.lane.b32.xlu0 %v6134_v18, %s9985_s0  ;;  %v3274_v9 = vsel %vm2698_vm7, %v3267_v60, %v5943_v53  ;;  %v3280_v52 = vsel %vm2719_vm8, %v3273_v36, %v5952_v63  ;;  %v6164_v18 = vpack.i.bf16 %v2553_v44, %v2554_v1  ;;  %v5913_v36 = vunpack.i.h.bf16 %v8927_v11 }
 0x3c2   : > { %v3281_v20 = vsel %vm2719_vm8, %v3274_v9, %v5953_v8 }
 0x3c3   : > { %v1284_v49 = vpop.f32.mrf.mxu2  ;;  %v9059_v30 = vpop.permute.xlu2 %6020 }
 0x3c4   : > { %v9077_v49 = vpop.permute.xlu1 %6010 }
 0x3c8   : > { %v5986_v28 = vpop.permute.xlu0 %5985 }
 0x3c9   : > { %6150 = vrot.lane.b32.xlu0 %v10274_v7, %s9981_s22  ;;  %v5988_v34 = vunpack.i.h.bf16 %v5986_v28  ;;  %v5987_v25 = vunpack.i.l.bf16 %v5986_v28  ;;  %v5383_v7 = vunpack.i.h.bf16 %v10243_v4  ;;  %s6274_s22 = smov 16  }
 0x3cb   : > { %v3528_v55 = vpack.c.bf16 %v5988_v34, %v5987_v25  ;;  %v3507_v58 = vsel %vm3502_vm3, %v8200_v6, %v5987_v25  ;;  %v3508_v37 = vsel %vm3502_vm3, %v8203_v61, %v5988_v34  ;;  %v1286_v26 = vpop.f32.mrf.mxu2  ;;  %v5972_v6 = vunpack.i.l.bf16 %v9046_v13  ;;  %v3034_v22 = vpop.permute.xlu2 %3033 }
 0x3cc   : > { %v3527_v3 = vpack.c.bf16 %v3508_v37, %v3507_v58  ;;  %v3300_v61 = vsel %vm2740_vm9, %v3280_v52, %v5373_v35  ;;  %v6002_v34 = vunpack.i.l.bf16 %v9019_v51  ;;  %v9096_v58 = vpop.permute.xlu1 %6025  ;;  %v5973_v26 = vunpack.i.h.bf16 %v9046_v13 }
 0x3cd   : > { %4878 = vmatmul.msk.bf16.gmra.mxu2 %vm3623_vm14, %v3528_v55  ;;  %v3301_v62 = vsel %vm2740_vm9, %v3281_v20, %v5972_v6  ;;  %v3320_v28 = vsel %vm2761_vm10, %v3300_v61, %v5368_v2  ;;  %v6003_v61 = vunpack.i.h.bf16 %v9019_v51 }
 0x3ce   : > { %3676 = vmatmul.bf16.gmra.mxu1 %v3527_v3  ;;  %v3321_v53 = vsel %vm2761_vm10, %v3301_v62, %v5982_v42  ;;  %v10284_v42 = vld [vmem:[#allocation47_spill] sm:$0xff] }
 0x3d1   : > { %6165 = vrot.lane.b32.xlu0 %v6164_v18, %s9986_s1  ;;  %v3530_v18 = vpack.c.bf16 %v6018_v43, %v6017_v23  ;;  %v5983_v43 = vunpack.i.h.bf16 %v9012_v19  ;;  %s6212_s1 = scalar_lea.hbm %s9587_s11, 2 }
 0x3d3   : > { %v5991_v44 = vpop.permute.xlu0 %5990  ;;  %v1287_v63 = vpop.f32.mrf.mxu2 }
 0x3d4   : > { %v5993_v39 = vunpack.i.h.bf16 %v5991_v44  ;;  %v5992_v31 = vunpack.i.l.bf16 %v5991_v44  ;;  %v9106_v3 = vpop.permute.xlu2 %6040  ;;  %v3059_v20 = vpop.permute.xlu1 %3058 }
 0x3d6   : > { %v3340_v29 = vsel %vm2782_vm11, %v3320_v28, %v5992_v31  ;;  %v3341_v25 = vsel %vm2782_vm11, %v3321_v53, %v5993_v39 }
 0x3d7   : > { %v3360_v1 = vsel %vm10277_vm1, %v3340_v29, %v5383_v7  ;;  %v3361_v10 = vsel %vm10278_vm15, %v3341_v25, %v5997_v48  ;;  %vm10285_vm15 = vmmov %vm10279_vm2 }
 0x3d8   : > { %v3380_v4 = vsel %vm10279_vm2, %v3360_v1, %v5913_v36  ;;  %v3381_v60 = vsel %vm10280_vm5, %v3361_v10, %v6002_v34  ;;  %vm10286_vm2 = vmmov %vm10281_vm12  ;;  %vm10287_vm5 = vcmask 441344  }
 0x3d9   : > { %v3436_v9 = vrot.slane %v3380_v4, 1  ;;  %v3438_v55 = vrot.slane %v3381_v60, 1  ;;  %v10291_v4 = vld [vmem:[#allocation54_spill] sm:$0xff]  ;;  %v10292_v60 = vld [vmem:[#allocation59_spill] sm:$0xff] }
 0x3da   : > { %v10293_v63 = vpack.i.bf16 %v10291_v4, %v10292_v60 }
 0x3db   : > { %v6006_v11 = vpop.permute.xlu0 %6005  ;;  %v3437_v37 = vsel %vm10281_vm12, %v3434_v27, %v3436_v9  ;;  %v3439_v8 = vsel %vm10282_vm13, %v3436_v9, %v3438_v55  ;;  %v10283_v27 = vld [vmem:[#allocation63_spill] sm:$0xff]  ;;  %vm10288_vm12 = vmmov %vm10287_vm5  ;;  %vm10289_vm13 = vcmask 490496   ;;  %v6022_v9 = vunpack.i.l.bf16 %v9059_v30 }
 0x3dc   : > { %v6119_v52 = vpack.i.bf16 %v3439_v8, %v3437_v37  ;;  %v3204_v16 = vpop.permute.xlu2 %3203  ;;  %v6008_v53 = vunpack.i.h.bf16 %v6006_v11  ;;  %v6007_v48 = vunpack.i.l.bf16 %v6006_v11  ;;  %v6051_v25 = vpop.permute.xlu1 %6050  ;;  %v6028_v37 = vunpack.i.h.bf16 %v9096_v58 }
 0x3dd   : > { %4879 = vmatmul.msk.bf16.gmra.mxu2 %vm3623_vm14, %v3530_v18  ;;  %v6027_v8 = vunpack.i.l.bf16 %v9096_v58  ;;  %v6043_v58 = vunpack.i.h.bf16 %v9106_v3 }
 0x3de   : > { %6120 = vrot.lane.b32.xlu1 %v6119_v52, %s6272_s17  ;;  %3681 = vmatmul.bf16.gmra.mxu1 %v3529_v57  ;;  %v2858_v34 = vsel %vm10288_vm12, %v8671_v45, %v6007_v48  ;;  %v3534_v52 = vpack.c.bf16 %v5958_v40, %v5957_v47  ;;  %v10300_v47 = vld [vmem:[#allocation81_spill] sm:$0xff] }
 0x3e3   : > { %v3009_v24 = vpop.permute.xlu0 %3008 }
 0x3e4   : > { %v3268_v35 = vsel %vm2677_vm6, %v10283_v27, %v3009_v24 }
 0x3e5   : > { %v3275_v15 = vsel %vm2698_vm7, %v3268_v35, %v3034_v22 }
 0x3e6   : > { %v3282_v23 = vsel %vm2719_vm8, %v3275_v15, %v3059_v20  ;;  %2147 = vrot.lane.b32.xlu1 %v10284_v42, %s9998_s26  ;;  %v6052_v20 = vunpack.i.l.bf16 %v6051_v25  ;;  %v6042_v42 = vunpack.i.l.bf16 %v9106_v3 }
 0x3e7   : > { %v3302_v6 = vsel %vm2740_vm9, %v3282_v23, %v5973_v26  ;;  %v6053_v26 = vunpack.i.h.bf16 %v6051_v25  ;;  %v6061_v23 = vpop.permute.xlu1 %6060 }
 0x3e8   : > { %v3322_v57 = vsel %vm2761_vm10, %v3302_v6, %v5983_v43 }
 0x3e9   : > { %v3342_v13 = vsel %vm2782_vm11, %v3322_v57, %v3204_v16 }
 0x3ea   : > { %v3362_v2 = vsel %vm10277_vm1, %v3342_v13, %v5998_v50  ;;  %vm10290_vm1 = vmmov %vm10289_vm13 }
 0x3eb   : > { %v6031_v44 = vpop.permute.xlu0 %6030  ;;  %v3382_v19 = vsel %vm10285_vm15, %v3362_v2, %v6003_v61  ;;  %vm10294_vm15 = vcmask 539648  }
 0x3ec   : > { %v6033_v62 = vunpack.i.h.bf16 %v6031_v44  ;;  %v6032_v22 = vunpack.i.l.bf16 %v6031_v44  ;;  %v3440_v39 = vrot.slane %v3382_v19, 1  ;;  %v6066_v19 = vpop.permute.xlu2 %6065 }
 0x3ed   : > { %v6067_v48 = vunpack.i.l.bf16 %v6066_v19 }
 0x3ee   : > { %v3532_v31 = vpack.c.bf16 %v6033_v62, %v6032_v22  ;;  %6140 = vrot.lane.b32.xlu1 %v10267_v41, %s10010_s23  ;;  %v3441_v54 = vsel %vm10286_vm2, %v3438_v55, %v3440_v39  ;;  %v3511_v7 = vsel %vm3502_vm3, %v8564_v32, %v6032_v22  ;;  %v3512_v51 = vsel %vm3502_vm3, %v8567_v0, %v6033_v62  ;;  %vm10295_vm2 = vmmov %vm10294_vm15  ;;  %s6273_s23 = smov 64  }
 0x3ef   : > { %v6159_v28 = vpack.i.bf16 %v3440_v39, %v3441_v54  ;;  %v3531_v36 = vpack.c.bf16 %v3512_v51, %v3511_v7  ;;  %v2859_v41 = vsel %vm10287_vm5, %v8720_v21, %v6008_v53  ;;  %v6013_v32 = vunpack.i.h.bf16 %v9077_v49  ;;  %v6076_v44 = vpop.permute.xlu1 %6075 }
 0x3f0   : > { %4880 = vmatmul.msk.bf16.gmra.mxu2 %vm3623_vm14, %v3532_v31  ;;  %v6012_v0 = vunpack.i.l.bf16 %v9077_v49  ;;  %v6023_v21 = vunpack.i.h.bf16 %v9059_v30  ;;  %vm10296_vm5 = vcmask 588800   ;;  %v6063_v31 = vunpack.i.h.bf16 %v6061_v23 }
 0x3f1   : > { %6160 = vrot.lane.b32.xlu2 %v6159_v28, %s6272_s17  ;;  %3686 = vmatmul.bf16.gmra.mxu1 %v3531_v36  ;;  %v2880_v10 = vsel %vm10290_vm1, %v2859_v41, %v6013_v32  ;;  %vm10297_vm12 = vmmov %vm10296_vm5  ;;  %v6062_v54 = vunpack.i.l.bf16 %v6061_v23  ;;  %v3536_v7 = vpack.c.bf16 %v6043_v58, %v6042_v42  ;;  %v6068_v53 = vunpack.i.h.bf16 %v6066_v19 }
 0x3f2   : > { %v2879_v1 = vsel %vm10289_vm13, %v2858_v34, %v6012_v0  ;;  %v2901_v49 = vsel %vm10295_vm2, %v2880_v10, %v6023_v21  ;;  %vm10298_vm13 = vcmask 637952   ;;  %v6078_v34 = vunpack.i.h.bf16 %v6076_v44 }
 0x3f3   : > { %v6036_v29 = vpop.permute.xlu0 %6035  ;;  %v2900_v11 = vsel %vm10294_vm15, %v2879_v1, %v6022_v9  ;;  %v2922_v30 = vsel %vm10297_vm12, %v2901_v49, %v6028_v37  ;;  %vm10299_vm1 = vmmov %vm10298_vm13  ;;  %vm10301_vm15 = vcmask 441344  }
 0x3f4   : > { %v6038_v45 = vunpack.i.h.bf16 %v6036_v29  ;;  %v6037_v55 = vunpack.i.l.bf16 %v6036_v29  ;;  %v2921_v24 = vsel %vm10296_vm5, %v2900_v11, %v6027_v8  ;;  %vm10302_vm2 = vmmov %vm10301_vm15  ;;  %vm10303_vm5 = vcmask 490496   ;;  %v6081_v32 = vpop.permute.xlu2 %6080 }
 0x3f5   : > { %vm10304_vm12 = vmmov %vm10303_vm5  ;;  %v6077_v29 = vunpack.i.l.bf16 %v6076_v44  ;;  %v6083_v21 = vunpack.i.h.bf16 %v6081_v32  ;;  %v6082_v9 = vunpack.i.l.bf16 %v6081_v32 }
 0x3f6   : > { %6155 = vrot.lane.b32.xlu1 %v10293_v63, %s10005_s19  ;;  %v2942_v15 = vsel %vm10298_vm13, %v2921_v24, %v6037_v55  ;;  %v2943_v43 = vsel %vm10299_vm1, %v2922_v30, %v6038_v45  ;;  %vm10305_vm13 = vcmask 539648  }
 0x3f7   : > { %vm10306_vm1 = vmmov %vm10305_vm13 }
 0x3f8   : > { %v9197_v24 = vpop.f32.mrf.mxu1 }
 0x3fb   : > { %v6046_v18 = vpop.permute.xlu0 %6045 }
 0x3fc   : > { %v6048_v27 = vunpack.i.h.bf16 %v6046_v18  ;;  %v6047_v35 = vunpack.i.l.bf16 %v6046_v18  ;;  %v3538_v18 = vpack.c.bf16 %v6083_v21, %v6082_v9  ;;  %v6096_v30 = vpop.permute.xlu2 %6095 }
 0x3fe   : > { %v2963_v46 = vsel %vm2950_vm4, %v2942_v15, %v6047_v35  ;;  %v2964_v40 = vsel %vm2950_vm4, %v2943_v43, %v6048_v27  ;;  %6170 = vrot.lane.b32.xlu1 %v10300_v47, %s9980_s25  ;;  %v9199_v27 = vpop.f32.mrf.mxu2 }
 0x3ff   : > { %v2984_v6 = vsel %vm2971_vm0, %v2963_v46, %v6052_v20  ;;  %v2985_v50 = vsel %vm2971_vm0, %v2964_v40, %v6053_v26  ;;  %v6098_v46 = vunpack.i.h.bf16 %v6096_v30  ;;  %v6097_v40 = vunpack.i.l.bf16 %v6096_v30 }
 0x400   : > { %4881 = vmatmul.msk.bf16.gmra.mxu2 %vm3623_vm14, %v3534_v52  ;;  %v3515_v16 = vsel %vm3502_vm3, %v2984_v6, %v6042_v42  ;;  %v3516_v57 = vsel %vm3502_vm3, %v2985_v50, %v6043_v58  ;;  %v3669_v35 = vpop.f32.mrf.mxu1 }
 0x401   : > { %3691 = vmatmul.bf16.gmra.mxu1 %v3533_v14  ;;  %v3535_v3 = vpack.c.bf16 %v3516_v57, %v3515_v16  ;;  %v10312_v57 = vld [vmem:[#allocation21_spill] sm:$0xff] }
 0x403   : > { %v6056_v61 = vpop.permute.xlu0 %6055 }
 0x404   : > { %v6058_v13 = vunpack.i.h.bf16 %v6056_v61  ;;  %v6057_v2 = vunpack.i.l.bf16 %v6056_v61  ;;  %v6111_v26 = vpop.permute.xlu2 %6110 }
 0x406   : > { %v2861_v62 = vsel %vm10301_vm15, %v8639_v12, %v6058_v13  ;;  %v2860_v22 = vsel %vm10302_vm2, %v8644_v56, %v6057_v2  ;;  %v6091_v56 = vpop.permute.xlu1 %6090  ;;  %vm10307_vm15 = vcmask 588800   ;;  %v3728_v15 = vpop.f32.mrf.mxu2  ;;  %v9208_v13 = vld [vmem:[%s9580_s4] ss:$0 sm:$0xff] }
 0x407   : > { %v2882_v51 = vsel %vm10303_vm5, %v2861_v62, %v6063_v31  ;;  %v2881_v59 = vsel %vm10304_vm12, %v2860_v22, %v6062_v54  ;;  %vm10308_vm2 = vmmov %vm10307_vm15  ;;  %v6093_v10 = vunpack.i.h.bf16 %v6091_v56  ;;  %v6092_v4 = vunpack.i.l.bf16 %v6091_v56 }
 0x408   : > { %v2902_v28 = vsel %vm10305_vm13, %v2881_v59, %v6067_v48  ;;  %v2903_v12 = vsel %vm10306_vm1, %v2882_v51, %v6068_v53  ;;  %vm10309_vm5 = vcmask 637952   ;;  %vm10311_vm13 = vcmask 441344  }
 0x409   : > { %vm10310_vm12 = vmmov %vm10309_vm5  ;;  %v2863_v16 = vsel %vm10311_vm13, %v8070_v5, %v6098_v46  ;;  %v6113_v51 = vunpack.i.h.bf16 %v6111_v26  ;;  %v6112_v59 = vunpack.i.l.bf16 %v6111_v26 }
 0x40a   : > { %vm10313_vm1 = vmmov %vm10311_vm13  ;;  %vm10318_vm13 = vcmask 588800  }
 0x40b   : > { %v6071_v39 = vpop.permute.xlu0 %6070 }
 0x40c   : > { %v6073_v17 = vunpack.i.h.bf16 %v6071_v39  ;;  %v6072_v14 = vunpack.i.l.bf16 %v6071_v39  ;;  %v6126_v23 = vpop.permute.xlu2 %6125 }
 0x40e   : > { %v2923_v36 = vsel %vm10307_vm15, %v2902_v28, %v6072_v14  ;;  %v2924_v41 = vsel %vm10308_vm2, %v2903_v12, %v6073_v17  ;;  %v6106_v50 = vpop.permute.xlu1 %6105  ;;  %vm10314_vm15 = vcmask 490496   ;;  %v3670_v17 = vadd.f32 %v9208_v13, %v3669_v35  ;;  %v10324_v35 = vld [vmem:[#allocation35_spill] sm:$0xff] }
 0x40f   : > { %v2944_v60 = vsel %vm10309_vm5, %v2923_v36, %v6077_v29  ;;  %v2945_v63 = vsel %vm10310_vm12, %v2924_v41, %v6078_v34  ;;  %vm10315_vm2 = vmmov %vm10314_vm15  ;;  %v6108_v19 = vunpack.i.h.bf16 %v6106_v50  ;;  %v6107_v62 = vunpack.i.l.bf16 %v6106_v50 }
 0x410   : > { %4882 = vmatmul.msk.bf16.gmra.mxu2 %vm3623_vm14, %v3536_v7  ;;  %v3672_v43 = vpop.f32.mrf.mxu1  ;;  %vm10316_vm5 = vcmask 539648   ;;  %v3729_v28 = vadd.f32 %v3728_v15, %v3670_v17 }
 0x411   : > { %3696 = vmatmul.bf16.gmra.mxu1 %v3535_v3  ;;  %v2862_v3 = vsel %vm10313_vm1, %v10312_v57, %v6097_v40  ;;  %v3673_v22 = vadd.f32 %v9208_v13, %v3672_v43  ;;  %vm10317_vm12 = vmmov %vm10316_vm5 }
 0x412   : > { %vm10319_vm1 = vmmov %vm10318_vm13 }
 0x413   : > { %v6086_v0 = vpop.permute.xlu0 %6085 }
 0x414   : > { %v6088_v25 = vunpack.i.h.bf16 %v6086_v0  ;;  %v6087_v1 = vunpack.i.l.bf16 %v6086_v0  ;;  %v9213_v39 = vpop.permute.xlu2 %2211 }
 0x415   : > { %v3731_v58 = vpop.f32.mrf.mxu2 }
 0x416   : > { %v2965_v45 = vsel %vm2950_vm4, %v2944_v60, %v6087_v1  ;;  %v2966_v55 = vsel %vm2950_vm4, %v2945_v63, %v6088_v25  ;;  %v9218_v48 = vadd.f32 %v3731_v58, %v3673_v22  ;;  %v10322_v25 = vld [vmem:[#allocation89_spill] sm:$0xff] }
 0x417   : > { %v2986_v11 = vsel %vm2971_vm0, %v2965_v45, %v6092_v4  ;;  %v2987_v49 = vsel %vm2971_vm0, %v2966_v55, %v6093_v10  ;;  %v5258_v1 = vunpack.i.h.bf16 %v10322_v25  ;;  %v6128_v10 = vunpack.i.h.bf16 %v6126_v23  ;;  %v10323_v60 = vld [vmem:[#allocation85_spill] sm:$0xff] }
 0x418   : > { %v3517_v37 = vsel %vm3502_vm3, %v2986_v11, %v6082_v9  ;;  %v3518_v8 = vsel %vm3502_vm3, %v2987_v49, %v6083_v21  ;;  %v3674_v61 = vpop.f32.mrf.mxu1  ;;  %v6127_v4 = vunpack.i.l.bf16 %v6126_v23  ;;  %v5263_v63 = vunpack.i.h.bf16 %v10323_v60 }
 0x419   : > { %v3537_v52 = vpack.c.bf16 %v3518_v8, %v3517_v37  ;;  %v3675_v12 = vadd.f32 %v9208_v13, %v3674_v61  ;;  %v3778_v21 = vmax.f32 %v9218_v48, 0.0  ;;  %v3777_v8 = vmax.f32 %v3729_v28, 0.0 }
 0x41a   : > { %v2697_v26 = vsel %vm2677_vm6, %v10324_v35, %v5258_v1  ;;  %vm10327_vm6 = vcmask 1046528  }
 0x41b   : > { %v6101_v20 = vpop.permute.xlu0 %6100  ;;  %v2718_v50 = vsel %vm2698_vm7, %v2697_v26, %v5263_v63  ;;  %vm10328_vm7 = vmmov %vm10327_vm6 }
 0x41c   : > { %v6103_v47 = vunpack.i.h.bf16 %v6101_v20  ;;  %v6102_v6 = vunpack.i.l.bf16 %v6101_v20  ;;  %v6146_v58 = vpop.permute.xlu2 %6145 }
 0x41d   : > { %v3733_v14 = vpop.f32.mrf.mxu2  ;;  %v6148_v26 = vunpack.i.h.bf16 %v6146_v58 }
 0x41e   : > { %v2883_v2 = vsel %vm10314_vm15, %v2862_v3, %v6102_v6  ;;  %v2884_v44 = vsel %vm10315_vm2, %v2863_v16, %v6103_v47  ;;  %vm10320_vm15 = vcmask 637952   ;;  %v3734_v9 = vadd.f32 %v3733_v14, %v3675_v12  ;;  %v5122_v6 = vld [vmem:[%s9581_s5 + $0x38] sm:$0xff] }
 0x41f   : > { %v2904_v5 = vsel %vm10316_vm5, %v2883_v2, %v6107_v62  ;;  %v2905_v31 = vsel %vm10317_vm12, %v2884_v44, %v6108_v19  ;;  %vm10321_vm2 = vmmov %vm10320_vm15  ;;  %v10325_v16 = vld [vmem:[#allocation92_spill] sm:$0xff]  ;;  %v9249_v3 = vrot.slane %v3777_v8, 1  ;;  %4234 = vmatpush.bf16.msrb.mxu3 %v5122_v6  ;;  %vm10335_vm5 = vcmask 490496  }
 0x420   : > { %4883 = vmatmul.msk.bf16.gmra.mxu2 %vm3623_vm14, %v3538_v18  ;;  %v2925_v56 = vsel %vm10318_vm13, %v2904_v5, %v6112_v59  ;;  %v2926_v36 = vsel %vm10319_vm1, %v2905_v31, %v6113_v51  ;;  %v3779_v46 = vmax.f32 %v3734_v9, 0.0  ;;  %v5273_v57 = vunpack.i.h.bf16 %v10325_v16  ;;  %v10326_v44 = vld [vmem:[#allocation88_spill] sm:$0xff]  ;;  %vm10336_vm12 = vmmov %vm10335_vm5 }
 0x421   : > { %3701 = vmatmul.bf16.gmra.mxu1 %v3537_v52  ;;  %v5268_v19 = vunpack.i.h.bf16 %v10326_v44 }
 0x422   : > { %v9256_v22 = vrot.slane %v3779_v46, 1 }
 0x423   : > { %v6116_v42 = vpop.permute.xlu0 %6115 }
 0x424   : > { %v6118_v54 = vunpack.i.h.bf16 %v6116_v42  ;;  %v6117_v7 = vunpack.i.l.bf16 %v6116_v42  ;;  %v9239_v42 = vrot.slane %v3778_v21, 1 }
 0x426   : > { %v2946_v41 = vsel %vm10320_vm15, %v2925_v56, %v6117_v7  ;;  %v2947_v34 = vsel %vm10321_vm2, %v2926_v36, %v6118_v54  ;;  %v3820_v62 = vsel %vm10327_vm6, %v9249_v3, %v9239_v42  ;;  %v2739_v54 = vsel %vm2719_vm8, %v2718_v50, %v5268_v19  ;;  %v10329_v36 = vld [vmem:[#allocation90_spill] sm:$0xff]  ;;  %vm10339_vm15 = vmmov %vm10319_vm1 }
 0x427   : > { %v2967_v55 = vsel %vm2950_vm4, %v2946_v41, %v6127_v4  ;;  %v2968_v11 = vsel %vm2950_vm4, %v2947_v34, %v6128_v10  ;;  %v2760_v51 = vsel %vm2740_vm9, %v2739_v54, %v5273_v57  ;;  %v3876_v17 = vmax.f32 %v3777_v8, %v3820_v62  ;;  %vm10340_vm6 = vmmov %vm10321_vm2 }
 0x428   : > { %v2781_v12 = vsel %vm2761_vm10, %v2760_v51, %v5288_v38  ;;  %v5293_v41 = vunpack.i.h.bf16 %v10329_v36  ;;  %vm10330_vm8 = vcmask 343040   ;;  %vm10331_vm9 = vcmask 392192  }
 0x429   : > { %vm10333_vm10 = vcmask 441344  }
 0x42b   : > { %v6131_v53 = vpop.permute.xlu0 %6130 }
 0x42c   : > { %v6133_v29 = vunpack.i.h.bf16 %v6131_v53  ;;  %v6132_v32 = vunpack.i.l.bf16 %v6131_v53 }
 0x42e   : > { %v2988_v52 = vsel %vm2971_vm0, %v2967_v55, %v6132_v32  ;;  %v2989_v18 = vsel %vm2971_vm0, %v2968_v11, %v6133_v29  ;;  %v10332_v55 = vld [vmem:[#allocation15_spill] sm:$0xff] }
 0x433   : > { %v6136_v7 = vpop.permute.xlu0 %6135 }
 0x434   : > { %v6137_v10 = vunpack.i.l.bf16 %v6136_v7 }
 0x436   : > { %v2864_v11 = vsel %vm10333_vm10, %v10332_v55, %v6137_v10 }
 0x43b   : > { %v6151_v33 = vpop.permute.xlu0 %6150 }
 0x43c   : > { %v6153_v6 = vunpack.i.h.bf16 %v6151_v33  ;;  %v6152_v50 = vunpack.i.l.bf16 %v6151_v33 }
 0x443   : > { %v6166_v44 = vpop.permute.xlu0 %6165 }
 0x44b   : > { %v3677_v0 = vpop.f32.mrf.mxu1  ;;  %v9267_v28 = vpop.permute.xlu2 %6160 }
 0x44c   : > { %v3678_v30 = vadd.f32 %v9208_v13, %v3677_v0  ;;  %v6163_v29 = vunpack.i.h.bf16 %v9267_v28  ;;  %v6162_v32 = vunpack.i.l.bf16 %v9267_v28  ;;  %v2802_v0 = vsel %vm2782_vm11, %v2781_v12, %v5293_v41  ;;  %vm10334_vm11 = vmmov %vm10333_vm10 }
 0x44e   : > { %v3542_v38 = vpack.c.bf16 %v6163_v29, %v6162_v32 }
 0x450   : > { %v6121_v45 = vpop.permute.xlu1 %6120  ;;  %v3736_v15 = vpop.f32.mrf.mxu2 }
 0x451   : > { %v6123_v49 = vunpack.i.h.bf16 %v6121_v45  ;;  %v6122_v37 = vunpack.i.l.bf16 %v6121_v45  ;;  %v9241_v40 = vadd.f32 %v3736_v15, %v3678_v30  ;;  %v6138_v45 = vunpack.i.h.bf16 %v6136_v7 }
 0x453   : > { %v3540_v20 = vpack.c.bf16 %v6123_v49, %v6122_v37  ;;  %v3519_v43 = vsel %vm3502_vm3, %v2988_v52, %v6122_v37  ;;  %v3520_v23 = vsel %vm3502_vm3, %v2989_v18, %v6123_v49  ;;  %v3780_v61 = vmax.f32 %v9241_v40, 0.0  ;;  %v3679_v2 = vpop.f32.mrf.mxu1 }
 0x454   : > { %v3539_v47 = vpack.c.bf16 %v3520_v23, %v3519_v43  ;;  %v3668_v37 = vadd.f32 %v9208_v13, %v9197_v24  ;;  %v6147_v18 = vunpack.i.l.bf16 %v6146_v58  ;;  %v3680_v16 = vadd.f32 %v9208_v13, %v3679_v2 }
 0x455   : > { %4884 = vmatmul.msk.bf16.gmra.mxu2 %vm3623_vm14, %v3540_v20  ;;  %v9260_v5 = vrot.slane %v3780_v61, 1 }
 0x456   : > { %3706 = vmatmul.bf16.gmra.mxu1 %v3539_v47 }
 0x457   : > { %v3824_v59 = vsel %vm10328_vm7, %v9256_v22, %v9260_v5 }
 0x458   : > { %v2148_v31 = vpop.permute.xlu1 %2147  ;;  %v3878_v14 = vmax.f32 %v3779_v46, %v3824_v59  ;;  %v3738_v53 = vpop.f32.mrf.mxu2  ;;  %v6168_v59 = vunpack.i.h.bf16 %v6166_v44 }
 0x459   : > { %v2823_v1 = vsel %vm10330_vm8, %v2802_v0, %v2148_v31  ;;  %v3739_v19 = vadd.f32 %v3738_v53, %v3680_v16  ;;  %v3822_v53 = vsel %vm10328_vm7, %v9239_v42, %v9256_v22  ;;  %vm10341_vm8 = vmmov %vm10328_vm7 }
 0x45a   : > { %v3896_v56 = vmax.f32 %v3876_v17, %v3878_v14  ;;  %v2844_v63 = vsel %vm10331_vm9, %v2823_v1, %v9213_v39  ;;  %v3727_v39 = vadd.f32 %v9199_v27, %v3668_v37  ;;  %v6167_v17 = vunpack.i.l.bf16 %v6166_v44 }
 0x45b   : > { %v3682_v34 = vpop.f32.mrf.mxu1  ;;  %v2865_v8 = vsel %vm10334_vm11, %v2844_v63, %v6138_v45  ;;  %v3781_v41 = vmax.f32 %v3739_v19, 0.0  ;;  %v5121_v45 = vld [vmem:[%s9581_s5 + $0x30] sm:$0xff] }
 0x45c   : > { %3919 = vrot.lane.b32.xlu2 %v3896_v56, %s6273_s23  ;;  %v3683_v20 = vadd.f32 %v9208_v13, %v3682_v34  ;;  %v3776_v57 = vmax.f32 %v3727_v39, 0.0  ;;  %4235 = vmatpush.bf16.msrb.mxu3 %v5121_v45 }
 0x45d   : > { %v3825_v55 = vrot.slane %v3781_v41, 1 }
 0x45e   : > { %v3816_v2 = vrot.slane %v3776_v57, 1 }
 0x460   : > { %v6141_v25 = vpop.permute.xlu1 %6140  ;;  %v3741_v60 = vpop.f32.mrf.mxu2  ;;  %v3818_v1 = vsel %vm10341_vm8, %v3816_v2, %v9249_v3 }
 0x461   : > { %v6142_v4 = vunpack.i.l.bf16 %v6141_v25  ;;  %v6143_v9 = vunpack.i.h.bf16 %v6141_v25  ;;  %v3742_v23 = vadd.f32 %v3741_v60, %v3683_v20  ;;  %v3875_v37 = vmax.f32 %v3776_v57, %v3818_v1 }
 0x463   : > { %v3684_v49 = vpop.f32.mrf.mxu1  ;;  %v2885_v52 = vsel %vm10335_vm5, %v2864_v11, %v6142_v4  ;;  %v2886_v30 = vsel %vm10336_vm12, %v2865_v8, %v6143_v9  ;;  %v3782_v54 = vmax.f32 %v3742_v23, 0.0  ;;  %v3877_v9 = vmax.f32 %v3778_v21, %v3822_v53  ;;  %v5120_v53 = vld [vmem:[%s9581_s5 + $0x28] sm:$0xff] }
 0x464   : > { %v3685_v27 = vadd.f32 %v9208_v13, %v3684_v49  ;;  %4236 = vmatpush.bf16.msrb.mxu3 %v5120_v53  ;;  %v5103_v53 = vld [vmem:[%s6402_s29 + $0x1f8] sm:$0xff] }
 0x465   : > { %4885 = vmatmul.msk.bf16.gmra.mxu2 %vm3623_vm14, %v3542_v38  ;;  %vm10337_vm14 = vcmask 539648   ;;  %v3827_v10 = vrot.slane %v3782_v54, 1 }
 0x466   : > { %v2906_v15 = vsel %vm10337_vm14, %v2885_v52, %v6147_v18  ;;  %vm10338_vm13 = vmmov %vm10337_vm14  ;;  %v9324_v52 = vmax.f32 %v3875_v37, %v3877_v9 }
 0x467   : > { %v2907_v43 = vsel %vm10338_vm13, %v2886_v30, %v6148_v26  ;;  %v2927_v58 = vsel %vm10319_vm1, %v2906_v15, %v6152_v50 }
 0x468   : > { %v6156_v35 = vpop.permute.xlu1 %6155  ;;  %v3743_v47 = vpop.f32.mrf.mxu2  ;;  %v2928_v62 = vsel %vm10339_vm15, %v2907_v43, %v6153_v6  ;;  %v3906_v39 = vrot.slane %v9324_v52, 2  ;;  %v3914_v1 = vrot.slane %v9324_v52, 6 }
 0x469   : > { %v6158_v46 = vunpack.i.h.bf16 %v6156_v35  ;;  %v6157_v24 = vunpack.i.l.bf16 %v6156_v35  ;;  %v3744_v14 = vadd.f32 %v3743_v47, %v3685_v27 }
 0x46b   : > { %v2948_v7 = vsel %vm10321_vm2, %v2927_v58, %v6157_v24  ;;  %v2949_v51 = vsel %vm10340_vm6, %v2928_v62, %v6158_v46  ;;  %v3783_v60 = vmax.f32 %v3744_v14, 0.0 }
 0x46c   : > { %v2969_v0 = vsel %vm2950_vm4, %v2948_v7, %v6167_v17  ;;  %v2970_v25 = vsel %vm2950_vm4, %v2949_v51, %v6168_v59 }
 0x46d   : > { %v3829_v8 = vrot.slane %v3783_v60, 1 }
 0x46e   : > { %v3687_v31 = vpop.f32.mrf.mxu1 }
 0x46f   : > { %v3688_v34 = vadd.f32 %v9208_v13, %v3687_v31 }
 0x470   : > { %v6171_v12 = vpop.permute.xlu1 %6170 }
 0x471   : > { %v6173_v56 = vunpack.i.h.bf16 %v6171_v12  ;;  %v6172_v36 = vunpack.i.l.bf16 %v6171_v12 }
 0x473   : > { %v2990_v33 = vsel %vm2971_vm0, %v2969_v0, %v6172_v36  ;;  %v2991_v38 = vsel %vm2971_vm0, %v2970_v25, %v6173_v56  ;;  %v3746_v4 = vpop.f32.mrf.mxu2  ;;  %vm10342_vm0 = vmmov %vm10328_vm7  ;;  %vm10354_vm7 = vcmask 203776  }
 0x474   : > { %v3747_v42 = vadd.f32 %v3746_v4, %v3688_v34  ;;  %v3521_v22 = vsel %vm3502_vm3, %v2990_v33, %v6162_v32  ;;  %v3522_v63 = vsel %vm3502_vm3, %v2991_v38, %v6163_v29  ;;  %v3828_v32 = vsel %vm10342_vm0, %v3825_v55, %v3827_v10  ;;  %vm10343_vm9 = vmmov %vm10342_vm0 }
 0x475   : > { %v3541_v3 = vpack.c.bf16 %v3522_v63, %v3521_v22  ;;  %v3880_v21 = vmax.f32 %v3781_v41, %v3828_v32  ;;  %vm10344_vm10 = vmmov %vm10342_vm0  ;;  %v3910_v41 = vrot.slane %v9324_v52, 4 }
 0x476   : > { %v3784_v11 = vmax.f32 %v3747_v42, 0.0  ;;  %v3689_v49 = vpop.f32.mrf.mxu1  ;;  %v3830_v30 = vsel %vm10344_vm10, %v3827_v10, %v3829_v8  ;;  %vm10345_vm11 = vmmov %vm10342_vm0 }
 0x477   : > { %3711 = vmatmul.bf16.gmra.mxu1 %v3541_v3  ;;  %v3826_v26 = vsel %vm10345_vm11, %v9260_v5, %v3825_v55  ;;  %v3881_v15 = vmax.f32 %v3782_v54, %v3830_v30  ;;  %v3690_v46 = vadd.f32 %v9208_v13, %v3689_v49  ;;  %vm10346_vm5 = vmmov %vm10342_vm0  ;;  %vm3964_vm11 = vcmask 130048  }
 0x478   : > { %v3831_v28 = vrot.slane %v3784_v11, 1  ;;  %v3879_v23 = vmax.f32 %v3780_v61, %v3826_v26  ;;  %vm10347_vm12 = vmmov %vm10342_vm0 }
 0x479   : > { %vm10348_vm14 = vmmov %vm10342_vm0 }
 0x47a   : > { %v3832_v48 = vsel %vm10343_vm9, %v3829_v8, %v3831_v28  ;;  %v9335_v24 = vmax.f32 %v3879_v23, %v3881_v15  ;;  %vm10349_vm13 = vmmov %vm10342_vm0 }
 0x47b   : > { %v3882_v29 = vmax.f32 %v3783_v60, %v3832_v48  ;;  %v3748_v18 = vpop.f32.mrf.mxu2  ;;  %v5119_v60 = vld [vmem:[%s9581_s5 + $0x20] sm:$0xff]  ;;  %vm10350_vm1 = vmmov %vm10342_vm0 }
 0x47c   : > { %v3749_v6 = vadd.f32 %v3748_v18, %v3690_v46  ;;  %v3930_v5 = vrot.slane %v9335_v24, 4  ;;  %4237 = vmatpush.bf16.msrb.mxu3 %v5119_v60  ;;  %v3926_v55 = vrot.slane %v9335_v24, 2  ;;  %vm10351_vm15 = vmmov %vm10342_vm0 }
 0x47d   : > { %v3898_v35 = vmax.f32 %v3880_v21, %v3882_v29  ;;  %vm10352_vm2 = vmmov %vm10342_vm0 }
 0x47e   : > { %v3692_v20 = vpop.f32.mrf.mxu1  ;;  %v3785_v57 = vmax.f32 %v3749_v6, 0.0  ;;  %vm10353_vm6 = vmmov %vm10342_vm0 }
 0x47f   : > { %v6174_v43 = vpack.i.bf16 %v3898_v35, %v3906_v39  ;;  %v3693_v50 = vadd.f32 %v9208_v13, %v3692_v20  ;;  %vm10355_vm8 = vmmov %vm10354_vm7 }
 0x480   : > { %v3833_v19 = vrot.slane %v3785_v57, 1  ;;  %vm10356_vm9 = vmmov %vm10342_vm0 }
 0x481   : > { %6175 = vrot.lane.b32.xlu2 %v6174_v43, %s6274_s22  ;;  %vm10357_vm10 = vmmov %vm10342_vm0 }
 0x482   : > { %v3834_v54 = vsel %vm10346_vm5, %v3831_v28, %v3833_v19  ;;  %vm3966_vm5 = vcmask 261120  }
 0x483   : > { %v3751_v47 = vpop.f32.mrf.mxu2  ;;  %v3883_v14 = vmax.f32 %v3784_v11, %v3834_v54 }
 0x484   : > { %v3752_v44 = vadd.f32 %v3751_v47, %v3693_v50 }
 0x486   : > { %v3694_v16 = vpop.f32.mrf.mxu1  ;;  %v3786_v27 = vmax.f32 %v3752_v44, 0.0 }
 0x487   : > { %v3695_v40 = vadd.f32 %v9208_v13, %v3694_v16 }
 0x488   : > { %v3835_v7 = vrot.slane %v3786_v27, 1 }
 0x489   : > { %3931 = vrot.lane.b32.xlu2 %v3930_v5, %s6275_s24 }
 0x48a   : > { %v3836_v33 = vsel %vm10348_vm14, %v3833_v19, %v3835_v7  ;;  %vm10358_vm14 = vcmask 392192  }
 0x48b   : > { %v3753_v61 = vpop.f32.mrf.mxu2  ;;  %v3884_v22 = vmax.f32 %v3785_v57, %v3836_v33  ;;  %v5118_v57 = vld [vmem:[%s9581_s5 + $0x18] sm:$0xff] }
 0x48c   : > { %v3754_v58 = vadd.f32 %v3753_v61, %v3695_v40  ;;  %4238 = vmatpush.bf16.msrb.mxu3 %v5118_v57 }
 0x48e   : > { %v3787_v62 = vmax.f32 %v3754_v58, 0.0  ;;  %v3697_v31 = vpop.f32.mrf.mxu1 }
 0x48f   : > { %v3698_v17 = vadd.f32 %v9208_v13, %v3697_v31  ;;  %v5102_v31 = vld [vmem:[%s6402_s29 + $0x1f0] sm:$0xff] }
 0x490   : > { %v3837_v51 = vrot.slane %v3787_v62, 1  ;;  %4838 = vmatmul.msk.bf16.gmra.mxu3 %vm10354_vm7, %v5102_v31  ;;  %vm4349_vm7 = vcmask 982016  }
 0x492   : > { %v3838_v59 = vsel %vm10347_vm12, %v3835_v7, %v3837_v51  ;;  %vm3969_vm12 = vcmask 523264  }
 0x493   : > { %v3885_v12 = vmax.f32 %v3786_v27, %v3838_v59  ;;  %v3756_v2 = vpop.f32.mrf.mxu2 }
 0x494   : > { %v3757_v56 = vadd.f32 %v3756_v2, %v3698_v17  ;;  %v5117_v2 = vld [vmem:[%s9581_s5 + $0x10] sm:$0xff] }
 0x495   : > { %v3899_v36 = vmax.f32 %v3883_v14, %v3885_v12  ;;  %4239 = vmatpush.bf16.msrb.mxu3 %v5117_v2 }
 0x496   : > { %v3788_v34 = vmax.f32 %v3757_v56, 0.0  ;;  %v3699_v0 = vpop.f32.mrf.mxu1  ;;  %v5116_v56 = vld [vmem:[%s9581_s5 + $0x8] sm:$0xff] }
 0x497   : > { %v6179_v25 = vpack.i.bf16 %v3899_v36, %v3910_v41  ;;  %v3944_v10 = vrot.slane %v3899_v36, 2  ;;  %v3700_v11 = vadd.f32 %v9208_v13, %v3699_v0  ;;  %v3948_v28 = vrot.slane %v3899_v36, 4 }
 0x498   : > { %v3839_v38 = vrot.slane %v3788_v34, 1  ;;  %v3952_v29 = vrot.slane %v3899_v36, 6 }
 0x499   : > { %6180 = vrot.lane.b32.xlu0 %v6179_v25, %s6276_s13  ;;  %v6184_v4 = vpack.i.bf16 %v3944_v10, %v3914_v1  ;;  %4240 = vmatpush.bf16.msrb.mxu3 %v5116_v56  ;;  %v5130_v1 = vld [vmem:[%s9581_s5 + $0x78] sm:$0xff] }
 0x49a   : > { %v3840_v42 = vsel %vm10349_vm13, %v3837_v51, %v3839_v38  ;;  %vm3971_vm13 = vcmask 654336  }
 0x49b   : > { %v3886_v63 = vmax.f32 %v3787_v62, %v3840_v42  ;;  %v3758_v9 = vpop.f32.mrf.mxu2  ;;  %6185 = vrot.lane.b32.xlu1 %v6184_v4, %s9936_s16  ;;  %v5129_v4 = vld [vmem:[%s9581_s5 + $0x70] sm:$0xff] }
 0x49c   : > { %v3759_v37 = vadd.f32 %v3758_v9, %v3700_v11  ;;  %v5128_v9 = vld [vmem:[%s9581_s5 + $0x68] sm:$0xff] }
 0x49d   : > { %v3900_v3 = vmax.f32 %v3884_v22, %v3886_v63 }
 0x49e   : > { %v3702_v45 = vpop.f32.mrf.mxu1  ;;  %v3789_v48 = vmax.f32 %v3759_v37, 0.0 }
 0x49f   : > { %3957 = vrot.lane.b32.xlu2 %v3900_v3, %s6272_s17  ;;  %v3703_v32 = vadd.f32 %v9208_v13, %v3702_v45 }
 0x4a0   : > { %v3841_v35 = vrot.slane %v3789_v48, 1  ;;  %4839 = vmatmul.msk.bf16.gmra.mxu3 %vm10355_vm8, %v5103_v53  ;;  %vm4436_vm8 = vcmask 73728  }
 0x4a1   : > { %3923 = vrot.lane.b32.xlu0 %v9335_v24, %s6277_s30 }
 0x4a2   : > { %v3842_v15 = vsel %vm10350_vm1, %v3839_v38, %v3841_v35  ;;  %vm3974_vm1 = vcmask 916480  }
 0x4a3   : > { %v3761_v49 = vpop.f32.mrf.mxu2  ;;  %3927 = vrot.lane.b32.xlu1 %v3926_v55, %s6272_s17  ;;  %v3887_v47 = vmax.f32 %v3788_v34, %v3842_v15  ;;  %v5115_v34 = vld [vmem:[%s9581_s5] sm:$0xff]  ;;  %v5125_v15 = vld [vmem:[%s9581_s5 + $0x50] sm:$0xff] }
 0x4a4   : > { %v3762_v21 = vadd.f32 %v3761_v49, %v3703_v32  ;;  %4241 = vmatpush.bf16.msrb.mxu3 %v5115_v34  ;;  %v5127_v32 = vld [vmem:[%s9581_s5 + $0x60] sm:$0xff] }
 0x4a6   : > { %v3704_v8 = vpop.f32.mrf.mxu1  ;;  %v3790_v39 = vmax.f32 %v3762_v21, 0.0  ;;  %v5126_v21 = vld [vmem:[%s9581_s5 + $0x58] sm:$0xff] }
 0x4a7   : > { %v3705_v18 = vadd.f32 %v9208_v13, %v3704_v8 }
 0x4a8   : > { %v3843_v43 = vrot.slane %v3790_v39, 1  ;;  %4247 = vmatpush.bf16.msra.mxu3 %v5130_v1 }
 0x4a9   : > { %3949 = vrot.lane.b32.xlu0 %v3948_v28, %s6273_s23 }
 0x4aa   : > { %v3844_v58 = vsel %vm10352_vm2, %v3841_v35, %v3843_v43  ;;  %vm10360_vm2 = vmmov %vm10358_vm14 }
 0x4ab   : > { %v3763_v30 = vpop.f32.mrf.mxu2  ;;  %3953 = vrot.lane.b32.xlu1 %v3952_v29, %s6277_s30  ;;  %v3888_v7 = vmax.f32 %v3789_v48, %v3844_v58 }
 0x4ac   : > { %v3764_v26 = vadd.f32 %v3763_v30, %v3705_v18  ;;  %4248 = vmatpush.bf16.msra.mxu3 %v5129_v4  ;;  %v5137_v4 = vld [vmem:[%s9581_s5 + $0xb0] sm:$0xff] }
 0x4ae   : > { %v3791_v20 = vmax.f32 %v3764_v26, 0.0 }
 0x4b0   : > { %v3845_v23 = vrot.slane %v3791_v20, 1  ;;  %4249 = vmatpush.bf16.msra.mxu3 %v5128_v9 }
 0x4b2   : > { %v3846_v46 = vsel %vm10351_vm15, %v3843_v43, %v3845_v23  ;;  %vm10359_vm15 = vmmov %vm10358_vm14 }
 0x4b3   : > { %v3889_v6 = vmax.f32 %v3790_v39, %v3846_v46 }
 0x4b4   : > { %4250 = vmatpush.bf16.msra.mxu3 %v5127_v32 }
 0x4b5   : > { %v9368_v50 = vmax.f32 %v3887_v47, %v3889_v6 }
 0x4b6   : > { %v3920_v55 = vpop.permute.xlu2 %3919 }
 0x4b7   : > { %3961 = vrot.lane.b32.xlu0 %v9368_v50, %s6275_s24  ;;  %v3983_v16 = vrot.slane %v9368_v50, 2  ;;  %v3987_v5 = vrot.slane %v9368_v50, 4 }
 0x4b8   : > { %4251 = vmatpush.bf16.msra.mxu3 %v5126_v21 }
 0x4b9   : > { %3984 = vrot.lane.b32.xlu1 %v3983_v16, %s6274_s22  ;;  %3988 = vrot.lane.b32.xlu2 %v3987_v5, %s6276_s13  ;;  %v5124_v5 = vld [vmem:[%s9581_s5 + $0x48] sm:$0xff]  ;;  %s377_s22 = sand.u32 1, %s6246_s18  }
 0x4ba   : > { %s378_s25 = scalar_lea.vmem [#allocation2], %s377_s22  ;;  %s4439_s13 = scalar_lea.sflag [#allocation3], %s377_s22 }
 0x4bb   : > { %s4449_s12 = sshll.u32 %s378_s25, 4  ;;  %s4450_s12 = int_to_ptr.vmem [resolvable:$true] %s4449_s12 }
 0x4bc   : > { %4252 = vmatpush.bf16.msra.mxu3 %v5125_v15 }
 0x4c0   : > { %4253 = vmatpush.bf16.msra.mxu3 %v5124_v5  ;;  %v4302_v5 = vld [vmem:[%s9583_s7 + $0x38] sm:$0xf] }
 0x4d3   : > { %v3707_v44 = vpop.f32.mrf.mxu1 }
 0x4d4   : > { %v3708_v40 = vadd.f32 %v9208_v13, %v3707_v44 }
 0x4d8   : > { %v3766_v61 = vpop.f32.mrf.mxu2 }
 0x4d9   : > { %v3767_v19 = vadd.f32 %v3766_v61, %v3708_v40  ;;  %v5123_v61 = vld [vmem:[%s9581_s5 + $0x40] sm:$0xff] }
 0x4da   : > { %4254 = vmatpush.bf16.msra.mxu3 %v5123_v61 }
 0x4db   : > { %v3792_v27 = vmax.f32 %v3767_v19, 0.0  ;;  %v3709_v12 = vpop.f32.mrf.mxu1  ;;  %v6176_v18 = vpop.permute.xlu2 %6175 }
 0x4dc   : > { %v3710_v36 = vadd.f32 %v9208_v13, %v3709_v12 }
 0x4dd   : > { %v3847_v62 = vrot.slane %v3792_v27, 1 }
 0x4df   : > { %v3848_v54 = vsel %vm10353_vm6, %v3845_v23, %v3847_v62  ;;  %vm4419_vm6 = vcmask 1041408  }
 0x4e0   : > { %v3890_v51 = vmax.f32 %v3791_v20, %v3848_v54  ;;  %v3768_v14 = vpop.f32.mrf.mxu2  ;;  %v6177_v20 = vunpack.i.l.bf16 %v6176_v18 }
 0x4e1   : > { %v3769_v41 = vadd.f32 %v3768_v14, %v3710_v36  ;;  %v3934_v14 = vrot.slane %v9335_v24, 6 }
 0x4e2   : > { %v3902_v59 = vmax.f32 %v3888_v7, %v3890_v51  ;;  %v3965_v6 = vsel %vm3964_vm11, %v9324_v52, %v6177_v20 }
 0x4e3   : > { %v3793_v33 = vmax.f32 %v3769_v41, 0.0  ;;  %v3932_v31 = vpop.permute.xlu2 %3931 }
 0x4e4   : > { %v3992_v17 = vrot.slane %v3902_v59, 6  ;;  %v6178_v59 = vunpack.i.h.bf16 %v6176_v18 }
 0x4e5   : > { %v3849_v42 = vrot.slane %v3793_v33, 1 }
 0x4e6   : > { %3993 = vrot.lane.b32.xlu0 %v3992_v17, %s9936_s16  ;;  %v3976_v12 = vsel %vm3964_vm11, %v3934_v14, %v6178_v59  ;;  %v5143_v14 = vld [vmem:[%s9583_s7 + $0x18] sm:$0xff] }
 0x4e7   : > { %v3850_v28 = vsel %vm10356_vm9, %v3847_v62, %v3849_v42 }
 0x4e8   : > { %v3771_v0 = vpop.f32.mrf.mxu2  ;;  %v3891_v30 = vmax.f32 %v3792_v27, %v3850_v28 }
 0x4f0   : > { %v3773_v11 = vpop.f32.mrf.mxu2 }
 0x4f4   : > { %v3712_v25 = vpop.f32.mrf.mxu1 }
 0x4f5   : > { %v3713_v10 = vadd.f32 %v9208_v13, %v3712_v25 }
 0x4f7   : > { %v3772_v38 = vadd.f32 %v3771_v0, %v3713_v10 }
 0x4f9   : > { %v3794_v60 = vmax.f32 %v3772_v38, 0.0  ;;  %v3958_v25 = vpop.permute.xlu2 %3957  ;;  %v5138_v38 = vld [vmem:[%s9581_s5 + $0xb8] sm:$0xff] }
 0x4fb   : > { %v3851_v22 = vrot.slane %v3794_v60, 1 }
 0x4fc   : > { %v3714_v63 = vpop.f32.mrf.mxu1 }
 0x4fd   : > { %v3852_v3 = vsel %vm10342_vm0, %v3849_v42, %v3851_v22  ;;  %v3715_v45 = vadd.f32 %v9208_v13, %v3714_v63  ;;  %v5135_v42 = vld [vmem:[%s9581_s5 + $0xa0] sm:$0xff]  ;;  %v5133_v63 = vld [vmem:[%s9581_s5 + $0x90] sm:$0xff] }
 0x4fe   : > { %v9409_v49 = vmax.f32 %v3793_v33, %v3852_v3  ;;  %v5132_v3 = vld [vmem:[%s9581_s5 + $0x88] sm:$0xff] }
 0x4ff   : > { %v3774_v37 = vadd.f32 %v3773_v11, %v3715_v45  ;;  %v5139_v11 = vld [vmem:[%s9581_s5 + $0xc0] sm:$0xff] }
 0x501   : > { %v3795_v8 = vmax.f32 %v3774_v37, 0.0 }
 0x503   : > { %v3853_v48 = vrot.slane %v3795_v8, 1 }
 0x505   : > { %v3854_v13 = vsel %vm10357_vm10, %v3851_v22, %v3853_v48  ;;  %v9419_v29 = vmax.f32 %v3795_v8, %v3853_v48  ;;  %v5134_v22 = vld [vmem:[%s9581_s5 + $0x98] sm:$0xff] }
 0x506   : > { %v3893_v35 = vmax.f32 %v3794_v60, %v3854_v13  ;;  %v5136_v60 = vld [vmem:[%s9581_s5 + $0xa8] sm:$0xff] }
 0x507   : > { %v3904_v39 = vmax.f32 %v9409_v49, %v9419_v29  ;;  %v4080_v29 = vld [vmem:[%s9582_s6] sm:$0x1] }
 0x508   : > { %v3903_v26 = vmax.f32 %v3891_v30, %v3893_v35 }
 0x50a   : > { %4001 = vrot.lane.b32.xlu2 %v3903_v26, %s6277_s30  ;;  %v3997_v43 = vrot.slane %v3903_v26, 6  ;;  %v4004_v23 = vrot.slane %v3903_v26, 2  ;;  %v4008_v19 = vrot.slane %v3903_v26, 4  ;;  %s4447_s30 = scalar_lea.hbm %s9587_s11, %s6359_s21 }
 0x50b   : > { %v6181_v46 = vpop.permute.xlu0 %6180  ;;  %s4451_s29 = sshll.u32 %s4447_s30, 4  ;;  %s4452_s29 = int_to_ptr.hbm [resolvable:$true] %s4451_s29 }
 0x50c   : > { %v6182_v47 = vunpack.i.l.bf16 %v6181_v46  ;;  %3998 = vrot.lane.b32.xlu1 %v3997_v43, %s6273_s23  ;;  %4005 = vrot.lane.b32.xlu0 %v4004_v23, %s6272_s17  ;;  %v6183_v17 = vunpack.i.h.bf16 %v6181_v46  ;;  %s6206_s28 = sshra.s32 %s4452_s29, 4  ;;  %s6207_s28 = int_to_ptr.hbm [resolvable:$true] %s6206_s28 }
 0x50d   : > { %v6186_v16 = vpop.permute.xlu1 %6185  ;;  %s6208_s15 = scalar_lea.hbm %s6207_s28, 1  ;;  %p6213_p0 = scmp.lt.s32.totalorder %s6207_s28, %s9587_s11 }
 0x50e   : > { %v3967_v57 = vsel %vm3966_vm5, %v3965_v6, %v6182_v47  ;;  %v6187_v44 = vunpack.i.l.bf16 %v6186_v16  ;;  %v6188_v2 = vunpack.i.h.bf16 %v6186_v16  ;;  %v3977_v53 = vsel %vm3966_vm5, %v3976_v12, %v6183_v17  ;;  %v5142_v12 = vld [vmem:[%s9583_s7 + $0x10] sm:$0xff]  ;;  %p6209_p11 = scmp.ne.s32.totalorder %s6207_s28, %s6208_s15  ;;  %p6214_p1 = scmp.lt.s32.totalorder %s6212_s1, %s6208_s15 }
 0x50f   : > { %v4013_v6 = vrot.slane %v3904_v39, 6 }
 0x510   : > { %v3968_v40 = vsel %vm10358_vm14, %v3967_v57, %v6187_v44  ;;  %v3978_v36 = vsel %vm10359_vm15, %v3977_v53, %v6188_v2  ;;  %v4333_v57 = vunpack.c.l.b16 %v4302_v5  ;;  %v5141_v2 = vld [vmem:[%s9583_s7 + $0x8] sm:$0xff]  ;;  %v5140_v53 = vld [vmem:[%s9583_s7] sm:$0xff]  ;;  %p6210_p12 = pnand %p6209_p11, %p6376_p5  ;;  %p6215_p2 = por %p6214_p1, %p6213_p0 }
 0x511   : > { %v3970_v27 = vsel %vm3969_vm12, %v3968_v40, %v3920_v55  ;;  %v5131_v55 = vld [vmem:[%s9581_s5 + $0x80] sm:$0xff]  ;;  %v4023_v16 = vrot.slane %v4013_v6, 2 }
 0x512   : > { %v4341_v40 = vpack.c.b16 %v4333_v57, %v4333_v57  ;;  %p6211_p13 = pneg %p6210_p12 }
 0x513   : > { %v3924_v52 = vpop.permute.xlu0 %3923  ;;  %v1359_v9 = vpop.f32.mrf.mxu3  ;;  %v4029_v44 = vpack.c.bf16 %v4023_v16, %v4023_v16 }
 0x514   : > { %v3972_v58 = vsel %vm3971_vm13, %v3970_v27, %v3924_v52  ;;  %4009 = vrot.lane.b32.xlu1 %v4008_v19, %s6275_s24  ;;  %v3989_v8 = vpop.permute.xlu2 %3988  ;;  %v5146_v52 = vld [vmem:[%s9583_s7 + $0x30] sm:$0xff]  ;;  %p6216_p3 = pnand %p6215_p2, %p6211_p13 }
 0x515   : > { %v3928_v62 = vpop.permute.xlu1 %3927 }
 0x516   : > { %v3973_v54 = vsel %vm3502_vm3, %v3972_v58, %v3928_v62 }
 0x517   : > { %v3975_v7 = vsel %vm3974_vm1, %v3973_v54, %v3932_v31  ;;  %v5145_v31 = vld [vmem:[%s9583_s7 + $0x28] sm:$0xff] }
 0x518   : > { %v4026_v51 = vpack.c.bf16 %v3975_v7, %v3975_v7  ;;  %v4381_v54 = vld [vmem:[%s9585_s9 + $0x28] sm:$0x3] }
 0x519   : > { %v4404_v7 = vunpack.c.l.b16 %v4381_v54 }
 0x51a   : > { %4242 = vmatmul.bf16.vlgmr.msrb.gmra.mxu3 %v4026_v51  ;;  %v5144_v51 = vld [vmem:[%s9583_s7 + $0x20] sm:$0xff] }
 0x51b   : > { %v3950_v56 = vpop.permute.xlu0 %3949  ;;  %4260 = vmatpush.bf16.msrb.mxu3 %v5138_v38  ;;  %v1360_v45 = vpop.f32.mrf.mxu3  ;;  %v4410_v59 = vpack.c.b16 %v4404_v7, %v4404_v7 }
 0x51c   : > { %v3979_v41 = vsel %vm3969_vm12, %v3978_v36, %v3950_v56  ;;  %v5151_v56 = vld [vmem:[%s9585_s9 + $0x20] sm:$0xff]  ;;  %v5150_v36 = vld [vmem:[%s9585_s9 + $0x18] sm:$0xff] }
 0x51d   : > { %v3954_v34 = vpop.permute.xlu1 %3953  ;;  %v4421_v17 = vsel %vm4419_vm6, %v4410_v59, 0 }
 0x51e   : > { %v3980_v0 = vsel %vm3971_vm13, %v3979_v41, %v3954_v34  ;;  %4425 = vmatpush.bf16.msra.mxu2 %v4421_v17  ;;  %v5149_v41 = vld [vmem:[%s9585_s9 + $0x10] sm:$0xff] }
 0x51f   : > { %v3981_v10 = vsel %vm3502_vm3, %v3980_v0, %v3958_v25  ;;  %4261 = vmatpush.bf16.msrb.mxu3 %v5137_v4  ;;  %v5148_v0 = vld [vmem:[%s9585_s9 + $0x8] sm:$0xff]  ;;  %v5147_v25 = vld [vmem:[%s9585_s9] sm:$0xff] }
 0x522   : > { %4426 = vmatpush.bf16.msra.mxu2 %v5151_v56 }
 0x523   : > { %4262 = vmatpush.bf16.msrb.mxu3 %v5136_v60  ;;  %v1362_v37 = vpop.f32.mrf.mxu3 }
 0x526   : > { %4427 = vmatpush.bf16.msra.mxu2 %v5150_v36 }
 0x527   : > { %4263 = vmatpush.bf16.msrb.mxu3 %v5135_v42  ;;  %v4303_v42 = vld [vmem:[%s9584_s8] sm:$0x1] }
 0x529   : > { %v3962_v1 = vpop.permute.xlu0 %3961 }
 0x52a   : > { %v3982_v33 = vsel %vm3974_vm1, %v3981_v10, %v3962_v1  ;;  %4428 = vmatpush.bf16.msra.mxu2 %v5149_v41 }
 0x52b   : > { %v4027_v24 = vpack.c.bf16 %v3982_v33, %v3982_v33  ;;  %4264 = vmatpush.bf16.msrb.mxu3 %v5134_v22  ;;  %v3985_v32 = vpop.permute.xlu1 %3984  ;;  %v1363_v48 = vpop.f32.mrf.mxu3 }
 0x52c   : > { %v4014_v28 = vsel %vm3964_vm11, %v9368_v50, %v3985_v32 }
 0x52d   : > { %4255 = vmatmul.bf16.vlgmr.msra.gmra.mxu3 %v4027_v24  ;;  %v4015_v13 = vsel %vm3966_vm5, %v4014_v28, %v3989_v8 }
 0x52e   : > { %4429 = vmatpush.bf16.msra.mxu2 %v5148_v0 }
 0x52f   : > { %4265 = vmatpush.bf16.msrb.mxu3 %v5133_v63 }
 0x532   : > { %4430 = vmatpush.bf16.msra.mxu2 %v5147_v25 }
 0x533   : > { %4266 = vmatpush.bf16.msrb.mxu3 %v5132_v3 }
 0x537   : > { %4267 = vmatpush.bf16.msrb.mxu3 %v5131_v55  ;;  %v4382_v55 = vld [vmem:[%s9586_s10] sm:$0x1] }
 0x53b   : > { %4280 = vmatpush.bf16.msra.mxu3 %v5139_v11 }
 0x558   : > { %v3994_v21 = vpop.permute.xlu0 %3993 }
 0x559   : > { %v4016_v30 = vsel %vm10360_vm2, %v4015_v13, %v3994_v21 }
 0x564   : > { %v4002_v26 = vpop.permute.xlu2 %4001 }
 0x57e   : > { %v3999_v18 = vpop.permute.xlu1 %3998  ;;  %v4006_v15 = vpop.permute.xlu0 %4005 }
 0x57f   : > { %v4017_v35 = vsel %vm3969_vm12, %v4016_v30, %v3999_v18 }
 0x580   : > { %v4018_v20 = vsel %vm3971_vm13, %v4017_v35, %v4002_v26 }
 0x581   : > { %v4019_v43 = vsel %vm3502_vm3, %v4018_v20, %v4006_v15  ;;  %vm10361_vm3 = vcmask 1043456  }
 0x582   : > { %v4354_v19 = vsel %vm10361_vm3, %v4341_v40, 0 }
 0x586   : > { %v4010_v23 = vpop.permute.xlu1 %4009 }
 0x587   : > { %v4020_v46 = vsel %vm3974_vm1, %v4019_v43, %v4010_v23 }
 0x588   : > { %v4022_v47 = vrot.slane %v4020_v46, 2 }
 0x58a   : > { %v4028_v50 = vpack.c.bf16 %v4022_v47, %v4022_v47 }
 0x58c   : > { %4268 = vmatmul.bf16.vlgmr.msrb.gmra.mxu3 %v4028_v50 }
 0x58d   : > { %4356 = vmatpush.bf16.msrb.mxu3 %v4354_v19 }
 0x591   : > { %4357 = vmatpush.bf16.msrb.mxu3 %v5146_v52 }
 0x595   : > { %4358 = vmatpush.bf16.msrb.mxu3 %v5145_v31 }
 0x599   : > { %4359 = vmatpush.bf16.msrb.mxu3 %v5144_v51 }
 0x59c   : > { %4986 = vmatmul.msk.bf16.vlgmr.msra.gmra.mxu3 %vm3964_vm11, %v4029_v44 }
 0x59d   : > { %v4243_v61 = vpop.f32.mrf.mxu3  ;;  %4360 = vmatpush.bf16.msrb.mxu3 %v5143_v14 }
 0x59e   : > { %v4244_v39 = vadd.f32 %v4243_v61, %v4080_v29 }
 0x5a1   : > { %4361 = vmatpush.bf16.msrb.mxu3 %v5142_v12 }
 0x5a5   : > { %v4245_v49 = vpop.f32.mrf.mxu3  ;;  %4362 = vmatpush.bf16.msrb.mxu3 %v5141_v2 }
 0x5a9   : > { %4363 = vmatpush.bf16.msrb.mxu3 %v5140_v53 }
 0x5b0   : > { %v4256_v27 = vpop.f32.mrf.mxu3 }
 0x5b1   : > { %v4257_v58 = vadd.f32 %v4256_v27, %v4244_v39 }
 0x5b8   : > { %v4258_v62 = vpop.f32.mrf.mxu3 }
 0x60f   : > { %v4269_v34 = vpop.f32.mrf.mxu3 }
 0x610   : > { %v4270_v10 = vadd.f32 %v4269_v34, %v4257_v58 }
 0x617   : > { %v4271_v1 = vpop.f32.mrf.mxu3 }
 0x61f   : > { %v4282_v33 = vpop.f32.mrf.mxu3 }
 0x620   : > { %v4283_v24 = vadd.f32 %v4282_v33, %v4270_v10 }
 0x622   : > { %v4286_v38 = vmax.f32 %v4283_v24, 0.0 }
 0x624   : > { %v4287_v4 = vpack.c.bf16 %v4286_v38, %v4286_v38 }
 0x626   : > { %5015 = vmatmul.msk.bf16.vlgmr.msrb.gmra.mxu3 %vm4349_vm7, %v4287_v4 }
 0x627   : > { %v4284_v60 = vpop.f32.mrf.mxu3 }
 0x6a9   : > { %v4365_v22 = vpop.f32.mrf.mxu3 }
 0x6aa   : > { %v4366_v63 = vadd.f32 %v4365_v22, %v4303_v42 }
 0x6ac   : > { %v4369_v9 = vmax.f32 %v4366_v63, 0.0 }
 0x6ae   : > { %v4370_v3 = vpack.c.bf16 %v4369_v9, %v4369_v9 }
 0x6b0   : > { %5036 = vmatmul.msk.bf16.vlgmr.msra.gmra.mxu2 %vm2950_vm4, %v4370_v3 }
 0x6b1   : > { %v4367_v45 = vpop.f32.mrf.mxu3 }
 0x733   : > { %v4432_v11 = vpop.f32.mrf.mxu2 }
 0x734   : > { %v4433_v37 = vadd.f32 %v4432_v11, %v4382_v55 }
 0x736   : > { %4437 = vst.msk [vmem:[%s378_s25] sm:$0x1] %vm4436_vm8, %v4433_v37 }
 0x737   : > { %6219 = shalt.err (!%p6216_p3)
}
 0x738   : > { %5158 = dma.vmem_to_hbm [thread:$0]  (%p6376_p5), %s4450_s12, 16, %s4452_s29, %s4439_s13  }
 0x73b   : > { %v4434_v32 = vpop.f32.mrf.mxu2 }
 0x73c PF: > { %s10362_s26 = sld [smem:[#allocation5_spill]]  ;;  %p5164_p4 = scmp.ge.s32.totalorder %s6254_s20, 2 }
 0x73e   : > { %p5161_p7 = pnand %p5164_p4, %p6380_p6 }
 0x740   : > { %p5162_p8 = pneg %p5161_p7 }
 0x742   : > { %s4463_s22 = sand.u32 1, %s10362_s26  }
 0x743   : > { %s4464_s16 = scalar_lea.sflag [#allocation3], %s4463_s22 }
 0x744   : > { %6237 = dma.done.wait (%p5162_p8), %s4464_s16, 16  }
 0x745   : > { %6239 = vsyncadd (%p5162_p8), %s4464_s16, 4294967280  ;;  %s10364_s20 = sld [smem:[#allocation7_spill]]  ;;  %s10367_s17 = smov %s6246_s18 }
 0x746   : > { %s10365_s23 = sld [smem:[#allocation6_spill]] }
 0x747   : > { %s10366_s19 = sld [smem:[#allocation8_spill]] }
 0x74b   : > { %p21_p9 = scmp.ge.s32.totalorder %s10364_s20, 4  }
 0x74c   : > { %s10368_s18 = smov %s10365_s23 }
 0x74d   :  { %23 = sbr.rel (!%p21_p9) target bundleno = 7 (0x7), region = 99 }
 0x752   :  { %4469 = vsyncpa [#allocation3], 1 }
 0x753   :  { %4471 = vsyncpa [#allocation3 + $0x1], 1 }

</bundles_post_ra>
